<compile_context>
chip_gen: v6e
topology: v6e:2x2x1
jax: 0.10.0
libtpu: 0.0.40
codegen_flags: <defaults>
</compile_context>

<pallas_src>
import functools

import jax
import jax.numpy as jnp
from jax import lax
from jax.experimental import pallas as pl
from jax.experimental.pallas import tpu as pltpu

# ---------------- config (small, consistent with the module) ----------------
N_CLS = 8
PATCH = 4
D_ENC = 32
D_MODEL = 32
N_HEADS = 4
D_FF = 64
N_LAYERS = 2
LN_EPS = 1e-5
_INV_SQRT2 = 0.7071067811865476


# ---------------- in-kernel math helpers ----------------
def _layernorm(x, g, b, eps=LN_EPS):
    mu = jnp.mean(x, axis=-1, keepdims=True)
    var = jnp.mean((x - mu) ** 2, axis=-1, keepdims=True)
    return (x - mu) * lax.rsqrt(var + eps) * g + b


def _softmax(s):
    m = jnp.max(s, axis=-1, keepdims=True)
    e = jnp.exp(s - m)
    # reciprocal goes to the (otherwise idle) EUP slot
    return e * pl.reciprocal(jnp.sum(e, axis=-1, keepdims=True), approx=True)


def _erf(x):
    # Abramowitz & Stegun 7.1.26 rational approximation (|err| < 1.5e-7),
    # built only from exp/mul/add which lower cleanly on TPU.
    a1, a2, a3, a4, a5 = 0.254829592, -0.284496736, 1.421413741, -1.453152027, 1.061405429
    p = 0.3275911
    ax = jnp.abs(x)
    t = 1.0 / (1.0 + p * ax)
    poly = ((((a5 * t + a4) * t + a3) * t + a2) * t + a1) * t
    y = 1.0 - poly * jnp.exp(-ax * ax)
    return jnp.where(x < 0, -y, y)


def _gelu(x):
    # exact (erf-based) GELU, matching torch.nn.GELU() default
    return 0.5 * x * (1.0 + _erf(x * _INV_SQRT2))


# ---------------- fused Pallas kernel (one batch element per grid step) ----------------
def _fused_kernel(x_ref, pdw_ref, add_ref, qkvw_ref, qkvb_ref, projw_ref,
                  w1_ref, w2_ref, vec_ref, hvec_ref, pp_ref, pc_ref, o_ref,
                  *, n_layers, n_heads, n_cls):
    f32 = jnp.float32
    xin = x_ref[0]                       # (N_tok, D_ENC); cls rows are zero
    d = pdw_ref.shape[1]                 # D_MODEL
    hd = d // n_heads
    scale = hd ** -0.5
    dff = w1_ref.shape[-1]

    # proj_dec + cls-token append in one matmul:
    # add_ref rows 0..Np-1 = proj_dec bias, rows Np.. = cls_emb.
    x = jnp.dot(xin, pdw_ref[...], preferred_element_type=f32) + add_ref[...]

    def vrow(layer, r, w):
        # (1, w) lane-dense row from the packed per-layer vector slab
        return vec_ref[layer, r:r + 1, :w]

    for layer in range(n_layers):        # static unroll
        # ---- attention (pre-norm) ----
        h = _layernorm(x, vrow(layer, 0, d), vrow(layer, 1, d))
        attn_out = jnp.zeros_like(x)
        for hi in range(n_heads):        # static unroll; no lane slicing
            qh = jnp.dot(h, qkvw_ref[layer, 0, hi], preferred_element_type=f32) + qkvb_ref[layer, 0, hi]
            kh = jnp.dot(h, qkvw_ref[layer, 1, hi], preferred_element_type=f32) + qkvb_ref[layer, 1, hi]
            vh = jnp.dot(h, qkvw_ref[layer, 2, hi], preferred_element_type=f32) + qkvb_ref[layer, 2, hi]
            s = lax.dot_general(qh, kh, (((1,), (1,)), ((), ())),
                                preferred_element_type=f32) * scale          # (N, N)
            p = _softmax(s)
            ctx = jnp.dot(p, vh, preferred_element_type=f32)                 # (N, hd)
            # fold the output projection per head -> no concat of head outputs
            attn_out = attn_out + jnp.dot(ctx, projw_ref[layer, hi],
                                          preferred_element_type=f32)        # (N, d)
        x = x + attn_out + vrow(layer, 2, d)          # + proj bias, residual

        # ---- MLP (pre-norm) ----
        h2 = _layernorm(x, vrow(layer, 3, d), vrow(layer, 4, d))
        h2 = _gelu(jnp.dot(h2, w1_ref[layer], preferred_element_type=f32) + vrow(layer, 5, dff))
        h2 = jnp.dot(h2, w2_ref[layer], preferred_element_type=f32) + vrow(layer, 6, d)
        x = x + h2

    # ---- segmentation head ----
    x = _layernorm(x, hvec_ref[0:1, :d], hvec_ref[1:2, :d])       # decoder_norm
    n_tok = x.shape[0]
    patches = x[: n_tok - n_cls]                                  # sublane slice (cheap)
    cls_feat = x[n_tok - n_cls:]
    patches = jnp.dot(patches, pp_ref[...], preferred_element_type=f32)
    cls_feat = jnp.dot(cls_feat, pc_ref[...], preferred_element_type=f32)
    patches = patches * lax.rsqrt(jnp.sum(patches * patches, axis=-1, keepdims=True))
    cls_feat = cls_feat * lax.rsqrt(jnp.sum(cls_feat * cls_feat, axis=-1, keepdims=True))
    masks = lax.dot_general(patches, cls_feat, (((1,), (1,)), ((), ())),
                            preferred_element_type=f32)            # (Np, n_cls)
    o_ref[0] = _layernorm(masks, hvec_ref[2:3, :n_cls], hvec_ref[3:4, :n_cls])


# ---------------- wrapper: parameter packing + pallas_call ----------------
def _pack_params(params, n_patches):
    D, NH, HD = D_MODEL, N_HEADS, D_MODEL // N_HEADS
    qkvw, qkvb, projw, w1s, w2s, vecs = [], [], [], [], [], []
    for p in params["blocks"]:
        wq, wk, wv = jnp.split(p["wqkv"], 3, axis=1)               # (D, D) each
        per_head_w = jnp.stack(
            [w.reshape(D, NH, HD).transpose(1, 0, 2) for w in (wq, wk, wv)], axis=0)  # (3,NH,D,HD)
        bq, bk, bv = jnp.split(p["bqkv"], 3)
        per_head_b = jnp.stack(
            [b.reshape(NH, 1, HD) for b in (bq, bk, bv)], axis=0)                     # (3,NH,1,HD)
        qkvw.append(per_head_w)
        qkvb.append(per_head_b)
        projw.append(p["wproj"].reshape(NH, HD, D))                                   # row blocks
        w1s.append(p["w1"])
        w2s.append(p["w2"])
        vec = jnp.zeros((8, 128), jnp.float32)
        vec = vec.at[0, :D].set(p["ln1_g"])
        vec = vec.at[1, :D].set(p["ln1_b"])
        vec = vec.at[2, :D].set(p["bproj"])
        vec = vec.at[3, :D].set(p["ln2_g"])
        vec = vec.at[4, :D].set(p["ln2_b"])
        vec = vec.at[5, :D_FF].set(p["b1"])
        vec = vec.at[6, :D].set(p["b2"])
        vecs.append(vec)
    hvec = jnp.zeros((8, 128), jnp.float32)
    hvec = hvec.at[0, :D].set(params["dn_g"])
    hvec = hvec.at[1, :D].set(params["dn_b"])
    hvec = hvec.at[2, :N_CLS].set(params["mn_g"])
    hvec = hvec.at[3, :N_CLS].set(params["mn_b"])
    # additive slab: proj_dec bias for patch rows, cls_emb for class rows
    add = jnp.concatenate(
        [jnp.broadcast_to(params["proj_dec_b"], (n_patches, D)), params["cls_emb"][0]], axis=0)
    return {
        "pdw": params["proj_dec_w"], "add": add,
        "qkvw": jnp.stack(qkvw), "qkvb": jnp.stack(qkvb), "projw": jnp.stack(projw),
        "w1": jnp.stack(w1s), "w2": jnp.stack(w2s), "vec": jnp.stack(vecs),
        "hvec": hvec, "pp": params["proj_patch"], "pc": params["proj_classes"],
    }


def _fused_call(x_pad, pk, n_patches):
    B, NT, _ = x_pad.shape
    D = D_MODEL

    def const(shape):
        return pl.BlockSpec(shape, lambda b, _s=len(shape): (0,) * _s)

    kernel = functools.partial(_fused_kernel, n_layers=N_LAYERS,
                               n_heads=N_HEADS, n_cls=N_CLS)
    return pl.pallas_call(
        kernel,
        out_shape=jax.ShapeDtypeStruct((B, n_patches, N_CLS), jnp.float32),
        grid=(B,),
        in_specs=[
            pl.BlockSpec((1, NT, D_ENC), lambda b: (b, 0, 0)),
            const((D_ENC, D)),
            const((NT, D)),
            const(pk["qkvw"].shape),
            const(pk["qkvb"].shape),
            const(pk["projw"].shape),
            const(pk["w1"].shape),
            const(pk["w2"].shape),
            const(pk["vec"].shape),
            const(pk["hvec"].shape),
            const((D, D)),
            const((D, D)),
        ],
        out_specs=pl.BlockSpec((1, n_patches, N_CLS), lambda b: (b, 0, 0)),
        compiler_params=pltpu.CompilerParams(dimension_semantics=("parallel",)),
    )(x_pad, pk["pdw"], pk["add"], pk["qkvw"], pk["qkvb"], pk["projw"],
      pk["w1"], pk["w2"], pk["vec"], pk["hvec"], pk["pp"], pk["pc"])


def mask_transformer_forward(x, params, im_size):
    H, W = im_size
    GS = H // PATCH
    B, Np, _ = x.shape
    pk = _pack_params(params, Np)
    # zero-pad the class-token rows so proj_dec + cls append fuse into one matmul
    x_pad = jnp.concatenate([x, jnp.zeros((B, N_CLS, D_ENC), x.dtype)], axis=1)
    masks = _fused_call(x_pad, pk, Np)                 # (B, Np, n_cls)
    # rearrange 'b (h w) n -> b n h w' (layout plumbing, stays in JAX)
    return masks.reshape(B, GS, GS, N_CLS).transpose(0, 3, 1, 2)


# ---------------- pure-JAX reference for verification ----------------
def reference_forward(x, params, im_size):
    HIGH = jax.lax.Precision.HIGHEST

    def ln(y, g, b):
        mu = y.mean(-1, keepdims=True)
        var = ((y - mu) ** 2).mean(-1, keepdims=True)
        return (y - mu) / jnp.sqrt(var + LN_EPS) * g + b

    H, W = im_size
    GS = H // PATCH
    B = x.shape[0]
    x = jnp.einsum("bnd,de->bne", x, params["proj_dec_w"], precision=HIGH) + params["proj_dec_b"]
    cls = jnp.broadcast_to(params["cls_emb"], (B, N_CLS, D_MODEL))
    x = jnp.concatenate([x, cls], axis=1)
    hd = D_MODEL // N_HEADS
    for p in params["blocks"]:
        h = ln(x, p["ln1_g"], p["ln1_b"])
        Bc, Nc, _ = h.shape
        qkv = jnp.einsum("bnd,de->bne", h, p["wqkv"], precision=HIGH) + p["bqkv"]
        qkv = qkv.reshape(Bc, Nc, 3, N_HEADS, hd).transpose(2, 0, 3, 1, 4)
        q, k, v = qkv[0], qkv[1], qkv[2]
        attn = jnp.einsum("bhqd,bhkd->bhqk", q, k, precision=HIGH) * (hd ** -0.5)
        attn = jax.nn.softmax(attn, axis=-1)
        o = jnp.einsum("bhqk,bhkd->bhqd", attn, v, precision=HIGH)
        o = o.transpose(0, 2, 1, 3).reshape(Bc, Nc, D_MODEL)
        o = jnp.einsum("bnd,de->bne", o, p["wproj"], precision=HIGH) + p["bproj"]
        x = x + o
        h2 = ln(x, p["ln2_g"], p["ln2_b"])
        h2 = jax.nn.gelu(
            jnp.einsum("bnd,df->bnf", h2, p["w1"], precision=HIGH) + p["b1"],
            approximate=False,
        )
        h2 = jnp.einsum("bnf,fd->bnd", h2, p["w2"], precision=HIGH) + p["b2"]
        x = x + h2
    x = ln(x, params["dn_g"], params["dn_b"])
    patches, cls_feat = x[:, :-N_CLS], x[:, -N_CLS:]
    patches = jnp.einsum("bnd,de->bne", patches, params["proj_patch"], precision=HIGH)
    cls_feat = jnp.einsum("bnd,de->bne", cls_feat, params["proj_classes"], precision=HIGH)
    patches = patches / jnp.linalg.norm(patches, axis=-1, keepdims=True)
    cls_feat = cls_feat / jnp.linalg.norm(cls_feat, axis=-1, keepdims=True)
    masks = jnp.einsum("bnd,bkd->bnk", patches, cls_feat, precision=HIGH)
    masks = ln(masks, params["mn_g"], params["mn_b"])
    return masks.reshape(B, GS, GS, N_CLS).transpose(0, 3, 1, 2)


# ---------------- deterministic parameter init ----------------
def init_params(key):
    n_rand = 4 + 4 * N_LAYERS
    keys = iter(jax.random.split(key, n_rand))
    scale = D_MODEL ** (-0.5)
    nrm = lambda k, shape, std=0.02: std * jax.random.normal(k, shape, jnp.float32)
    params = {
        "proj_dec_w": nrm(next(keys), (D_ENC, D_MODEL)),
        "proj_dec_b": jnp.zeros((D_MODEL,), jnp.float32),
        "cls_emb": nrm(next(keys), (1, N_CLS, D_MODEL)),
        "proj_patch": scale * jax.random.normal(next(keys), (D_MODEL, D_MODEL), jnp.float32),
        "proj_classes": scale * jax.random.normal(next(keys), (D_MODEL, D_MODEL), jnp.float32),
        "dn_g": jnp.ones((D_MODEL,), jnp.float32),
        "dn_b": jnp.zeros((D_MODEL,), jnp.float32),
        "mn_g": jnp.ones((N_CLS,), jnp.float32),
        "mn_b": jnp.zeros((N_CLS,), jnp.float32),
        "blocks": [],
    }
    for _ in range(N_LAYERS):
        params["blocks"].append({
            "ln1_g": jnp.ones((D_MODEL,), jnp.float32),
            "ln1_b": jnp.zeros((D_MODEL,), jnp.float32),
            "wqkv": nrm(next(keys), (D_MODEL, 3 * D_MODEL)),
            "bqkv": jnp.zeros((3 * D_MODEL,), jnp.float32),
            "wproj": nrm(next(keys), (D_MODEL, D_MODEL)),
            "bproj": jnp.zeros((D_MODEL,), jnp.float32),
            "ln2_g": jnp.ones((D_MODEL,), jnp.float32),
            "ln2_b": jnp.zeros((D_MODEL,), jnp.float32),
            "w1": nrm(next(keys), (D_MODEL, D_FF)),
            "b1": jnp.zeros((D_FF,), jnp.float32),
            "w2": nrm(next(keys), (D_FF, D_MODEL)),
            "b2": jnp.zeros((D_MODEL,), jnp.float32),
        })
    return params


if __name__ == "__main__":
    key = jax.random.PRNGKey(0)
    kx, kp = jax.random.split(key)
    params = init_params(kp)

    B, H, W = 2, 16, 16
    GS = H // PATCH
    Np = GS * GS
    x = jax.random.normal(kx, (B, Np, D_ENC), jnp.float32)

    out = mask_transformer_forward(x, params, (H, W))
    out = jax.block_until_ready(out)
    assert out.shape == (B, N_CLS, GS, GS), out.shape

    ref = reference_forward(x, params, (H, W))
    err = float(jnp.max(jnp.abs(out - ref)))
    if not jnp.allclose(out, ref, atol=5e-3, rtol=5e-3):
        raise SystemExit(f"mismatch vs reference: max abs err {err:e}")

    print("KERNEL_OK")
</pallas_src>

<mosaic_0001>
module attributes {stable_mosaic.version = 11 : i64} {
  func.func @_fused_kernel(%arg0: i32, %arg1: memref<1x24x32xf32, #tpu.memory_space<vmem>>, %arg2: memref<32x32xf32, #tpu.memory_space<vmem>>, %arg3: memref<24x32xf32, #tpu.memory_space<vmem>>, %arg4: memref<2x3x4x32x8xf32, #tpu.memory_space<vmem>>, %arg5: memref<2x3x4x1x8xf32, #tpu.memory_space<vmem>>, %arg6: memref<2x4x8x32xf32, #tpu.memory_space<vmem>>, %arg7: memref<2x32x64xf32, #tpu.memory_space<vmem>>, %arg8: memref<2x64x32xf32, #tpu.memory_space<vmem>>, %arg9: memref<2x8x128xf32, #tpu.memory_space<vmem>>, %arg10: memref<8x128xf32, #tpu.memory_space<vmem>>, %arg11: memref<32x32xf32, #tpu.memory_space<vmem>>, %arg12: memref<32x32xf32, #tpu.memory_space<vmem>>, %arg13: memref<1x16x8xf32, #tpu.memory_space<vmem>>) attributes {dimension_semantics = [#tpu.dimension_semantics<parallel>], iteration_bounds = array<i64: 2>, scalar_prefetch = 0 : i64, scratch_operands = 0 : i64, tpu.core_type = #tpu.core_type<tc>, window_params = [{transform_indices = @transform_0, window_bounds = array<i64: 1, 24, 32>}, {pipeline_mode = #tpu.pipeline_mode<synchronous>, transform_indices = @transform_1, window_bounds = array<i64: 32, 32>}, {pipeline_mode = #tpu.pipeline_mode<synchronous>, transform_indices = @transform_2, window_bounds = array<i64: 24, 32>}, {pipeline_mode = #tpu.pipeline_mode<synchronous>, transform_indices = @transform_3, window_bounds = array<i64: 2, 3, 4, 32, 8>}, {pipeline_mode = #tpu.pipeline_mode<synchronous>, transform_indices = @transform_4, window_bounds = array<i64: 2, 3, 4, 1, 8>}, {pipeline_mode = #tpu.pipeline_mode<synchronous>, transform_indices = @transform_5, window_bounds = array<i64: 2, 4, 8, 32>}, {pipeline_mode = #tpu.pipeline_mode<synchronous>, transform_indices = @transform_6, window_bounds = array<i64: 2, 32, 64>}, {pipeline_mode = #tpu.pipeline_mode<synchronous>, transform_indices = @transform_7, window_bounds = array<i64: 2, 64, 32>}, {pipeline_mode = #tpu.pipeline_mode<synchronous>, transform_indices = @transform_8, window_bounds = array<i64: 2, 8, 128>}, {pipeline_mode = #tpu.pipeline_mode<synchronous>, transform_indices = @transform_9, window_bounds = array<i64: 8, 128>}, {pipeline_mode = #tpu.pipeline_mode<synchronous>, transform_indices = @transform_10, window_bounds = array<i64: 32, 32>}, {pipeline_mode = #tpu.pipeline_mode<synchronous>, transform_indices = @transform_11, window_bounds = array<i64: 32, 32>}, {transform_indices = @transform_12, window_bounds = array<i64: 1, 16, 8>}]} {
    %c0 = arith.constant 0 : index
    %c0_0 = arith.constant 0 : index
    %c0_1 = arith.constant 0 : index
    %0 = vector.load %arg1[%c0, %c0_0, %c0_1] : memref<1x24x32xf32, #tpu.memory_space<vmem>>, vector<1x24x32xf32>
    %1 = vector.shape_cast %0 : vector<1x24x32xf32> to vector<24x32xf32>
    %c0_2 = arith.constant 0 : index
    %c0_3 = arith.constant 0 : index
    %2 = vector.load %arg2[%c0_2, %c0_3] : memref<32x32xf32, #tpu.memory_space<vmem>>, vector<32x32xf32>
    %cst = arith.constant dense<0.000000e+00> : vector<24x32xf32>
    %3 = tpu.matmul %1, %2, %cst {dimension_numbers = #tpu.dot_dimension_numbers<[1], [0], [0], [1], [0, 0, 1, 1], [], []>} : vector<24x32xf32>, vector<32x32xf32>, vector<24x32xf32> -> vector<24x32xf32>
    %c0_4 = arith.constant 0 : index
    %c0_5 = arith.constant 0 : index
    %4 = vector.load %arg3[%c0_4, %c0_5] : memref<24x32xf32, #tpu.memory_space<vmem>>, vector<24x32xf32>
    %5 = arith.addf %3, %4 : vector<24x32xf32>
    %c0_6 = arith.constant 0 : index
    %c0_7 = arith.constant 0 : index
    %c0_8 = arith.constant 0 : index
    %6 = vector.load %arg9[%c0_6, %c0_7, %c0_8] : memref<2x8x128xf32, #tpu.memory_space<vmem>>, vector<1x1x32xf32>
    %7 = vector.shape_cast %6 : vector<1x1x32xf32> to vector<1x32xf32>
    %c0_9 = arith.constant 0 : index
    %c1 = arith.constant 1 : index
    %c0_10 = arith.constant 0 : index
    %8 = vector.load %arg9[%c0_9, %c1, %c0_10] : memref<2x8x128xf32, #tpu.memory_space<vmem>>, vector<1x1x32xf32>
    %9 = vector.shape_cast %8 : vector<1x1x32xf32> to vector<1x32xf32>
    %cst_11 = arith.constant dense<0.000000e+00> : vector<24xf32>
    %10 = vector.multi_reduction <add>, %5, %cst_11 [1] : vector<24x32xf32> to vector<24xf32>
    %11 = vector.shape_cast %10 : vector<24xf32> to vector<24x1xf32>
    %cst_12 = arith.constant 3.200000e+01 : f32
    %12 = vector.broadcast %cst_12 : f32 to vector<24x1xf32>
    %13 = arith.divf %11, %12 : vector<24x1xf32>
    %14 = vector.broadcast %13 : vector<24x1xf32> to vector<24x32xf32>
    %15 = arith.subf %5, %14 : vector<24x32xf32>
    %16 = arith.mulf %15, %15 : vector<24x32xf32>
    %cst_13 = arith.constant dense<0.000000e+00> : vector<24xf32>
    %17 = vector.multi_reduction <add>, %16, %cst_13 [1] : vector<24x32xf32> to vector<24xf32>
    %18 = vector.shape_cast %17 : vector<24xf32> to vector<24x1xf32>
    %cst_14 = arith.constant 3.200000e+01 : f32
    %19 = vector.broadcast %cst_14 : f32 to vector<24x1xf32>
    %20 = arith.divf %18, %19 : vector<24x1xf32>
    %21 = vector.broadcast %13 : vector<24x1xf32> to vector<24x32xf32>
    %22 = arith.subf %5, %21 : vector<24x32xf32>
    %cst_15 = arith.constant 9.99999974E-6 : f32
    %23 = vector.broadcast %cst_15 : f32 to vector<24x1xf32>
    %24 = arith.addf %20, %23 : vector<24x1xf32>
    %25 = math.rsqrt %24 : vector<24x1xf32>
    %26 = vector.broadcast %25 : vector<24x1xf32> to vector<24x32xf32>
    %27 = arith.mulf %22, %26 : vector<24x32xf32>
    %28 = vector.broadcast %7 : vector<1x32xf32> to vector<24x32xf32>
    %29 = arith.mulf %27, %28 : vector<24x32xf32>
    %30 = vector.broadcast %9 : vector<1x32xf32> to vector<24x32xf32>
    %31 = arith.addf %29, %30 : vector<24x32xf32>
    %cst_16 = arith.constant 0.000000e+00 : f32
    %32 = vector.broadcast %cst_16 : f32 to vector<24x32xf32>
    %c0_17 = arith.constant 0 : index
    %c0_18 = arith.constant 0 : index
    %c0_19 = arith.constant 0 : index
    %c0_20 = arith.constant 0 : index
    %c0_21 = arith.constant 0 : index
    %33 = vector.load %arg4[%c0_17, %c0_18, %c0_19, %c0_20, %c0_21] : memref<2x3x4x32x8xf32, #tpu.memory_space<vmem>>, vector<1x1x1x32x8xf32>
    %34 = vector.shape_cast %33 : vector<1x1x1x32x8xf32> to vector<32x8xf32>
    %cst_22 = arith.constant dense<0.000000e+00> : vector<24x8xf32>
    %35 = tpu.matmul %31, %34, %cst_22 {dimension_numbers = #tpu.dot_dimension_numbers<[1], [0], [0], [1], [0, 0, 1, 1], [], []>} : vector<24x32xf32>, vector<32x8xf32>, vector<24x8xf32> -> vector<24x8xf32>
    %c0_23 = arith.constant 0 : index
    %c0_24 = arith.constant 0 : index
    %c0_25 = arith.constant 0 : index
    %c0_26 = arith.constant 0 : index
    %c0_27 = arith.constant 0 : index
    %36 = vector.load %arg5[%c0_23, %c0_24, %c0_25, %c0_26, %c0_27] : memref<2x3x4x1x8xf32, #tpu.memory_space<vmem>>, vector<1x1x1x1x8xf32>
    %37 = vector.shape_cast %36 : vector<1x1x1x1x8xf32> to vector<1x8xf32>
    %38 = vector.broadcast %37 : vector<1x8xf32> to vector<24x8xf32>
    %39 = arith.addf %35, %38 : vector<24x8xf32>
    %c0_28 = arith.constant 0 : index
    %c1_29 = arith.constant 1 : index
    %c0_30 = arith.constant 0 : index
    %c0_31 = arith.constant 0 : index
    %c0_32 = arith.constant 0 : index
    %40 = vector.load %arg4[%c0_28, %c1_29, %c0_30, %c0_31, %c0_32] : memref<2x3x4x32x8xf32, #tpu.memory_space<vmem>>, vector<1x1x1x32x8xf32>
    %41 = vector.shape_cast %40 : vector<1x1x1x32x8xf32> to vector<32x8xf32>
    %cst_33 = arith.constant dense<0.000000e+00> : vector<24x8xf32>
    %42 = tpu.matmul %31, %41, %cst_33 {dimension_numbers = #tpu.dot_dimension_numbers<[1], [0], [0], [1], [0, 0, 1, 1], [], []>} : vector<24x32xf32>, vector<32x8xf32>, vector<24x8xf32> -> vector<24x8xf32>
    %c0_34 = arith.constant 0 : index
    %c1_35 = arith.constant 1 : index
    %c0_36 = arith.constant 0 : index
    %c0_37 = arith.constant 0 : index
    %c0_38 = arith.constant 0 : index
    %43 = vector.load %arg5[%c0_34, %c1_35, %c0_36, %c0_37, %c0_38] : memref<2x3x4x1x8xf32, #tpu.memory_space<vmem>>, vector<1x1x1x1x8xf32>
    %44 = vector.shape_cast %43 : vector<1x1x1x1x8xf32> to vector<1x8xf32>
    %45 = vector.broadcast %44 : vector<1x8xf32> to vector<24x8xf32>
    %46 = arith.addf %42, %45 : vector<24x8xf32>
    %c0_39 = arith.constant 0 : index
    %c2 = arith.constant 2 : index
    %c0_40 = arith.constant 0 : index
    %c0_41 = arith.constant 0 : index
    %c0_42 = arith.constant 0 : index
    %47 = vector.load %arg4[%c0_39, %c2, %c0_40, %c0_41, %c0_42] : memref<2x3x4x32x8xf32, #tpu.memory_space<vmem>>, vector<1x1x1x32x8xf32>
    %48 = vector.shape_cast %47 : vector<1x1x1x32x8xf32> to vector<32x8xf32>
    %cst_43 = arith.constant dense<0.000000e+00> : vector<24x8xf32>
    %49 = tpu.matmul %31, %48, %cst_43 {dimension_numbers = #tpu.dot_dimension_numbers<[1], [0], [0], [1], [0, 0, 1, 1], [], []>} : vector<24x32xf32>, vector<32x8xf32>, vector<24x8xf32> -> vector<24x8xf32>
    %c0_44 = arith.constant 0 : index
    %c2_45 = arith.constant 2 : index
    %c0_46 = arith.constant 0 : index
    %c0_47 = arith.constant 0 : index
    %c0_48 = arith.constant 0 : index
    %50 = vector.load %arg5[%c0_44, %c2_45, %c0_46, %c0_47, %c0_48] : memref<2x3x4x1x8xf32, #tpu.memory_space<vmem>>, vector<1x1x1x1x8xf32>
    %51 = vector.shape_cast %50 : vector<1x1x1x1x8xf32> to vector<1x8xf32>
    %52 = vector.broadcast %51 : vector<1x8xf32> to vector<24x8xf32>
    %53 = arith.addf %49, %52 : vector<24x8xf32>
    %cst_49 = arith.constant dense<0.000000e+00> : vector<24x24xf32>
    %54 = tpu.matmul %39, %46, %cst_49 {dimension_numbers = #tpu.dot_dimension_numbers<[1], [1], [0], [0], [0, 0, 1, 0], [], []>} : vector<24x8xf32>, vector<24x8xf32>, vector<24x24xf32> -> vector<24x24xf32>
    %cst_50 = arith.constant 0.353553385 : f32
    %55 = vector.broadcast %cst_50 : f32 to vector<24x24xf32>
    %56 = arith.mulf %54, %55 : vector<24x24xf32>
    %cst_51 = arith.constant dense<0xFF800000> : vector<24xf32>
    %57 = vector.multi_reduction <maximumf>, %56, %cst_51 [1] : vector<24x24xf32> to vector<24xf32>
    %58 = vector.shape_cast %57 : vector<24xf32> to vector<24x1xf32>
    %59 = vector.broadcast %58 : vector<24x1xf32> to vector<24x24xf32>
    %60 = arith.subf %56, %59 : vector<24x24xf32>
    %61 = math.exp %60 : vector<24x24xf32>
    %cst_52 = arith.constant dense<0.000000e+00> : vector<24xf32>
    %62 = vector.multi_reduction <add>, %61, %cst_52 [1] : vector<24x24xf32> to vector<24xf32>
    %63 = vector.shape_cast %62 : vector<24xf32> to vector<24x1xf32>
    %64 = tpu.reciprocal %63 {approx = true} : vector<24x1xf32> -> vector<24x1xf32>
    %65 = vector.broadcast %64 : vector<24x1xf32> to vector<24x24xf32>
    %66 = arith.mulf %61, %65 : vector<24x24xf32>
    %cst_53 = arith.constant dense<0.000000e+00> : vector<24x8xf32>
    %67 = tpu.matmul %66, %53, %cst_53 {dimension_numbers = #tpu.dot_dimension_numbers<[1], [0], [0], [1], [0, 0, 1, 1], [], []>} : vector<24x24xf32>, vector<24x8xf32>, vector<24x8xf32> -> vector<24x8xf32>
    %c0_54 = arith.constant 0 : index
    %c0_55 = arith.constant 0 : index
    %c0_56 = arith.constant 0 : index
    %c0_57 = arith.constant 0 : index
    %68 = vector.load %arg6[%c0_54, %c0_55, %c0_56, %c0_57] : memref<2x4x8x32xf32, #tpu.memory_space<vmem>>, vector<1x1x8x32xf32>
    %69 = vector.shape_cast %68 : vector<1x1x8x32xf32> to vector<8x32xf32>
    %cst_58 = arith.constant dense<0.000000e+00> : vector<24x32xf32>
    %70 = tpu.matmul %67, %69, %cst_58 {dimension_numbers = #tpu.dot_dimension_numbers<[1], [0], [0], [1], [0, 0, 1, 1], [], []>} : vector<24x8xf32>, vector<8x32xf32>, vector<24x32xf32> -> vector<24x32xf32>
    %71 = arith.addf %32, %70 : vector<24x32xf32>
    %c0_59 = arith.constant 0 : index
    %c0_60 = arith.constant 0 : index
    %c1_61 = arith.constant 1 : index
    %c0_62 = arith.constant 0 : index
    %c0_63 = arith.constant 0 : index
    %72 = vector.load %arg4[%c0_59, %c0_60, %c1_61, %c0_62, %c0_63] : memref<2x3x4x32x8xf32, #tpu.memory_space<vmem>>, vector<1x1x1x32x8xf32>
    %73 = vector.shape_cast %72 : vector<1x1x1x32x8xf32> to vector<32x8xf32>
    %cst_64 = arith.constant dense<0.000000e+00> : vector<24x8xf32>
    %74 = tpu.matmul %31, %73, %cst_64 {dimension_numbers = #tpu.dot_dimension_numbers<[1], [0], [0], [1], [0, 0, 1, 1], [], []>} : vector<24x32xf32>, vector<32x8xf32>, vector<24x8xf32> -> vector<24x8xf32>
    %c0_65 = arith.constant 0 : index
    %c0_66 = arith.constant 0 : index
    %c1_67 = arith.constant 1 : index
    %c0_68 = arith.constant 0 : index
    %c0_69 = arith.constant 0 : index
    %75 = vector.load %arg5[%c0_65, %c0_66, %c1_67, %c0_68, %c0_69] : memref<2x3x4x1x8xf32, #tpu.memory_space<vmem>>, vector<1x1x1x1x8xf32>
    %76 = vector.shape_cast %75 : vector<1x1x1x1x8xf32> to vector<1x8xf32>
    %77 = vector.broadcast %76 : vector<1x8xf32> to vector<24x8xf32>
    %78 = arith.addf %74, %77 : vector<24x8xf32>
    %c0_70 = arith.constant 0 : index
    %c1_71 = arith.constant 1 : index
    %c1_72 = arith.constant 1 : index
    %c0_73 = arith.constant 0 : index
    %c0_74 = arith.constant 0 : index
    %79 = vector.load %arg4[%c0_70, %c1_71, %c1_72, %c0_73, %c0_74] : memref<2x3x4x32x8xf32, #tpu.memory_space<vmem>>, vector<1x1x1x32x8xf32>
    %80 = vector.shape_cast %79 : vector<1x1x1x32x8xf32> to vector<32x8xf32>
    %cst_75 = arith.constant dense<0.000000e+00> : vector<24x8xf32>
    %81 = tpu.matmul %31, %80, %cst_75 {dimension_numbers = #tpu.dot_dimension_numbers<[1], [0], [0], [1], [0, 0, 1, 1], [], []>} : vector<24x32xf32>, vector<32x8xf32>, vector<24x8xf32> -> vector<24x8xf32>
    %c0_76 = arith.constant 0 : index
    %c1_77 = arith.constant 1 : index
    %c1_78 = arith.constant 1 : index
    %c0_79 = arith.constant 0 : index
    %c0_80 = arith.constant 0 : index
    %82 = vector.load %arg5[%c0_76, %c1_77, %c1_78, %c0_79, %c0_80] : memref<2x3x4x1x8xf32, #tpu.memory_space<vmem>>, vector<1x1x1x1x8xf32>
    %83 = vector.shape_cast %82 : vector<1x1x1x1x8xf32> to vector<1x8xf32>
    %84 = vector.broadcast %83 : vector<1x8xf32> to vector<24x8xf32>
    %85 = arith.addf %81, %84 : vector<24x8xf32>
    %c0_81 = arith.constant 0 : index
    %c2_82 = arith.constant 2 : index
    %c1_83 = arith.constant 1 : index
    %c0_84 = arith.constant 0 : index
    %c0_85 = arith.constant 0 : index
    %86 = vector.load %arg4[%c0_81, %c2_82, %c1_83, %c0_84, %c0_85] : memref<2x3x4x32x8xf32, #tpu.memory_space<vmem>>, vector<1x1x1x32x8xf32>
    %87 = vector.shape_cast %86 : vector<1x1x1x32x8xf32> to vector<32x8xf32>
    %cst_86 = arith.constant dense<0.000000e+00> : vector<24x8xf32>
    %88 = tpu.matmul %31, %87, %cst_86 {dimension_numbers = #tpu.dot_dimension_numbers<[1], [0], [0], [1], [0, 0, 1, 1], [], []>} : vector<24x32xf32>, vector<32x8xf32>, vector<24x8xf32> -> vector<24x8xf32>
    %c0_87 = arith.constant 0 : index
    %c2_88 = arith.constant 2 : index
    %c1_89 = arith.constant 1 : index
    %c0_90 = arith.constant 0 : index
    %c0_91 = arith.constant 0 : index
    %89 = vector.load %arg5[%c0_87, %c2_88, %c1_89, %c0_90, %c0_91] : memref<2x3x4x1x8xf32, #tpu.memory_space<vmem>>, vector<1x1x1x1x8xf32>
    %90 = vector.shape_cast %89 : vector<1x1x1x1x8xf32> to vector<1x8xf32>
    %91 = vector.broadcast %90 : vector<1x8xf32> to vector<24x8xf32>
    %92 = arith.addf %88, %91 : vector<24x8xf32>
    %cst_92 = arith.constant dense<0.000000e+00> : vector<24x24xf32>
    %93 = tpu.matmul %78, %85, %cst_92 {dimension_numbers = #tpu.dot_dimension_numbers<[1], [1], [0], [0], [0, 0, 1, 0], [], []>} : vector<24x8xf32>, vector<24x8xf32>, vector<24x24xf32> -> vector<24x24xf32>
    %cst_93 = arith.constant 0.353553385 : f32
    %94 = vector.broadcast %cst_93 : f32 to vector<24x24xf32>
    %95 = arith.mulf %93, %94 : vector<24x24xf32>
    %cst_94 = arith.constant dense<0xFF800000> : vector<24xf32>
    %96 = vector.multi_reduction <maximumf>, %95, %cst_94 [1] : vector<24x24xf32> to vector<24xf32>
    %97 = vector.shape_cast %96 : vector<24xf32> to vector<24x1xf32>
    %98 = vector.broadcast %97 : vector<24x1xf32> to vector<24x24xf32>
    %99 = arith.subf %95, %98 : vector<24x24xf32>
    %100 = math.exp %99 : vector<24x24xf32>
    %cst_95 = arith.constant dense<0.000000e+00> : vector<24xf32>
    %101 = vector.multi_reduction <add>, %100, %cst_95 [1] : vector<24x24xf32> to vector<24xf32>
    %102 = vector.shape_cast %101 : vector<24xf32> to vector<24x1xf32>
    %103 = tpu.reciprocal %102 {approx = true} : vector<24x1xf32> -> vector<24x1xf32>
    %104 = vector.broadcast %103 : vector<24x1xf32> to vector<24x24xf32>
    %105 = arith.mulf %100, %104 : vector<24x24xf32>
    %cst_96 = arith.constant dense<0.000000e+00> : vector<24x8xf32>
    %106 = tpu.matmul %105, %92, %cst_96 {dimension_numbers = #tpu.dot_dimension_numbers<[1], [0], [0], [1], [0, 0, 1, 1], [], []>} : vector<24x24xf32>, vector<24x8xf32>, vector<24x8xf32> -> vector<24x8xf32>
    %c0_97 = arith.constant 0 : index
    %c1_98 = arith.constant 1 : index
    %c0_99 = arith.constant 0 : index
    %c0_100 = arith.constant 0 : index
    %107 = vector.load %arg6[%c0_97, %c1_98, %c0_99, %c0_100] : memref<2x4x8x32xf32, #tpu.memory_space<vmem>>, vector<1x1x8x32xf32>
    %108 = vector.shape_cast %107 : vector<1x1x8x32xf32> to vector<8x32xf32>
    %cst_101 = arith.constant dense<0.000000e+00> : vector<24x32xf32>
    %109 = tpu.matmul %106, %108, %cst_101 {dimension_numbers = #tpu.dot_dimension_numbers<[1], [0], [0], [1], [0, 0, 1, 1], [], []>} : vector<24x8xf32>, vector<8x32xf32>, vector<24x32xf32> -> vector<24x32xf32>
    %110 = arith.addf %71, %109 : vector<24x32xf32>
    %c0_102 = arith.constant 0 : index
    %c0_103 = arith.constant 0 : index
    %c2_104 = arith.constant 2 : index
    %c0_105 = arith.constant 0 : index
    %c0_106 = arith.constant 0 : index
    %111 = vector.load %arg4[%c0_102, %c0_103, %c2_104, %c0_105, %c0_106] : memref<2x3x4x32x8xf32, #tpu.memory_space<vmem>>, vector<1x1x1x32x8xf32>
    %112 = vector.shape_cast %111 : vector<1x1x1x32x8xf32> to vector<32x8xf32>
    %cst_107 = arith.constant dense<0.000000e+00> : vector<24x8xf32>
    %113 = tpu.matmul %31, %112, %cst_107 {dimension_numbers = #tpu.dot_dimension_numbers<[1], [0], [0], [1], [0, 0, 1, 1], [], []>} : vector<24x32xf32>, vector<32x8xf32>, vector<24x8xf32> -> vector<24x8xf32>
    %c0_108 = arith.constant 0 : index
    %c0_109 = arith.constant 0 : index
    %c2_110 = arith.constant 2 : index
    %c0_111 = arith.constant 0 : index
    %c0_112 = arith.constant 0 : index
    %114 = vector.load %arg5[%c0_108, %c0_109, %c2_110, %c0_111, %c0_112] : memref<2x3x4x1x8xf32, #tpu.memory_space<vmem>>, vector<1x1x1x1x8xf32>
    %115 = vector.shape_cast %114 : vector<1x1x1x1x8xf32> to vector<1x8xf32>
    %116 = vector.broadcast %115 : vector<1x8xf32> to vector<24x8xf32>
    %117 = arith.addf %113, %116 : vector<24x8xf32>
    %c0_113 = arith.constant 0 : index
    %c1_114 = arith.constant 1 : index
    %c2_115 = arith.constant 2 : index
    %c0_116 = arith.constant 0 : index
    %c0_117 = arith.constant 0 : index
    %118 = vector.load %arg4[%c0_113, %c1_114, %c2_115, %c0_116, %c0_117] : memref<2x3x4x32x8xf32, #tpu.memory_space<vmem>>, vector<1x1x1x32x8xf32>
    %119 = vector.shape_cast %118 : vector<1x1x1x32x8xf32> to vector<32x8xf32>
    %cst_118 = arith.constant dense<0.000000e+00> : vector<24x8xf32>
    %120 = tpu.matmul %31, %119, %cst_118 {dimension_numbers = #tpu.dot_dimension_numbers<[1], [0], [0], [1], [0, 0, 1, 1], [], []>} : vector<24x32xf32>, vector<32x8xf32>, vector<24x8xf32> -> vector<24x8xf32>
    %c0_119 = arith.constant 0 : index
    %c1_120 = arith.constant 1 : index
    %c2_121 = arith.constant 2 : index
    %c0_122 = arith.constant 0 : index
    %c0_123 = arith.constant 0 : index
    %121 = vector.load %arg5[%c0_119, %c1_120, %c2_121, %c0_122, %c0_123] : memref<2x3x4x1x8xf32, #tpu.memory_space<vmem>>, vector<1x1x1x1x8xf32>
    %122 = vector.shape_cast %121 : vector<1x1x1x1x8xf32> to vector<1x8xf32>
    %123 = vector.broadcast %122 : vector<1x8xf32> to vector<24x8xf32>
    %124 = arith.addf %120, %123 : vector<24x8xf32>
    %c0_124 = arith.constant 0 : index
    %c2_125 = arith.constant 2 : index
    %c2_126 = arith.constant 2 : index
    %c0_127 = arith.constant 0 : index
    %c0_128 = arith.constant 0 : index
    %125 = vector.load %arg4[%c0_124, %c2_125, %c2_126, %c0_127, %c0_128] : memref<2x3x4x32x8xf32, #tpu.memory_space<vmem>>, vector<1x1x1x32x8xf32>
    %126 = vector.shape_cast %125 : vector<1x1x1x32x8xf32> to vector<32x8xf32>
    %cst_129 = arith.constant dense<0.000000e+00> : vector<24x8xf32>
    %127 = tpu.matmul %31, %126, %cst_129 {dimension_numbers = #tpu.dot_dimension_numbers<[1], [0], [0], [1], [0, 0, 1, 1], [], []>} : vector<24x32xf32>, vector<32x8xf32>, vector<24x8xf32> -> vector<24x8xf32>
    %c0_130 = arith.constant 0 : index
    %c2_131 = arith.constant 2 : index
    %c2_132 = arith.constant 2 : index
    %c0_133 = arith.constant 0 : index
    %c0_134 = arith.constant 0 : index
    %128 = vector.load %arg5[%c0_130, %c2_131, %c2_132, %c0_133, %c0_134] : memref<2x3x4x1x8xf32, #tpu.memory_space<vmem>>, vector<1x1x1x1x8xf32>
    %129 = vector.shape_cast %128 : vector<1x1x1x1x8xf32> to vector<1x8xf32>
    %130 = vector.broadcast %129 : vector<1x8xf32> to vector<24x8xf32>
    %131 = arith.addf %127, %130 : vector<24x8xf32>
    %cst_135 = arith.constant dense<0.000000e+00> : vector<24x24xf32>
    %132 = tpu.matmul %117, %124, %cst_135 {dimension_numbers = #tpu.dot_dimension_numbers<[1], [1], [0], [0], [0, 0, 1, 0], [], []>} : vector<24x8xf32>, vector<24x8xf32>, vector<24x24xf32> -> vector<24x24xf32>
    %cst_136 = arith.constant 0.353553385 : f32
    %133 = vector.broadcast %cst_136 : f32 to vector<24x24xf32>
    %134 = arith.mulf %132, %133 : vector<24x24xf32>
    %cst_137 = arith.constant dense<0xFF800000> : vector<24xf32>
    %135 = vector.multi_reduction <maximumf>, %134, %cst_137 [1] : vector<24x24xf32> to vector<24xf32>
    %136 = vector.shape_cast %135 : vector<24xf32> to vector<24x1xf32>
    %137 = vector.broadcast %136 : vector<24x1xf32> to vector<24x24xf32>
    %138 = arith.subf %134, %137 : vector<24x24xf32>
    %139 = math.exp %138 : vector<24x24xf32>
    %cst_138 = arith.constant dense<0.000000e+00> : vector<24xf32>
    %140 = vector.multi_reduction <add>, %139, %cst_138 [1] : vector<24x24xf32> to vector<24xf32>
    %141 = vector.shape_cast %140 : vector<24xf32> to vector<24x1xf32>
    %142 = tpu.reciprocal %141 {approx = true} : vector<24x1xf32> -> vector<24x1xf32>
    %143 = vector.broadcast %142 : vector<24x1xf32> to vector<24x24xf32>
    %144 = arith.mulf %139, %143 : vector<24x24xf32>
    %cst_139 = arith.constant dense<0.000000e+00> : vector<24x8xf32>
    %145 = tpu.matmul %144, %131, %cst_139 {dimension_numbers = #tpu.dot_dimension_numbers<[1], [0], [0], [1], [0, 0, 1, 1], [], []>} : vector<24x24xf32>, vector<24x8xf32>, vector<24x8xf32> -> vector<24x8xf32>
    %c0_140 = arith.constant 0 : index
    %c2_141 = arith.constant 2 : index
    %c0_142 = arith.constant 0 : index
    %c0_143 = arith.constant 0 : index
    %146 = vector.load %arg6[%c0_140, %c2_141, %c0_142, %c0_143] : memref<2x4x8x32xf32, #tpu.memory_space<vmem>>, vector<1x1x8x32xf32>
    %147 = vector.shape_cast %146 : vector<1x1x8x32xf32> to vector<8x32xf32>
    %cst_144 = arith.constant dense<0.000000e+00> : vector<24x32xf32>
    %148 = tpu.matmul %145, %147, %cst_144 {dimension_numbers = #tpu.dot_dimension_numbers<[1], [0], [0], [1], [0, 0, 1, 1], [], []>} : vector<24x8xf32>, vector<8x32xf32>, vector<24x32xf32> -> vector<24x32xf32>
    %149 = arith.addf %110, %148 : vector<24x32xf32>
    %c0_145 = arith.constant 0 : index
    %c0_146 = arith.constant 0 : index
    %c3 = arith.constant 3 : index
    %c0_147 = arith.constant 0 : index
    %c0_148 = arith.constant 0 : index
    %150 = vector.load %arg4[%c0_145, %c0_146, %c3, %c0_147, %c0_148] : memref<2x3x4x32x8xf32, #tpu.memory_space<vmem>>, vector<1x1x1x32x8xf32>
    %151 = vector.shape_cast %150 : vector<1x1x1x32x8xf32> to vector<32x8xf32>
    %cst_149 = arith.constant dense<0.000000e+00> : vector<24x8xf32>
    %152 = tpu.matmul %31, %151, %cst_149 {dimension_numbers = #tpu.dot_dimension_numbers<[1], [0], [0], [1], [0, 0, 1, 1], [], []>} : vector<24x32xf32>, vector<32x8xf32>, vector<24x8xf32> -> vector<24x8xf32>
    %c0_150 = arith.constant 0 : index
    %c0_151 = arith.constant 0 : index
    %c3_152 = arith.constant 3 : index
    %c0_153 = arith.constant 0 : index
    %c0_154 = arith.constant 0 : index
    %153 = vector.load %arg5[%c0_150, %c0_151, %c3_152, %c0_153, %c0_154] : memref<2x3x4x1x8xf32, #tpu.memory_space<vmem>>, vector<1x1x1x1x8xf32>
    %154 = vector.shape_cast %153 : vector<1x1x1x1x8xf32> to vector<1x8xf32>
    %155 = vector.broadcast %154 : vector<1x8xf32> to vector<24x8xf32>
    %156 = arith.addf %152, %155 : vector<24x8xf32>
    %c0_155 = arith.constant 0 : index
    %c1_156 = arith.constant 1 : index
    %c3_157 = arith.constant 3 : index
    %c0_158 = arith.constant 0 : index
    %c0_159 = arith.constant 0 : index
    %157 = vector.load %arg4[%c0_155, %c1_156, %c3_157, %c0_158, %c0_159] : memref<2x3x4x32x8xf32, #tpu.memory_space<vmem>>, vector<1x1x1x32x8xf32>
    %158 = vector.shape_cast %157 : vector<1x1x1x32x8xf32> to vector<32x8xf32>
    %cst_160 = arith.constant dense<0.000000e+00> : vector<24x8xf32>
    %159 = tpu.matmul %31, %158, %cst_160 {dimension_numbers = #tpu.dot_dimension_numbers<[1], [0], [0], [1], [0, 0, 1, 1], [], []>} : vector<24x32xf32>, vector<32x8xf32>, vector<24x8xf32> -> vector<24x8xf32>
    %c0_161 = arith.constant 0 : index
    %c1_162 = arith.constant 1 : index
    %c3_163 = arith.constant 3 : index
    %c0_164 = arith.constant 0 : index
    %c0_165 = arith.constant 0 : index
    %160 = vector.load %arg5[%c0_161, %c1_162, %c3_163, %c0_164, %c0_165] : memref<2x3x4x1x8xf32, #tpu.memory_space<vmem>>, vector<1x1x1x1x8xf32>
    %161 = vector.shape_cast %160 : vector<1x1x1x1x8xf32> to vector<1x8xf32>
    %162 = vector.broadcast %161 : vector<1x8xf32> to vector<24x8xf32>
    %163 = arith.addf %159, %162 : vector<24x8xf32>
    %c0_166 = arith.constant 0 : index
    %c2_167 = arith.constant 2 : index
    %c3_168 = arith.constant 3 : index
    %c0_169 = arith.constant 0 : index
    %c0_170 = arith.constant 0 : index
    %164 = vector.load %arg4[%c0_166, %c2_167, %c3_168, %c0_169, %c0_170] : memref<2x3x4x32x8xf32, #tpu.memory_space<vmem>>, vector<1x1x1x32x8xf32>
    %165 = vector.shape_cast %164 : vector<1x1x1x32x8xf32> to vector<32x8xf32>
    %cst_171 = arith.constant dense<0.000000e+00> : vector<24x8xf32>
    %166 = tpu.matmul %31, %165, %cst_171 {dimension_numbers = #tpu.dot_dimension_numbers<[1], [0], [0], [1], [0, 0, 1, 1], [], []>} : vector<24x32xf32>, vector<32x8xf32>, vector<24x8xf32> -> vector<24x8xf32>
    %c0_172 = arith.constant 0 : index
    %c2_173 = arith.constant 2 : index
    %c3_174 = arith.constant 3 : index
    %c0_175 = arith.constant 0 : index
    %c0_176 = arith.constant 0 : index
    %167 = vector.load %arg5[%c0_172, %c2_173, %c3_174, %c0_175, %c0_176] : memref<2x3x4x1x8xf32, #tpu.memory_space<vmem>>, vector<1x1x1x1x8xf32>
    %168 = vector.shape_cast %167 : vector<1x1x1x1x8xf32> to vector<1x8xf32>
    %169 = vector.broadcast %168 : vector<1x8xf32> to vector<24x8xf32>
    %170 = arith.addf %166, %169 : vector<24x8xf32>
    %cst_177 = arith.constant dense<0.000000e+00> : vector<24x24xf32>
    %171 = tpu.matmul %156, %163, %cst_177 {dimension_numbers = #tpu.dot_dimension_numbers<[1], [1], [0], [0], [0, 0, 1, 0], [], []>} : vector<24x8xf32>, vector<24x8xf32>, vector<24x24xf32> -> vector<24x24xf32>
    %cst_178 = arith.constant 0.353553385 : f32
    %172 = vector.broadcast %cst_178 : f32 to vector<24x24xf32>
    %173 = arith.mulf %171, %172 : vector<24x24xf32>
    %cst_179 = arith.constant dense<0xFF800000> : vector<24xf32>
    %174 = vector.multi_reduction <maximumf>, %173, %cst_179 [1] : vector<24x24xf32> to vector<24xf32>
    %175 = vector.shape_cast %174 : vector<24xf32> to vector<24x1xf32>
    %176 = vector.broadcast %175 : vector<24x1xf32> to vector<24x24xf32>
    %177 = arith.subf %173, %176 : vector<24x24xf32>
    %178 = math.exp %177 : vector<24x24xf32>
    %cst_180 = arith.constant dense<0.000000e+00> : vector<24xf32>
    %179 = vector.multi_reduction <add>, %178, %cst_180 [1] : vector<24x24xf32> to vector<24xf32>
    %180 = vector.shape_cast %179 : vector<24xf32> to vector<24x1xf32>
    %181 = tpu.reciprocal %180 {approx = true} : vector<24x1xf32> -> vector<24x1xf32>
    %182 = vector.broadcast %181 : vector<24x1xf32> to vector<24x24xf32>
    %183 = arith.mulf %178, %182 : vector<24x24xf32>
    %cst_181 = arith.constant dense<0.000000e+00> : vector<24x8xf32>
    %184 = tpu.matmul %183, %170, %cst_181 {dimension_numbers = #tpu.dot_dimension_numbers<[1], [0], [0], [1], [0, 0, 1, 1], [], []>} : vector<24x24xf32>, vector<24x8xf32>, vector<24x8xf32> -> vector<24x8xf32>
    %c0_182 = arith.constant 0 : index
    %c3_183 = arith.constant 3 : index
    %c0_184 = arith.constant 0 : index
    %c0_185 = arith.constant 0 : index
    %185 = vector.load %arg6[%c0_182, %c3_183, %c0_184, %c0_185] : memref<2x4x8x32xf32, #tpu.memory_space<vmem>>, vector<1x1x8x32xf32>
    %186 = vector.shape_cast %185 : vector<1x1x8x32xf32> to vector<8x32xf32>
    %cst_186 = arith.constant dense<0.000000e+00> : vector<24x32xf32>
    %187 = tpu.matmul %184, %186, %cst_186 {dimension_numbers = #tpu.dot_dimension_numbers<[1], [0], [0], [1], [0, 0, 1, 1], [], []>} : vector<24x8xf32>, vector<8x32xf32>, vector<24x32xf32> -> vector<24x32xf32>
    %188 = arith.addf %149, %187 : vector<24x32xf32>
    %189 = arith.addf %5, %188 : vector<24x32xf32>
    %c0_187 = arith.constant 0 : index
    %c2_188 = arith.constant 2 : index
    %c0_189 = arith.constant 0 : index
    %190 = vector.load %arg9[%c0_187, %c2_188, %c0_189] : memref<2x8x128xf32, #tpu.memory_space<vmem>>, vector<1x1x32xf32>
    %191 = vector.shape_cast %190 : vector<1x1x32xf32> to vector<1x32xf32>
    %192 = vector.broadcast %191 : vector<1x32xf32> to vector<24x32xf32>
    %193 = arith.addf %189, %192 : vector<24x32xf32>
    %c0_190 = arith.constant 0 : index
    %c3_191 = arith.constant 3 : index
    %c0_192 = arith.constant 0 : index
    %194 = vector.load %arg9[%c0_190, %c3_191, %c0_192] : memref<2x8x128xf32, #tpu.memory_space<vmem>>, vector<1x1x32xf32>
    %195 = vector.shape_cast %194 : vector<1x1x32xf32> to vector<1x32xf32>
    %c0_193 = arith.constant 0 : index
    %c4 = arith.constant 4 : index
    %c0_194 = arith.constant 0 : index
    %196 = vector.load %arg9[%c0_193, %c4, %c0_194] : memref<2x8x128xf32, #tpu.memory_space<vmem>>, vector<1x1x32xf32>
    %197 = vector.shape_cast %196 : vector<1x1x32xf32> to vector<1x32xf32>
    %cst_195 = arith.constant dense<0.000000e+00> : vector<24xf32>
    %198 = vector.multi_reduction <add>, %193, %cst_195 [1] : vector<24x32xf32> to vector<24xf32>
    %199 = vector.shape_cast %198 : vector<24xf32> to vector<24x1xf32>
    %cst_196 = arith.constant 3.200000e+01 : f32
    %200 = vector.broadcast %cst_196 : f32 to vector<24x1xf32>
    %201 = arith.divf %199, %200 : vector<24x1xf32>
    %202 = vector.broadcast %201 : vector<24x1xf32> to vector<24x32xf32>
    %203 = arith.subf %193, %202 : vector<24x32xf32>
    %204 = arith.mulf %203, %203 : vector<24x32xf32>
    %cst_197 = arith.constant dense<0.000000e+00> : vector<24xf32>
    %205 = vector.multi_reduction <add>, %204, %cst_197 [1] : vector<24x32xf32> to vector<24xf32>
    %206 = vector.shape_cast %205 : vector<24xf32> to vector<24x1xf32>
    %cst_198 = arith.constant 3.200000e+01 : f32
    %207 = vector.broadcast %cst_198 : f32 to vector<24x1xf32>
    %208 = arith.divf %206, %207 : vector<24x1xf32>
    %209 = vector.broadcast %201 : vector<24x1xf32> to vector<24x32xf32>
    %210 = arith.subf %193, %209 : vector<24x32xf32>
    %cst_199 = arith.constant 9.99999974E-6 : f32
    %211 = vector.broadcast %cst_199 : f32 to vector<24x1xf32>
    %212 = arith.addf %208, %211 : vector<24x1xf32>
    %213 = math.rsqrt %212 : vector<24x1xf32>
    %214 = vector.broadcast %213 : vector<24x1xf32> to vector<24x32xf32>
    %215 = arith.mulf %210, %214 : vector<24x32xf32>
    %216 = vector.broadcast %195 : vector<1x32xf32> to vector<24x32xf32>
    %217 = arith.mulf %215, %216 : vector<24x32xf32>
    %218 = vector.broadcast %197 : vector<1x32xf32> to vector<24x32xf32>
    %219 = arith.addf %217, %218 : vector<24x32xf32>
    %c0_200 = arith.constant 0 : index
    %c0_201 = arith.constant 0 : index
    %c0_202 = arith.constant 0 : index
    %220 = vector.load %arg7[%c0_200, %c0_201, %c0_202] : memref<2x32x64xf32, #tpu.memory_space<vmem>>, vector<1x32x64xf32>
    %221 = vector.shape_cast %220 : vector<1x32x64xf32> to vector<32x64xf32>
    %cst_203 = arith.constant dense<0.000000e+00> : vector<24x64xf32>
    %222 = tpu.matmul %219, %221, %cst_203 {dimension_numbers = #tpu.dot_dimension_numbers<[1], [0], [0], [1], [0, 0, 1, 1], [], []>} : vector<24x32xf32>, vector<32x64xf32>, vector<24x64xf32> -> vector<24x64xf32>
    %c0_204 = arith.constant 0 : index
    %c5 = arith.constant 5 : index
    %c0_205 = arith.constant 0 : index
    %223 = vector.load %arg9[%c0_204, %c5, %c0_205] : memref<2x8x128xf32, #tpu.memory_space<vmem>>, vector<1x1x64xf32>
    %224 = vector.shape_cast %223 : vector<1x1x64xf32> to vector<1x64xf32>
    %225 = vector.broadcast %224 : vector<1x64xf32> to vector<24x64xf32>
    %226 = arith.addf %222, %225 : vector<24x64xf32>
    %cst_206 = arith.constant 5.000000e-01 : f32
    %227 = vector.broadcast %cst_206 : f32 to vector<24x64xf32>
    %228 = arith.mulf %227, %226 : vector<24x64xf32>
    %cst_207 = arith.constant 0.707106769 : f32
    %229 = vector.broadcast %cst_207 : f32 to vector<24x64xf32>
    %230 = arith.mulf %226, %229 : vector<24x64xf32>
    %231 = math.absf %230 : vector<24x64xf32>
    %cst_208 = arith.constant 0.327591091 : f32
    %232 = vector.broadcast %cst_208 : f32 to vector<24x64xf32>
    %233 = arith.mulf %232, %231 : vector<24x64xf32>
    %cst_209 = arith.constant 1.000000e+00 : f32
    %234 = vector.broadcast %cst_209 : f32 to vector<24x64xf32>
    %235 = arith.addf %234, %233 : vector<24x64xf32>
    %cst_210 = arith.constant 1.000000e+00 : f32
    %236 = vector.broadcast %cst_210 : f32 to vector<24x64xf32>
    %237 = arith.divf %236, %235 : vector<24x64xf32>
    %cst_211 = arith.constant 1.06140542 : f32
    %238 = vector.broadcast %cst_211 : f32 to vector<24x64xf32>
    %239 = arith.mulf %238, %237 : vector<24x64xf32>
    %cst_212 = arith.constant -1.45315206 : f32
    %240 = vector.broadcast %cst_212 : f32 to vector<24x64xf32>
    %241 = arith.addf %239, %240 : vector<24x64xf32>
    %242 = arith.mulf %241, %237 : vector<24x64xf32>
    %cst_213 = arith.constant 1.42141378 : f32
    %243 = vector.broadcast %cst_213 : f32 to vector<24x64xf32>
    %244 = arith.addf %242, %243 : vector<24x64xf32>
    %245 = arith.mulf %244, %237 : vector<24x64xf32>
    %cst_214 = arith.constant -0.284496725 : f32
    %246 = vector.broadcast %cst_214 : f32 to vector<24x64xf32>
    %247 = arith.addf %245, %246 : vector<24x64xf32>
    %248 = arith.mulf %247, %237 : vector<24x64xf32>
    %cst_215 = arith.constant 0.254829586 : f32
    %249 = vector.broadcast %cst_215 : f32 to vector<24x64xf32>
    %250 = arith.addf %248, %249 : vector<24x64xf32>
    %251 = arith.mulf %250, %237 : vector<24x64xf32>
    %cst_216 = arith.constant 0.000000e+00 : f32
    %252 = vector.broadcast %cst_216 : f32 to vector<24x64xf32>
    %253 = arith.subf %252, %231 : vector<24x64xf32>
    %254 = arith.mulf %253, %231 : vector<24x64xf32>
    %255 = math.exp %254 : vector<24x64xf32>
    %256 = arith.mulf %251, %255 : vector<24x64xf32>
    %cst_217 = arith.constant 1.000000e+00 : f32
    %257 = vector.broadcast %cst_217 : f32 to vector<24x64xf32>
    %258 = arith.subf %257, %256 : vector<24x64xf32>
    %cst_218 = arith.constant 0.000000e+00 : f32
    %259 = vector.broadcast %cst_218 : f32 to vector<24x64xf32>
    %260 = arith.cmpf olt, %230, %259 : vector<24x64xf32>
    %cst_219 = arith.constant 0.000000e+00 : f32
    %261 = vector.broadcast %cst_219 : f32 to vector<24x64xf32>
    %262 = arith.subf %261, %258 : vector<24x64xf32>
    %263 = arith.select %260, %262, %258 : vector<24x64xi1>, vector<24x64xf32>
    %cst_220 = arith.constant 1.000000e+00 : f32
    %264 = vector.broadcast %cst_220 : f32 to vector<24x64xf32>
    %265 = arith.addf %264, %263 : vector<24x64xf32>
    %266 = arith.mulf %228, %265 : vector<24x64xf32>
    %c0_221 = arith.constant 0 : index
    %c0_222 = arith.constant 0 : index
    %c0_223 = arith.constant 0 : index
    %267 = vector.load %arg8[%c0_221, %c0_222, %c0_223] : memref<2x64x32xf32, #tpu.memory_space<vmem>>, vector<1x64x32xf32>
    %268 = vector.shape_cast %267 : vector<1x64x32xf32> to vector<64x32xf32>
    %cst_224 = arith.constant dense<0.000000e+00> : vector<24x32xf32>
    %269 = tpu.matmul %266, %268, %cst_224 {dimension_numbers = #tpu.dot_dimension_numbers<[1], [0], [0], [1], [0, 0, 1, 1], [], []>} : vector<24x64xf32>, vector<64x32xf32>, vector<24x32xf32> -> vector<24x32xf32>
    %c0_225 = arith.constant 0 : index
    %c6 = arith.constant 6 : index
    %c0_226 = arith.constant 0 : index
    %270 = vector.load %arg9[%c0_225, %c6, %c0_226] : memref<2x8x128xf32, #tpu.memory_space<vmem>>, vector<1x1x32xf32>
    %271 = vector.shape_cast %270 : vector<1x1x32xf32> to vector<1x32xf32>
    %272 = vector.broadcast %271 : vector<1x32xf32> to vector<24x32xf32>
    %273 = arith.addf %269, %272 : vector<24x32xf32>
    %274 = arith.addf %193, %273 : vector<24x32xf32>
    %c1_227 = arith.constant 1 : index
    %c0_228 = arith.constant 0 : index
    %c0_229 = arith.constant 0 : index
    %275 = vector.load %arg9[%c1_227, %c0_228, %c0_229] : memref<2x8x128xf32, #tpu.memory_space<vmem>>, vector<1x1x32xf32>
    %276 = vector.shape_cast %275 : vector<1x1x32xf32> to vector<1x32xf32>
    %c1_230 = arith.constant 1 : index
    %c1_231 = arith.constant 1 : index
    %c0_232 = arith.constant 0 : index
    %277 = vector.load %arg9[%c1_230, %c1_231, %c0_232] : memref<2x8x128xf32, #tpu.memory_space<vmem>>, vector<1x1x32xf32>
    %278 = vector.shape_cast %277 : vector<1x1x32xf32> to vector<1x32xf32>
    %cst_233 = arith.constant dense<0.000000e+00> : vector<24xf32>
    %279 = vector.multi_reduction <add>, %274, %cst_233 [1] : vector<24x32xf32> to vector<24xf32>
    %280 = vector.shape_cast %279 : vector<24xf32> to vector<24x1xf32>
    %cst_234 = arith.constant 3.200000e+01 : f32
    %281 = vector.broadcast %cst_234 : f32 to vector<24x1xf32>
    %282 = arith.divf %280, %281 : vector<24x1xf32>
    %283 = vector.broadcast %282 : vector<24x1xf32> to vector<24x32xf32>
    %284 = arith.subf %274, %283 : vector<24x32xf32>
    %285 = arith.mulf %284, %284 : vector<24x32xf32>
    %cst_235 = arith.constant dense<0.000000e+00> : vector<24xf32>
    %286 = vector.multi_reduction <add>, %285, %cst_235 [1] : vector<24x32xf32> to vector<24xf32>
    %287 = vector.shape_cast %286 : vector<24xf32> to vector<24x1xf32>
    %cst_236 = arith.constant 3.200000e+01 : f32
    %288 = vector.broadcast %cst_236 : f32 to vector<24x1xf32>
    %289 = arith.divf %287, %288 : vector<24x1xf32>
    %290 = vector.broadcast %282 : vector<24x1xf32> to vector<24x32xf32>
    %291 = arith.subf %274, %290 : vector<24x32xf32>
    %cst_237 = arith.constant 9.99999974E-6 : f32
    %292 = vector.broadcast %cst_237 : f32 to vector<24x1xf32>
    %293 = arith.addf %289, %292 : vector<24x1xf32>
    %294 = math.rsqrt %293 : vector<24x1xf32>
    %295 = vector.broadcast %294 : vector<24x1xf32> to vector<24x32xf32>
    %296 = arith.mulf %291, %295 : vector<24x32xf32>
    %297 = vector.broadcast %276 : vector<1x32xf32> to vector<24x32xf32>
    %298 = arith.mulf %296, %297 : vector<24x32xf32>
    %299 = vector.broadcast %278 : vector<1x32xf32> to vector<24x32xf32>
    %300 = arith.addf %298, %299 : vector<24x32xf32>
    %cst_238 = arith.constant 0.000000e+00 : f32
    %301 = vector.broadcast %cst_238 : f32 to vector<24x32xf32>
    %c1_239 = arith.constant 1 : index
    %c0_240 = arith.constant 0 : index
    %c0_241 = arith.constant 0 : index
    %c0_242 = arith.constant 0 : index
    %c0_243 = arith.constant 0 : index
    %302 = vector.load %arg4[%c1_239, %c0_240, %c0_241, %c0_242, %c0_243] : memref<2x3x4x32x8xf32, #tpu.memory_space<vmem>>, vector<1x1x1x32x8xf32>
    %303 = vector.shape_cast %302 : vector<1x1x1x32x8xf32> to vector<32x8xf32>
    %cst_244 = arith.constant dense<0.000000e+00> : vector<24x8xf32>
    %304 = tpu.matmul %300, %303, %cst_244 {dimension_numbers = #tpu.dot_dimension_numbers<[1], [0], [0], [1], [0, 0, 1, 1], [], []>} : vector<24x32xf32>, vector<32x8xf32>, vector<24x8xf32> -> vector<24x8xf32>
    %c1_245 = arith.constant 1 : index
    %c0_246 = arith.constant 0 : index
    %c0_247 = arith.constant 0 : index
    %c0_248 = arith.constant 0 : index
    %c0_249 = arith.constant 0 : index
    %305 = vector.load %arg5[%c1_245, %c0_246, %c0_247, %c0_248, %c0_249] : memref<2x3x4x1x8xf32, #tpu.memory_space<vmem>>, vector<1x1x1x1x8xf32>
    %306 = vector.shape_cast %305 : vector<1x1x1x1x8xf32> to vector<1x8xf32>
    %307 = vector.broadcast %306 : vector<1x8xf32> to vector<24x8xf32>
    %308 = arith.addf %304, %307 : vector<24x8xf32>
    %c1_250 = arith.constant 1 : index
    %c1_251 = arith.constant 1 : index
    %c0_252 = arith.constant 0 : index
    %c0_253 = arith.constant 0 : index
    %c0_254 = arith.constant 0 : index
    %309 = vector.load %arg4[%c1_250, %c1_251, %c0_252, %c0_253, %c0_254] : memref<2x3x4x32x8xf32, #tpu.memory_space<vmem>>, vector<1x1x1x32x8xf32>
    %310 = vector.shape_cast %309 : vector<1x1x1x32x8xf32> to vector<32x8xf32>
    %cst_255 = arith.constant dense<0.000000e+00> : vector<24x8xf32>
    %311 = tpu.matmul %300, %310, %cst_255 {dimension_numbers = #tpu.dot_dimension_numbers<[1], [0], [0], [1], [0, 0, 1, 1], [], []>} : vector<24x32xf32>, vector<32x8xf32>, vector<24x8xf32> -> vector<24x8xf32>
    %c1_256 = arith.constant 1 : index
    %c1_257 = arith.constant 1 : index
    %c0_258 = arith.constant 0 : index
    %c0_259 = arith.constant 0 : index
    %c0_260 = arith.constant 0 : index
    %312 = vector.load %arg5[%c1_256, %c1_257, %c0_258, %c0_259, %c0_260] : memref<2x3x4x1x8xf32, #tpu.memory_space<vmem>>, vector<1x1x1x1x8xf32>
    %313 = vector.shape_cast %312 : vector<1x1x1x1x8xf32> to vector<1x8xf32>
    %314 = vector.broadcast %313 : vector<1x8xf32> to vector<24x8xf32>
    %315 = arith.addf %311, %314 : vector<24x8xf32>
    %c1_261 = arith.constant 1 : index
    %c2_262 = arith.constant 2 : index
    %c0_263 = arith.constant 0 : index
    %c0_264 = arith.constant 0 : index
    %c0_265 = arith.constant 0 : index
    %316 = vector.load %arg4[%c1_261, %c2_262, %c0_263, %c0_264, %c0_265] : memref<2x3x4x32x8xf32, #tpu.memory_space<vmem>>, vector<1x1x1x32x8xf32>
    %317 = vector.shape_cast %316 : vector<1x1x1x32x8xf32> to vector<32x8xf32>
    %cst_266 = arith.constant dense<0.000000e+00> : vector<24x8xf32>
    %318 = tpu.matmul %300, %317, %cst_266 {dimension_numbers = #tpu.dot_dimension_numbers<[1], [0], [0], [1], [0, 0, 1, 1], [], []>} : vector<24x32xf32>, vector<32x8xf32>, vector<24x8xf32> -> vector<24x8xf32>
    %c1_267 = arith.constant 1 : index
    %c2_268 = arith.constant 2 : index
    %c0_269 = arith.constant 0 : index
    %c0_270 = arith.constant 0 : index
    %c0_271 = arith.constant 0 : index
    %319 = vector.load %arg5[%c1_267, %c2_268, %c0_269, %c0_270, %c0_271] : memref<2x3x4x1x8xf32, #tpu.memory_space<vmem>>, vector<1x1x1x1x8xf32>
    %320 = vector.shape_cast %319 : vector<1x1x1x1x8xf32> to vector<1x8xf32>
    %321 = vector.broadcast %320 : vector<1x8xf32> to vector<24x8xf32>
    %322 = arith.addf %318, %321 : vector<24x8xf32>
    %cst_272 = arith.constant dense<0.000000e+00> : vector<24x24xf32>
    %323 = tpu.matmul %308, %315, %cst_272 {dimension_numbers = #tpu.dot_dimension_numbers<[1], [1], [0], [0], [0, 0, 1, 0], [], []>} : vector<24x8xf32>, vector<24x8xf32>, vector<24x24xf32> -> vector<24x24xf32>
    %cst_273 = arith.constant 0.353553385 : f32
    %324 = vector.broadcast %cst_273 : f32 to vector<24x24xf32>
    %325 = arith.mulf %323, %324 : vector<24x24xf32>
    %cst_274 = arith.constant dense<0xFF800000> : vector<24xf32>
    %326 = vector.multi_reduction <maximumf>, %325, %cst_274 [1] : vector<24x24xf32> to vector<24xf32>
    %327 = vector.shape_cast %326 : vector<24xf32> to vector<24x1xf32>
    %328 = vector.broadcast %327 : vector<24x1xf32> to vector<24x24xf32>
    %329 = arith.subf %325, %328 : vector<24x24xf32>
    %330 = math.exp %329 : vector<24x24xf32>
    %cst_275 = arith.constant dense<0.000000e+00> : vector<24xf32>
    %331 = vector.multi_reduction <add>, %330, %cst_275 [1] : vector<24x24xf32> to vector<24xf32>
    %332 = vector.shape_cast %331 : vector<24xf32> to vector<24x1xf32>
    %333 = tpu.reciprocal %332 {approx = true} : vector<24x1xf32> -> vector<24x1xf32>
    %334 = vector.broadcast %333 : vector<24x1xf32> to vector<24x24xf32>
    %335 = arith.mulf %330, %334 : vector<24x24xf32>
    %cst_276 = arith.constant dense<0.000000e+00> : vector<24x8xf32>
    %336 = tpu.matmul %335, %322, %cst_276 {dimension_numbers = #tpu.dot_dimension_numbers<[1], [0], [0], [1], [0, 0, 1, 1], [], []>} : vector<24x24xf32>, vector<24x8xf32>, vector<24x8xf32> -> vector<24x8xf32>
    %c1_277 = arith.constant 1 : index
    %c0_278 = arith.constant 0 : index
    %c0_279 = arith.constant 0 : index
    %c0_280 = arith.constant 0 : index
    %337 = vector.load %arg6[%c1_277, %c0_278, %c0_279, %c0_280] : memref<2x4x8x32xf32, #tpu.memory_space<vmem>>, vector<1x1x8x32xf32>
    %338 = vector.shape_cast %337 : vector<1x1x8x32xf32> to vector<8x32xf32>
    %cst_281 = arith.constant dense<0.000000e+00> : vector<24x32xf32>
    %339 = tpu.matmul %336, %338, %cst_281 {dimension_numbers = #tpu.dot_dimension_numbers<[1], [0], [0], [1], [0, 0, 1, 1], [], []>} : vector<24x8xf32>, vector<8x32xf32>, vector<24x32xf32> -> vector<24x32xf32>
    %340 = arith.addf %301, %339 : vector<24x32xf32>
    %c1_282 = arith.constant 1 : index
    %c0_283 = arith.constant 0 : index
    %c1_284 = arith.constant 1 : index
    %c0_285 = arith.constant 0 : index
    %c0_286 = arith.constant 0 : index
    %341 = vector.load %arg4[%c1_282, %c0_283, %c1_284, %c0_285, %c0_286] : memref<2x3x4x32x8xf32, #tpu.memory_space<vmem>>, vector<1x1x1x32x8xf32>
    %342 = vector.shape_cast %341 : vector<1x1x1x32x8xf32> to vector<32x8xf32>
    %cst_287 = arith.constant dense<0.000000e+00> : vector<24x8xf32>
    %343 = tpu.matmul %300, %342, %cst_287 {dimension_numbers = #tpu.dot_dimension_numbers<[1], [0], [0], [1], [0, 0, 1, 1], [], []>} : vector<24x32xf32>, vector<32x8xf32>, vector<24x8xf32> -> vector<24x8xf32>
    %c1_288 = arith.constant 1 : index
    %c0_289 = arith.constant 0 : index
    %c1_290 = arith.constant 1 : index
    %c0_291 = arith.constant 0 : index
    %c0_292 = arith.constant 0 : index
    %344 = vector.load %arg5[%c1_288, %c0_289, %c1_290, %c0_291, %c0_292] : memref<2x3x4x1x8xf32, #tpu.memory_space<vmem>>, vector<1x1x1x1x8xf32>
    %345 = vector.shape_cast %344 : vector<1x1x1x1x8xf32> to vector<1x8xf32>
    %346 = vector.broadcast %345 : vector<1x8xf32> to vector<24x8xf32>
    %347 = arith.addf %343, %346 : vector<24x8xf32>
    %c1_293 = arith.constant 1 : index
    %c1_294 = arith.constant 1 : index
    %c1_295 = arith.constant 1 : index
    %c0_296 = arith.constant 0 : index
    %c0_297 = arith.constant 0 : index
    %348 = vector.load %arg4[%c1_293, %c1_294, %c1_295, %c0_296, %c0_297] : memref<2x3x4x32x8xf32, #tpu.memory_space<vmem>>, vector<1x1x1x32x8xf32>
    %349 = vector.shape_cast %348 : vector<1x1x1x32x8xf32> to vector<32x8xf32>
    %cst_298 = arith.constant dense<0.000000e+00> : vector<24x8xf32>
    %350 = tpu.matmul %300, %349, %cst_298 {dimension_numbers = #tpu.dot_dimension_numbers<[1], [0], [0], [1], [0, 0, 1, 1], [], []>} : vector<24x32xf32>, vector<32x8xf32>, vector<24x8xf32> -> vector<24x8xf32>
    %c1_299 = arith.constant 1 : index
    %c1_300 = arith.constant 1 : index
    %c1_301 = arith.constant 1 : index
    %c0_302 = arith.constant 0 : index
    %c0_303 = arith.constant 0 : index
    %351 = vector.load %arg5[%c1_299, %c1_300, %c1_301, %c0_302, %c0_303] : memref<2x3x4x1x8xf32, #tpu.memory_space<vmem>>, vector<1x1x1x1x8xf32>
    %352 = vector.shape_cast %351 : vector<1x1x1x1x8xf32> to vector<1x8xf32>
    %353 = vector.broadcast %352 : vector<1x8xf32> to vector<24x8xf32>
    %354 = arith.addf %350, %353 : vector<24x8xf32>
    %c1_304 = arith.constant 1 : index
    %c2_305 = arith.constant 2 : index
    %c1_306 = arith.constant 1 : index
    %c0_307 = arith.constant 0 : index
    %c0_308 = arith.constant 0 : index
    %355 = vector.load %arg4[%c1_304, %c2_305, %c1_306, %c0_307, %c0_308] : memref<2x3x4x32x8xf32, #tpu.memory_space<vmem>>, vector<1x1x1x32x8xf32>
    %356 = vector.shape_cast %355 : vector<1x1x1x32x8xf32> to vector<32x8xf32>
    %cst_309 = arith.constant dense<0.000000e+00> : vector<24x8xf32>
    %357 = tpu.matmul %300, %356, %cst_309 {dimension_numbers = #tpu.dot_dimension_numbers<[1], [0], [0], [1], [0, 0, 1, 1], [], []>} : vector<24x32xf32>, vector<32x8xf32>, vector<24x8xf32> -> vector<24x8xf32>
    %c1_310 = arith.constant 1 : index
    %c2_311 = arith.constant 2 : index
    %c1_312 = arith.constant 1 : index
    %c0_313 = arith.constant 0 : index
    %c0_314 = arith.constant 0 : index
    %358 = vector.load %arg5[%c1_310, %c2_311, %c1_312, %c0_313, %c0_314] : memref<2x3x4x1x8xf32, #tpu.memory_space<vmem>>, vector<1x1x1x1x8xf32>
    %359 = vector.shape_cast %358 : vector<1x1x1x1x8xf32> to vector<1x8xf32>
    %360 = vector.broadcast %359 : vector<1x8xf32> to vector<24x8xf32>
    %361 = arith.addf %357, %360 : vector<24x8xf32>
    %cst_315 = arith.constant dense<0.000000e+00> : vector<24x24xf32>
    %362 = tpu.matmul %347, %354, %cst_315 {dimension_numbers = #tpu.dot_dimension_numbers<[1], [1], [0], [0], [0, 0, 1, 0], [], []>} : vector<24x8xf32>, vector<24x8xf32>, vector<24x24xf32> -> vector<24x24xf32>
    %cst_316 = arith.constant 0.353553385 : f32
    %363 = vector.broadcast %cst_316 : f32 to vector<24x24xf32>
    %364 = arith.mulf %362, %363 : vector<24x24xf32>
    %cst_317 = arith.constant dense<0xFF800000> : vector<24xf32>
    %365 = vector.multi_reduction <maximumf>, %364, %cst_317 [1] : vector<24x24xf32> to vector<24xf32>
    %366 = vector.shape_cast %365 : vector<24xf32> to vector<24x1xf32>
    %367 = vector.broadcast %366 : vector<24x1xf32> to vector<24x24xf32>
    %368 = arith.subf %364, %367 : vector<24x24xf32>
    %369 = math.exp %368 : vector<24x24xf32>
    %cst_318 = arith.constant dense<0.000000e+00> : vector<24xf32>
    %370 = vector.multi_reduction <add>, %369, %cst_318 [1] : vector<24x24xf32> to vector<24xf32>
    %371 = vector.shape_cast %370 : vector<24xf32> to vector<24x1xf32>
    %372 = tpu.reciprocal %371 {approx = true} : vector<24x1xf32> -> vector<24x1xf32>
    %373 = vector.broadcast %372 : vector<24x1xf32> to vector<24x24xf32>
    %374 = arith.mulf %369, %373 : vector<24x24xf32>
    %cst_319 = arith.constant dense<0.000000e+00> : vector<24x8xf32>
    %375 = tpu.matmul %374, %361, %cst_319 {dimension_numbers = #tpu.dot_dimension_numbers<[1], [0], [0], [1], [0, 0, 1, 1], [], []>} : vector<24x24xf32>, vector<24x8xf32>, vector<24x8xf32> -> vector<24x8xf32>
    %c1_320 = arith.constant 1 : index
    %c1_321 = arith.constant 1 : index
    %c0_322 = arith.constant 0 : index
    %c0_323 = arith.constant 0 : index
    %376 = vector.load %arg6[%c1_320, %c1_321, %c0_322, %c0_323] : memref<2x4x8x32xf32, #tpu.memory_space<vmem>>, vector<1x1x8x32xf32>
    %377 = vector.shape_cast %376 : vector<1x1x8x32xf32> to vector<8x32xf32>
    %cst_324 = arith.constant dense<0.000000e+00> : vector<24x32xf32>
    %378 = tpu.matmul %375, %377, %cst_324 {dimension_numbers = #tpu.dot_dimension_numbers<[1], [0], [0], [1], [0, 0, 1, 1], [], []>} : vector<24x8xf32>, vector<8x32xf32>, vector<24x32xf32> -> vector<24x32xf32>
    %379 = arith.addf %340, %378 : vector<24x32xf32>
    %c1_325 = arith.constant 1 : index
    %c0_326 = arith.constant 0 : index
    %c2_327 = arith.constant 2 : index
    %c0_328 = arith.constant 0 : index
    %c0_329 = arith.constant 0 : index
    %380 = vector.load %arg4[%c1_325, %c0_326, %c2_327, %c0_328, %c0_329] : memref<2x3x4x32x8xf32, #tpu.memory_space<vmem>>, vector<1x1x1x32x8xf32>
    %381 = vector.shape_cast %380 : vector<1x1x1x32x8xf32> to vector<32x8xf32>
    %cst_330 = arith.constant dense<0.000000e+00> : vector<24x8xf32>
    %382 = tpu.matmul %300, %381, %cst_330 {dimension_numbers = #tpu.dot_dimension_numbers<[1], [0], [0], [1], [0, 0, 1, 1], [], []>} : vector<24x32xf32>, vector<32x8xf32>, vector<24x8xf32> -> vector<24x8xf32>
    %c1_331 = arith.constant 1 : index
    %c0_332 = arith.constant 0 : index
    %c2_333 = arith.constant 2 : index
    %c0_334 = arith.constant 0 : index
    %c0_335 = arith.constant 0 : index
    %383 = vector.load %arg5[%c1_331, %c0_332, %c2_333, %c0_334, %c0_335] : memref<2x3x4x1x8xf32, #tpu.memory_space<vmem>>, vector<1x1x1x1x8xf32>
    %384 = vector.shape_cast %383 : vector<1x1x1x1x8xf32> to vector<1x8xf32>
    %385 = vector.broadcast %384 : vector<1x8xf32> to vector<24x8xf32>
    %386 = arith.addf %382, %385 : vector<24x8xf32>
    %c1_336 = arith.constant 1 : index
    %c1_337 = arith.constant 1 : index
    %c2_338 = arith.constant 2 : index
    %c0_339 = arith.constant 0 : index
    %c0_340 = arith.constant 0 : index
    %387 = vector.load %arg4[%c1_336, %c1_337, %c2_338, %c0_339, %c0_340] : memref<2x3x4x32x8xf32, #tpu.memory_space<vmem>>, vector<1x1x1x32x8xf32>
    %388 = vector.shape_cast %387 : vector<1x1x1x32x8xf32> to vector<32x8xf32>
    %cst_341 = arith.constant dense<0.000000e+00> : vector<24x8xf32>
    %389 = tpu.matmul %300, %388, %cst_341 {dimension_numbers = #tpu.dot_dimension_numbers<[1], [0], [0], [1], [0, 0, 1, 1], [], []>} : vector<24x32xf32>, vector<32x8xf32>, vector<24x8xf32> -> vector<24x8xf32>
    %c1_342 = arith.constant 1 : index
    %c1_343 = arith.constant 1 : index
    %c2_344 = arith.constant 2 : index
    %c0_345 = arith.constant 0 : index
    %c0_346 = arith.constant 0 : index
    %390 = vector.load %arg5[%c1_342, %c1_343, %c2_344, %c0_345, %c0_346] : memref<2x3x4x1x8xf32, #tpu.memory_space<vmem>>, vector<1x1x1x1x8xf32>
    %391 = vector.shape_cast %390 : vector<1x1x1x1x8xf32> to vector<1x8xf32>
    %392 = vector.broadcast %391 : vector<1x8xf32> to vector<24x8xf32>
    %393 = arith.addf %389, %392 : vector<24x8xf32>
    %c1_347 = arith.constant 1 : index
    %c2_348 = arith.constant 2 : index
    %c2_349 = arith.constant 2 : index
    %c0_350 = arith.constant 0 : index
    %c0_351 = arith.constant 0 : index
    %394 = vector.load %arg4[%c1_347, %c2_348, %c2_349, %c0_350, %c0_351] : memref<2x3x4x32x8xf32, #tpu.memory_space<vmem>>, vector<1x1x1x32x8xf32>
    %395 = vector.shape_cast %394 : vector<1x1x1x32x8xf32> to vector<32x8xf32>
    %cst_352 = arith.constant dense<0.000000e+00> : vector<24x8xf32>
    %396 = tpu.matmul %300, %395, %cst_352 {dimension_numbers = #tpu.dot_dimension_numbers<[1], [0], [0], [1], [0, 0, 1, 1], [], []>} : vector<24x32xf32>, vector<32x8xf32>, vector<24x8xf32> -> vector<24x8xf32>
    %c1_353 = arith.constant 1 : index
    %c2_354 = arith.constant 2 : index
    %c2_355 = arith.constant 2 : index
    %c0_356 = arith.constant 0 : index
    %c0_357 = arith.constant 0 : index
    %397 = vector.load %arg5[%c1_353, %c2_354, %c2_355, %c0_356, %c0_357] : memref<2x3x4x1x8xf32, #tpu.memory_space<vmem>>, vector<1x1x1x1x8xf32>
    %398 = vector.shape_cast %397 : vector<1x1x1x1x8xf32> to vector<1x8xf32>
    %399 = vector.broadcast %398 : vector<1x8xf32> to vector<24x8xf32>
    %400 = arith.addf %396, %399 : vector<24x8xf32>
    %cst_358 = arith.constant dense<0.000000e+00> : vector<24x24xf32>
    %401 = tpu.matmul %386, %393, %cst_358 {dimension_numbers = #tpu.dot_dimension_numbers<[1], [1], [0], [0], [0, 0, 1, 0], [], []>} : vector<24x8xf32>, vector<24x8xf32>, vector<24x24xf32> -> vector<24x24xf32>
    %cst_359 = arith.constant 0.353553385 : f32
    %402 = vector.broadcast %cst_359 : f32 to vector<24x24xf32>
    %403 = arith.mulf %401, %402 : vector<24x24xf32>
    %cst_360 = arith.constant dense<0xFF800000> : vector<24xf32>
    %404 = vector.multi_reduction <maximumf>, %403, %cst_360 [1] : vector<24x24xf32> to vector<24xf32>
    %405 = vector.shape_cast %404 : vector<24xf32> to vector<24x1xf32>
    %406 = vector.broadcast %405 : vector<24x1xf32> to vector<24x24xf32>
    %407 = arith.subf %403, %406 : vector<24x24xf32>
    %408 = math.exp %407 : vector<24x24xf32>
    %cst_361 = arith.constant dense<0.000000e+00> : vector<24xf32>
    %409 = vector.multi_reduction <add>, %408, %cst_361 [1] : vector<24x24xf32> to vector<24xf32>
    %410 = vector.shape_cast %409 : vector<24xf32> to vector<24x1xf32>
    %411 = tpu.reciprocal %410 {approx = true} : vector<24x1xf32> -> vector<24x1xf32>
    %412 = vector.broadcast %411 : vector<24x1xf32> to vector<24x24xf32>
    %413 = arith.mulf %408, %412 : vector<24x24xf32>
    %cst_362 = arith.constant dense<0.000000e+00> : vector<24x8xf32>
    %414 = tpu.matmul %413, %400, %cst_362 {dimension_numbers = #tpu.dot_dimension_numbers<[1], [0], [0], [1], [0, 0, 1, 1], [], []>} : vector<24x24xf32>, vector<24x8xf32>, vector<24x8xf32> -> vector<24x8xf32>
    %c1_363 = arith.constant 1 : index
    %c2_364 = arith.constant 2 : index
    %c0_365 = arith.constant 0 : index
    %c0_366 = arith.constant 0 : index
    %415 = vector.load %arg6[%c1_363, %c2_364, %c0_365, %c0_366] : memref<2x4x8x32xf32, #tpu.memory_space<vmem>>, vector<1x1x8x32xf32>
    %416 = vector.shape_cast %415 : vector<1x1x8x32xf32> to vector<8x32xf32>
    %cst_367 = arith.constant dense<0.000000e+00> : vector<24x32xf32>
    %417 = tpu.matmul %414, %416, %cst_367 {dimension_numbers = #tpu.dot_dimension_numbers<[1], [0], [0], [1], [0, 0, 1, 1], [], []>} : vector<24x8xf32>, vector<8x32xf32>, vector<24x32xf32> -> vector<24x32xf32>
    %418 = arith.addf %379, %417 : vector<24x32xf32>
    %c1_368 = arith.constant 1 : index
    %c0_369 = arith.constant 0 : index
    %c3_370 = arith.constant 3 : index
    %c0_371 = arith.constant 0 : index
    %c0_372 = arith.constant 0 : index
    %419 = vector.load %arg4[%c1_368, %c0_369, %c3_370, %c0_371, %c0_372] : memref<2x3x4x32x8xf32, #tpu.memory_space<vmem>>, vector<1x1x1x32x8xf32>
    %420 = vector.shape_cast %419 : vector<1x1x1x32x8xf32> to vector<32x8xf32>
    %cst_373 = arith.constant dense<0.000000e+00> : vector<24x8xf32>
    %421 = tpu.matmul %300, %420, %cst_373 {dimension_numbers = #tpu.dot_dimension_numbers<[1], [0], [0], [1], [0, 0, 1, 1], [], []>} : vector<24x32xf32>, vector<32x8xf32>, vector<24x8xf32> -> vector<24x8xf32>
    %c1_374 = arith.constant 1 : index
    %c0_375 = arith.constant 0 : index
    %c3_376 = arith.constant 3 : index
    %c0_377 = arith.constant 0 : index
    %c0_378 = arith.constant 0 : index
    %422 = vector.load %arg5[%c1_374, %c0_375, %c3_376, %c0_377, %c0_378] : memref<2x3x4x1x8xf32, #tpu.memory_space<vmem>>, vector<1x1x1x1x8xf32>
    %423 = vector.shape_cast %422 : vector<1x1x1x1x8xf32> to vector<1x8xf32>
    %424 = vector.broadcast %423 : vector<1x8xf32> to vector<24x8xf32>
    %425 = arith.addf %421, %424 : vector<24x8xf32>
    %c1_379 = arith.constant 1 : index
    %c1_380 = arith.constant 1 : index
    %c3_381 = arith.constant 3 : index
    %c0_382 = arith.constant 0 : index
    %c0_383 = arith.constant 0 : index
    %426 = vector.load %arg4[%c1_379, %c1_380, %c3_381, %c0_382, %c0_383] : memref<2x3x4x32x8xf32, #tpu.memory_space<vmem>>, vector<1x1x1x32x8xf32>
    %427 = vector.shape_cast %426 : vector<1x1x1x32x8xf32> to vector<32x8xf32>
    %cst_384 = arith.constant dense<0.000000e+00> : vector<24x8xf32>
    %428 = tpu.matmul %300, %427, %cst_384 {dimension_numbers = #tpu.dot_dimension_numbers<[1], [0], [0], [1], [0, 0, 1, 1], [], []>} : vector<24x32xf32>, vector<32x8xf32>, vector<24x8xf32> -> vector<24x8xf32>
    %c1_385 = arith.constant 1 : index
    %c1_386 = arith.constant 1 : index
    %c3_387 = arith.constant 3 : index
    %c0_388 = arith.constant 0 : index
    %c0_389 = arith.constant 0 : index
    %429 = vector.load %arg5[%c1_385, %c1_386, %c3_387, %c0_388, %c0_389] : memref<2x3x4x1x8xf32, #tpu.memory_space<vmem>>, vector<1x1x1x1x8xf32>
    %430 = vector.shape_cast %429 : vector<1x1x1x1x8xf32> to vector<1x8xf32>
    %431 = vector.broadcast %430 : vector<1x8xf32> to vector<24x8xf32>
    %432 = arith.addf %428, %431 : vector<24x8xf32>
    %c1_390 = arith.constant 1 : index
    %c2_391 = arith.constant 2 : index
    %c3_392 = arith.constant 3 : index
    %c0_393 = arith.constant 0 : index
    %c0_394 = arith.constant 0 : index
    %433 = vector.load %arg4[%c1_390, %c2_391, %c3_392, %c0_393, %c0_394] : memref<2x3x4x32x8xf32, #tpu.memory_space<vmem>>, vector<1x1x1x32x8xf32>
    %434 = vector.shape_cast %433 : vector<1x1x1x32x8xf32> to vector<32x8xf32>
    %cst_395 = arith.constant dense<0.000000e+00> : vector<24x8xf32>
    %435 = tpu.matmul %300, %434, %cst_395 {dimension_numbers = #tpu.dot_dimension_numbers<[1], [0], [0], [1], [0, 0, 1, 1], [], []>} : vector<24x32xf32>, vector<32x8xf32>, vector<24x8xf32> -> vector<24x8xf32>
    %c1_396 = arith.constant 1 : index
    %c2_397 = arith.constant 2 : index
    %c3_398 = arith.constant 3 : index
    %c0_399 = arith.constant 0 : index
    %c0_400 = arith.constant 0 : index
    %436 = vector.load %arg5[%c1_396, %c2_397, %c3_398, %c0_399, %c0_400] : memref<2x3x4x1x8xf32, #tpu.memory_space<vmem>>, vector<1x1x1x1x8xf32>
    %437 = vector.shape_cast %436 : vector<1x1x1x1x8xf32> to vector<1x8xf32>
    %438 = vector.broadcast %437 : vector<1x8xf32> to vector<24x8xf32>
    %439 = arith.addf %435, %438 : vector<24x8xf32>
    %cst_401 = arith.constant dense<0.000000e+00> : vector<24x24xf32>
    %440 = tpu.matmul %425, %432, %cst_401 {dimension_numbers = #tpu.dot_dimension_numbers<[1], [1], [0], [0], [0, 0, 1, 0], [], []>} : vector<24x8xf32>, vector<24x8xf32>, vector<24x24xf32> -> vector<24x24xf32>
    %cst_402 = arith.constant 0.353553385 : f32
    %441 = vector.broadcast %cst_402 : f32 to vector<24x24xf32>
    %442 = arith.mulf %440, %441 : vector<24x24xf32>
    %cst_403 = arith.constant dense<0xFF800000> : vector<24xf32>
    %443 = vector.multi_reduction <maximumf>, %442, %cst_403 [1] : vector<24x24xf32> to vector<24xf32>
    %444 = vector.shape_cast %443 : vector<24xf32> to vector<24x1xf32>
    %445 = vector.broadcast %444 : vector<24x1xf32> to vector<24x24xf32>
    %446 = arith.subf %442, %445 : vector<24x24xf32>
    %447 = math.exp %446 : vector<24x24xf32>
    %cst_404 = arith.constant dense<0.000000e+00> : vector<24xf32>
    %448 = vector.multi_reduction <add>, %447, %cst_404 [1] : vector<24x24xf32> to vector<24xf32>
    %449 = vector.shape_cast %448 : vector<24xf32> to vector<24x1xf32>
    %450 = tpu.reciprocal %449 {approx = true} : vector<24x1xf32> -> vector<24x1xf32>
    %451 = vector.broadcast %450 : vector<24x1xf32> to vector<24x24xf32>
    %452 = arith.mulf %447, %451 : vector<24x24xf32>
    %cst_405 = arith.constant dense<0.000000e+00> : vector<24x8xf32>
    %453 = tpu.matmul %452, %439, %cst_405 {dimension_numbers = #tpu.dot_dimension_numbers<[1], [0], [0], [1], [0, 0, 1, 1], [], []>} : vector<24x24xf32>, vector<24x8xf32>, vector<24x8xf32> -> vector<24x8xf32>
    %c1_406 = arith.constant 1 : index
    %c3_407 = arith.constant 3 : index
    %c0_408 = arith.constant 0 : index
    %c0_409 = arith.constant 0 : index
    %454 = vector.load %arg6[%c1_406, %c3_407, %c0_408, %c0_409] : memref<2x4x8x32xf32, #tpu.memory_space<vmem>>, vector<1x1x8x32xf32>
    %455 = vector.shape_cast %454 : vector<1x1x8x32xf32> to vector<8x32xf32>
    %cst_410 = arith.constant dense<0.000000e+00> : vector<24x32xf32>
    %456 = tpu.matmul %453, %455, %cst_410 {dimension_numbers = #tpu.dot_dimension_numbers<[1], [0], [0], [1], [0, 0, 1, 1], [], []>} : vector<24x8xf32>, vector<8x32xf32>, vector<24x32xf32> -> vector<24x32xf32>
    %457 = arith.addf %418, %456 : vector<24x32xf32>
    %458 = arith.addf %274, %457 : vector<24x32xf32>
    %c1_411 = arith.constant 1 : index
    %c2_412 = arith.constant 2 : index
    %c0_413 = arith.constant 0 : index
    %459 = vector.load %arg9[%c1_411, %c2_412, %c0_413] : memref<2x8x128xf32, #tpu.memory_space<vmem>>, vector<1x1x32xf32>
    %460 = vector.shape_cast %459 : vector<1x1x32xf32> to vector<1x32xf32>
    %461 = vector.broadcast %460 : vector<1x32xf32> to vector<24x32xf32>
    %462 = arith.addf %458, %461 : vector<24x32xf32>
    %c1_414 = arith.constant 1 : index
    %c3_415 = arith.constant 3 : index
    %c0_416 = arith.constant 0 : index
    %463 = vector.load %arg9[%c1_414, %c3_415, %c0_416] : memref<2x8x128xf32, #tpu.memory_space<vmem>>, vector<1x1x32xf32>
    %464 = vector.shape_cast %463 : vector<1x1x32xf32> to vector<1x32xf32>
    %c1_417 = arith.constant 1 : index
    %c4_418 = arith.constant 4 : index
    %c0_419 = arith.constant 0 : index
    %465 = vector.load %arg9[%c1_417, %c4_418, %c0_419] : memref<2x8x128xf32, #tpu.memory_space<vmem>>, vector<1x1x32xf32>
    %466 = vector.shape_cast %465 : vector<1x1x32xf32> to vector<1x32xf32>
    %cst_420 = arith.constant dense<0.000000e+00> : vector<24xf32>
    %467 = vector.multi_reduction <add>, %462, %cst_420 [1] : vector<24x32xf32> to vector<24xf32>
    %468 = vector.shape_cast %467 : vector<24xf32> to vector<24x1xf32>
    %cst_421 = arith.constant 3.200000e+01 : f32
    %469 = vector.broadcast %cst_421 : f32 to vector<24x1xf32>
    %470 = arith.divf %468, %469 : vector<24x1xf32>
    %471 = vector.broadcast %470 : vector<24x1xf32> to vector<24x32xf32>
    %472 = arith.subf %462, %471 : vector<24x32xf32>
    %473 = arith.mulf %472, %472 : vector<24x32xf32>
    %cst_422 = arith.constant dense<0.000000e+00> : vector<24xf32>
    %474 = vector.multi_reduction <add>, %473, %cst_422 [1] : vector<24x32xf32> to vector<24xf32>
    %475 = vector.shape_cast %474 : vector<24xf32> to vector<24x1xf32>
    %cst_423 = arith.constant 3.200000e+01 : f32
    %476 = vector.broadcast %cst_423 : f32 to vector<24x1xf32>
    %477 = arith.divf %475, %476 : vector<24x1xf32>
    %478 = vector.broadcast %470 : vector<24x1xf32> to vector<24x32xf32>
    %479 = arith.subf %462, %478 : vector<24x32xf32>
    %cst_424 = arith.constant 9.99999974E-6 : f32
    %480 = vector.broadcast %cst_424 : f32 to vector<24x1xf32>
    %481 = arith.addf %477, %480 : vector<24x1xf32>
    %482 = math.rsqrt %481 : vector<24x1xf32>
    %483 = vector.broadcast %482 : vector<24x1xf32> to vector<24x32xf32>
    %484 = arith.mulf %479, %483 : vector<24x32xf32>
    %485 = vector.broadcast %464 : vector<1x32xf32> to vector<24x32xf32>
    %486 = arith.mulf %484, %485 : vector<24x32xf32>
    %487 = vector.broadcast %466 : vector<1x32xf32> to vector<24x32xf32>
    %488 = arith.addf %486, %487 : vector<24x32xf32>
    %c1_425 = arith.constant 1 : index
    %c0_426 = arith.constant 0 : index
    %c0_427 = arith.constant 0 : index
    %489 = vector.load %arg7[%c1_425, %c0_426, %c0_427] : memref<2x32x64xf32, #tpu.memory_space<vmem>>, vector<1x32x64xf32>
    %490 = vector.shape_cast %489 : vector<1x32x64xf32> to vector<32x64xf32>
    %cst_428 = arith.constant dense<0.000000e+00> : vector<24x64xf32>
    %491 = tpu.matmul %488, %490, %cst_428 {dimension_numbers = #tpu.dot_dimension_numbers<[1], [0], [0], [1], [0, 0, 1, 1], [], []>} : vector<24x32xf32>, vector<32x64xf32>, vector<24x64xf32> -> vector<24x64xf32>
    %c1_429 = arith.constant 1 : index
    %c5_430 = arith.constant 5 : index
    %c0_431 = arith.constant 0 : index
    %492 = vector.load %arg9[%c1_429, %c5_430, %c0_431] : memref<2x8x128xf32, #tpu.memory_space<vmem>>, vector<1x1x64xf32>
    %493 = vector.shape_cast %492 : vector<1x1x64xf32> to vector<1x64xf32>
    %494 = vector.broadcast %493 : vector<1x64xf32> to vector<24x64xf32>
    %495 = arith.addf %491, %494 : vector<24x64xf32>
    %cst_432 = arith.constant 5.000000e-01 : f32
    %496 = vector.broadcast %cst_432 : f32 to vector<24x64xf32>
    %497 = arith.mulf %496, %495 : vector<24x64xf32>
    %cst_433 = arith.constant 0.707106769 : f32
    %498 = vector.broadcast %cst_433 : f32 to vector<24x64xf32>
    %499 = arith.mulf %495, %498 : vector<24x64xf32>
    %500 = math.absf %499 : vector<24x64xf32>
    %cst_434 = arith.constant 0.327591091 : f32
    %501 = vector.broadcast %cst_434 : f32 to vector<24x64xf32>
    %502 = arith.mulf %501, %500 : vector<24x64xf32>
    %cst_435 = arith.constant 1.000000e+00 : f32
    %503 = vector.broadcast %cst_435 : f32 to vector<24x64xf32>
    %504 = arith.addf %503, %502 : vector<24x64xf32>
    %cst_436 = arith.constant 1.000000e+00 : f32
    %505 = vector.broadcast %cst_436 : f32 to vector<24x64xf32>
    %506 = arith.divf %505, %504 : vector<24x64xf32>
    %cst_437 = arith.constant 1.06140542 : f32
    %507 = vector.broadcast %cst_437 : f32 to vector<24x64xf32>
    %508 = arith.mulf %507, %506 : vector<24x64xf32>
    %cst_438 = arith.constant -1.45315206 : f32
    %509 = vector.broadcast %cst_438 : f32 to vector<24x64xf32>
    %510 = arith.addf %508, %509 : vector<24x64xf32>
    %511 = arith.mulf %510, %506 : vector<24x64xf32>
    %cst_439 = arith.constant 1.42141378 : f32
    %512 = vector.broadcast %cst_439 : f32 to vector<24x64xf32>
    %513 = arith.addf %511, %512 : vector<24x64xf32>
    %514 = arith.mulf %513, %506 : vector<24x64xf32>
    %cst_440 = arith.constant -0.284496725 : f32
    %515 = vector.broadcast %cst_440 : f32 to vector<24x64xf32>
    %516 = arith.addf %514, %515 : vector<24x64xf32>
    %517 = arith.mulf %516, %506 : vector<24x64xf32>
    %cst_441 = arith.constant 0.254829586 : f32
    %518 = vector.broadcast %cst_441 : f32 to vector<24x64xf32>
    %519 = arith.addf %517, %518 : vector<24x64xf32>
    %520 = arith.mulf %519, %506 : vector<24x64xf32>
    %cst_442 = arith.constant 0.000000e+00 : f32
    %521 = vector.broadcast %cst_442 : f32 to vector<24x64xf32>
    %522 = arith.subf %521, %500 : vector<24x64xf32>
    %523 = arith.mulf %522, %500 : vector<24x64xf32>
    %524 = math.exp %523 : vector<24x64xf32>
    %525 = arith.mulf %520, %524 : vector<24x64xf32>
    %cst_443 = arith.constant 1.000000e+00 : f32
    %526 = vector.broadcast %cst_443 : f32 to vector<24x64xf32>
    %527 = arith.subf %526, %525 : vector<24x64xf32>
    %cst_444 = arith.constant 0.000000e+00 : f32
    %528 = vector.broadcast %cst_444 : f32 to vector<24x64xf32>
    %529 = arith.cmpf olt, %499, %528 : vector<24x64xf32>
    %cst_445 = arith.constant 0.000000e+00 : f32
    %530 = vector.broadcast %cst_445 : f32 to vector<24x64xf32>
    %531 = arith.subf %530, %527 : vector<24x64xf32>
    %532 = arith.select %529, %531, %527 : vector<24x64xi1>, vector<24x64xf32>
    %cst_446 = arith.constant 1.000000e+00 : f32
    %533 = vector.broadcast %cst_446 : f32 to vector<24x64xf32>
    %534 = arith.addf %533, %532 : vector<24x64xf32>
    %535 = arith.mulf %497, %534 : vector<24x64xf32>
    %c1_447 = arith.constant 1 : index
    %c0_448 = arith.constant 0 : index
    %c0_449 = arith.constant 0 : index
    %536 = vector.load %arg8[%c1_447, %c0_448, %c0_449] : memref<2x64x32xf32, #tpu.memory_space<vmem>>, vector<1x64x32xf32>
    %537 = vector.shape_cast %536 : vector<1x64x32xf32> to vector<64x32xf32>
    %cst_450 = arith.constant dense<0.000000e+00> : vector<24x32xf32>
    %538 = tpu.matmul %535, %537, %cst_450 {dimension_numbers = #tpu.dot_dimension_numbers<[1], [0], [0], [1], [0, 0, 1, 1], [], []>} : vector<24x64xf32>, vector<64x32xf32>, vector<24x32xf32> -> vector<24x32xf32>
    %c1_451 = arith.constant 1 : index
    %c6_452 = arith.constant 6 : index
    %c0_453 = arith.constant 0 : index
    %539 = vector.load %arg9[%c1_451, %c6_452, %c0_453] : memref<2x8x128xf32, #tpu.memory_space<vmem>>, vector<1x1x32xf32>
    %540 = vector.shape_cast %539 : vector<1x1x32xf32> to vector<1x32xf32>
    %541 = vector.broadcast %540 : vector<1x32xf32> to vector<24x32xf32>
    %542 = arith.addf %538, %541 : vector<24x32xf32>
    %543 = arith.addf %462, %542 : vector<24x32xf32>
    %c0_454 = arith.constant 0 : index
    %c0_455 = arith.constant 0 : index
    %544 = vector.load %arg10[%c0_454, %c0_455] : memref<8x128xf32, #tpu.memory_space<vmem>>, vector<1x32xf32>
    %c1_456 = arith.constant 1 : index
    %c0_457 = arith.constant 0 : index
    %545 = vector.load %arg10[%c1_456, %c0_457] : memref<8x128xf32, #tpu.memory_space<vmem>>, vector<1x32xf32>
    %cst_458 = arith.constant dense<0.000000e+00> : vector<24xf32>
    %546 = vector.multi_reduction <add>, %543, %cst_458 [1] : vector<24x32xf32> to vector<24xf32>
    %547 = vector.shape_cast %546 : vector<24xf32> to vector<24x1xf32>
    %cst_459 = arith.constant 3.200000e+01 : f32
    %548 = vector.broadcast %cst_459 : f32 to vector<24x1xf32>
    %549 = arith.divf %547, %548 : vector<24x1xf32>
    %550 = vector.broadcast %549 : vector<24x1xf32> to vector<24x32xf32>
    %551 = arith.subf %543, %550 : vector<24x32xf32>
    %552 = arith.mulf %551, %551 : vector<24x32xf32>
    %cst_460 = arith.constant dense<0.000000e+00> : vector<24xf32>
    %553 = vector.multi_reduction <add>, %552, %cst_460 [1] : vector<24x32xf32> to vector<24xf32>
    %554 = vector.shape_cast %553 : vector<24xf32> to vector<24x1xf32>
    %cst_461 = arith.constant 3.200000e+01 : f32
    %555 = vector.broadcast %cst_461 : f32 to vector<24x1xf32>
    %556 = arith.divf %554, %555 : vector<24x1xf32>
    %557 = vector.broadcast %549 : vector<24x1xf32> to vector<24x32xf32>
    %558 = arith.subf %543, %557 : vector<24x32xf32>
    %cst_462 = arith.constant 9.99999974E-6 : f32
    %559 = vector.broadcast %cst_462 : f32 to vector<24x1xf32>
    %560 = arith.addf %556, %559 : vector<24x1xf32>
    %561 = math.rsqrt %560 : vector<24x1xf32>
    %562 = vector.broadcast %561 : vector<24x1xf32> to vector<24x32xf32>
    %563 = arith.mulf %558, %562 : vector<24x32xf32>
    %564 = vector.broadcast %544 : vector<1x32xf32> to vector<24x32xf32>
    %565 = arith.mulf %563, %564 : vector<24x32xf32>
    %566 = vector.broadcast %545 : vector<1x32xf32> to vector<24x32xf32>
    %567 = arith.addf %565, %566 : vector<24x32xf32>
    %568 = vector.extract_strided_slice %567 {offsets = [0, 0], sizes = [16, 32], strides = [1, 1]} : vector<24x32xf32> to vector<16x32xf32>
    %569 = vector.extract_strided_slice %567 {offsets = [16, 0], sizes = [8, 32], strides = [1, 1]} : vector<24x32xf32> to vector<8x32xf32>
    %c0_463 = arith.constant 0 : index
    %c0_464 = arith.constant 0 : index
    %570 = vector.load %arg11[%c0_463, %c0_464] : memref<32x32xf32, #tpu.memory_space<vmem>>, vector<32x32xf32>
    %cst_465 = arith.constant dense<0.000000e+00> : vector<16x32xf32>
    %571 = tpu.matmul %568, %570, %cst_465 {dimension_numbers = #tpu.dot_dimension_numbers<[1], [0], [0], [1], [0, 0, 1, 1], [], []>} : vector<16x32xf32>, vector<32x32xf32>, vector<16x32xf32> -> vector<16x32xf32>
    %c0_466 = arith.constant 0 : index
    %c0_467 = arith.constant 0 : index
    %572 = vector.load %arg12[%c0_466, %c0_467] : memref<32x32xf32, #tpu.memory_space<vmem>>, vector<32x32xf32>
    %cst_468 = arith.constant dense<0.000000e+00> : vector<8x32xf32>
    %573 = tpu.matmul %569, %572, %cst_468 {dimension_numbers = #tpu.dot_dimension_numbers<[1], [0], [0], [1], [0, 0, 1, 1], [], []>} : vector<8x32xf32>, vector<32x32xf32>, vector<8x32xf32> -> vector<8x32xf32>
    %574 = arith.mulf %571, %571 : vector<16x32xf32>
    %cst_469 = arith.constant dense<0.000000e+00> : vector<16xf32>
    %575 = vector.multi_reduction <add>, %574, %cst_469 [1] : vector<16x32xf32> to vector<16xf32>
    %576 = vector.shape_cast %575 : vector<16xf32> to vector<16x1xf32>
    %577 = math.rsqrt %576 : vector<16x1xf32>
    %578 = vector.broadcast %577 : vector<16x1xf32> to vector<16x32xf32>
    %579 = arith.mulf %571, %578 : vector<16x32xf32>
    %580 = arith.mulf %573, %573 : vector<8x32xf32>
    %cst_470 = arith.constant dense<0.000000e+00> : vector<8xf32>
    %581 = vector.multi_reduction <add>, %580, %cst_470 [1] : vector<8x32xf32> to vector<8xf32>
    %582 = vector.shape_cast %581 : vector<8xf32> to vector<8x1xf32>
    %583 = math.rsqrt %582 : vector<8x1xf32>
    %584 = vector.broadcast %583 : vector<8x1xf32> to vector<8x32xf32>
    %585 = arith.mulf %573, %584 : vector<8x32xf32>
    %cst_471 = arith.constant dense<0.000000e+00> : vector<16x8xf32>
    %586 = tpu.matmul %579, %585, %cst_471 {dimension_numbers = #tpu.dot_dimension_numbers<[1], [1], [0], [0], [0, 0, 1, 0], [], []>} : vector<16x32xf32>, vector<8x32xf32>, vector<16x8xf32> -> vector<16x8xf32>
    %c2_472 = arith.constant 2 : index
    %c0_473 = arith.constant 0 : index
    %587 = vector.load %arg10[%c2_472, %c0_473] : memref<8x128xf32, #tpu.memory_space<vmem>>, vector<1x8xf32>
    %c3_474 = arith.constant 3 : index
    %c0_475 = arith.constant 0 : index
    %588 = vector.load %arg10[%c3_474, %c0_475] : memref<8x128xf32, #tpu.memory_space<vmem>>, vector<1x8xf32>
    %cst_476 = arith.constant dense<0.000000e+00> : vector<16xf32>
    %589 = vector.multi_reduction <add>, %586, %cst_476 [1] : vector<16x8xf32> to vector<16xf32>
    %590 = vector.shape_cast %589 : vector<16xf32> to vector<16x1xf32>
    %cst_477 = arith.constant 8.000000e+00 : f32
    %591 = vector.broadcast %cst_477 : f32 to vector<16x1xf32>
    %592 = arith.divf %590, %591 : vector<16x1xf32>
    %593 = vector.broadcast %592 : vector<16x1xf32> to vector<16x8xf32>
    %594 = arith.subf %586, %593 : vector<16x8xf32>
    %595 = arith.mulf %594, %594 : vector<16x8xf32>
    %cst_478 = arith.constant dense<0.000000e+00> : vector<16xf32>
    %596 = vector.multi_reduction <add>, %595, %cst_478 [1] : vector<16x8xf32> to vector<16xf32>
    %597 = vector.shape_cast %596 : vector<16xf32> to vector<16x1xf32>
    %cst_479 = arith.constant 8.000000e+00 : f32
    %598 = vector.broadcast %cst_479 : f32 to vector<16x1xf32>
    %599 = arith.divf %597, %598 : vector<16x1xf32>
    %600 = vector.broadcast %592 : vector<16x1xf32> to vector<16x8xf32>
    %601 = arith.subf %586, %600 : vector<16x8xf32>
    %cst_480 = arith.constant 9.99999974E-6 : f32
    %602 = vector.broadcast %cst_480 : f32 to vector<16x1xf32>
    %603 = arith.addf %599, %602 : vector<16x1xf32>
    %604 = math.rsqrt %603 : vector<16x1xf32>
    %605 = vector.broadcast %604 : vector<16x1xf32> to vector<16x8xf32>
    %606 = arith.mulf %601, %605 : vector<16x8xf32>
    %607 = vector.broadcast %587 : vector<1x8xf32> to vector<16x8xf32>
    %608 = arith.mulf %606, %607 : vector<16x8xf32>
    %609 = vector.broadcast %588 : vector<1x8xf32> to vector<16x8xf32>
    %610 = arith.addf %608, %609 : vector<16x8xf32>
    %c0_481 = arith.constant 0 : index
    %c0_482 = arith.constant 0 : index
    %c0_483 = arith.constant 0 : index
    %611 = vector.load %arg13[%c0_481, %c0_482, %c0_483] : memref<1x16x8xf32, #tpu.memory_space<vmem>>, vector<1x16x8xf32>
    %612 = vector.shape_cast %611 : vector<1x16x8xf32> to vector<16x8xf32>
    %613 = vector.shape_cast %610 : vector<16x8xf32> to vector<1x16x8xf32>
    tpu.vector_store %arg13[%c0_481, %c0_482, %c0_483], %613 {strides = array<i32>} : memref<1x16x8xf32, #tpu.memory_space<vmem>>, vector<1x16x8xf32>,
    return
  }
  func.func @transform_0(%arg0: i32) -> (i32, i32, i32) {
    %c0_i32 = arith.constant 0 : i32
    %c0_i32_0 = arith.constant 0 : i32
    %c0_i32_1 = arith.constant 0 : i32
    return %arg0, %c0_i32, %c0_i32_0 : i32, i32, i32
  }
  func.func @transform_1(%arg0: i32) -> (i32, i32) {
    %c0_i32 = arith.constant 0 : i32
    %c0_i32_0 = arith.constant 0 : i32
    %c0_i32_1 = arith.constant 0 : i32
    return %c0_i32, %c0_i32_0 : i32, i32
  }
  func.func @transform_2(%arg0: i32) -> (i32, i32) {
    %c0_i32 = arith.constant 0 : i32
    %c0_i32_0 = arith.constant 0 : i32
    %c0_i32_1 = arith.constant 0 : i32
    return %c0_i32, %c0_i32_0 : i32, i32
  }
  func.func @transform_3(%arg0: i32) -> (i32, i32, i32, i32, i32) {
    %c0_i32 = arith.constant 0 : i32
    %c0_i32_0 = arith.constant 0 : i32
    %c0_i32_1 = arith.constant 0 : i32
    %c0_i32_2 = arith.constant 0 : i32
    %c0_i32_3 = arith.constant 0 : i32
    %c0_i32_4 = arith.constant 0 : i32
    return %c0_i32, %c0_i32_0, %c0_i32_1, %c0_i32_2, %c0_i32_3 : i32, i32, i32, i32, i32
  }
  func.func @transform_4(%arg0: i32) -> (i32, i32, i32, i32, i32) {
    %c0_i32 = arith.constant 0 : i32
    %c0_i32_0 = arith.constant 0 : i32
    %c0_i32_1 = arith.constant 0 : i32
    %c0_i32_2 = arith.constant 0 : i32
    %c0_i32_3 = arith.constant 0 : i32
    %c0_i32_4 = arith.constant 0 : i32
    return %c0_i32, %c0_i32_0, %c0_i32_1, %c0_i32_2, %c0_i32_3 : i32, i32, i32, i32, i32
  }
  func.func @transform_5(%arg0: i32) -> (i32, i32, i32, i32) {
    %c0_i32 = arith.constant 0 : i32
    %c0_i32_0 = arith.constant 0 : i32
    %c0_i32_1 = arith.constant 0 : i32
    %c0_i32_2 = arith.constant 0 : i32
    %c0_i32_3 = arith.constant 0 : i32
    return %c0_i32, %c0_i32_0, %c0_i32_1, %c0_i32_2 : i32, i32, i32, i32
  }
  func.func @transform_6(%arg0: i32) -> (i32, i32, i32) {
    %c0_i32 = arith.constant 0 : i32
    %c0_i32_0 = arith.constant 0 : i32
    %c0_i32_1 = arith.constant 0 : i32
    %c0_i32_2 = arith.constant 0 : i32
    return %c0_i32, %c0_i32_0, %c0_i32_1 : i32, i32, i32
  }
  func.func @transform_7(%arg0: i32) -> (i32, i32, i32) {
    %c0_i32 = arith.constant 0 : i32
    %c0_i32_0 = arith.constant 0 : i32
    %c0_i32_1 = arith.constant 0 : i32
    %c0_i32_2 = arith.constant 0 : i32
    return %c0_i32, %c0_i32_0, %c0_i32_1 : i32, i32, i32
  }
  func.func @transform_8(%arg0: i32) -> (i32, i32, i32) {
    %c0_i32 = arith.constant 0 : i32
    %c0_i32_0 = arith.constant 0 : i32
    %c0_i32_1 = arith.constant 0 : i32
    %c0_i32_2 = arith.constant 0 : i32
    return %c0_i32, %c0_i32_0, %c0_i32_1 : i32, i32, i32
  }
  func.func @transform_9(%arg0: i32) -> (i32, i32) {
    %c0_i32 = arith.constant 0 : i32
    %c0_i32_0 = arith.constant 0 : i32
    %c0_i32_1 = arith.constant 0 : i32
    return %c0_i32, %c0_i32_0 : i32, i32
  }
  func.func @transform_10(%arg0: i32) -> (i32, i32) {
    %c0_i32 = arith.constant 0 : i32
    %c0_i32_0 = arith.constant 0 : i32
    %c0_i32_1 = arith.constant 0 : i32
    return %c0_i32, %c0_i32_0 : i32, i32
  }
  func.func @transform_11(%arg0: i32) -> (i32, i32) {
    %c0_i32 = arith.constant 0 : i32
    %c0_i32_0 = arith.constant 0 : i32
    %c0_i32_1 = arith.constant 0 : i32
    return %c0_i32, %c0_i32_0 : i32, i32
  }
  func.func @transform_12(%arg0: i32) -> (i32, i32, i32) {
    %c0_i32 = arith.constant 0 : i32
    %c0_i32_0 = arith.constant 0 : i32
    %c0_i32_1 = arith.constant 0 : i32
    return %arg0, %c0_i32, %c0_i32_0 : i32, i32, i32
  }
}

</mosaic_0001>

<bundles_post_ra>
// kernel: tpu_custom_call.1
= control target key start
LH: loop header
LB: loop body
LE: loop exit
PB: predicated region body
PF: predicated region fallthrough
CT: control target
= control target key end

     0   :  { %s8365_s21 = smov 0   ;;  %s10004_s0 = inlined_call_operand.vmem [shape: f32[2,24,32], index: 0, kind: input, shape index: {}]   ;;  %s10005_s1 = inlined_call_operand.vmem [shape: f32[32,32], index: 1, kind: input, shape index: {}]   ;;  %s10006_s2 = inlined_call_operand.vmem [shape: f32[24,32], index: 2, kind: input, shape index: {}]   ;;  %s10007_s3 = inlined_call_operand.vmem [shape: f32[2,3,4,32,8], index: 3, kind: input, shape index: {}]   ;;  %s10008_s4 = inlined_call_operand.vmem [shape: f32[2,3,4,1,8], index: 4, kind: input, shape index: {}]   ;;  %s10009_s5 = inlined_call_operand.vmem [shape: f32[2,4,8,32], index: 5, kind: input, shape index: {}]   ;;  %s10010_s6 = inlined_call_operand.vmem [shape: f32[2,32,64], index: 6, kind: input, shape index: {}]   ;;  %s10011_s7 = inlined_call_operand.vmem [shape: f32[2,64,32], index: 7, kind: input, shape index: {}]   ;;  %s10012_s8 = inlined_call_operand.vmem [shape: f32[2,8,128], index: 8, kind: input, shape index: {}]   ;;  %s10013_s9 = inlined_call_operand.vmem [shape: f32[8,128], index: 9, kind: input, shape index: {}]   ;;  %s10014_s10 = inlined_call_operand.vmem [shape: f32[32,32], index: 10, kind: input, shape index: {}]   ;;  %s10015_s11 = inlined_call_operand.vmem [shape: f32[32,32], index: 11, kind: input, shape index: {}]   ;;  %s10016_s12 = inlined_call_operand.vmem [shape: f32[2,16,8], index: 12, kind: output, shape index: {}]  }
   0x1 LB: > { %s6519_s22 = sadd.s32 4294967295, %s8296_s21   ;;  %p6523_p0 = scmp.ge.s32.totalorder %s8296_s21, 1  ;;  %s8296_s21 = sphi %s8365_s21, %s22_s21  }
   0x2   : > { %p362_p1 = scmp.lt.s32.totalorder %s8296_s21, 3 }
   0x4   : > { %p363_p2 = pnand %p6523_p0, %p362_p1 }
   0x5   : > { %p404_p3 = scmp.lt.s32.totalorder (!%p363_p2), %s6519_s22, 1 }
   0x6   : > { %366 = sbr.rel (%p363_p2) target bundleno = 10882 (0x2a82), region = 68 }
   0xb   : > { %v420_v0 = vld [vmem:[%s10005_s1 + $0x18] sm:$0xff]  ;;  %v8298_v1 = vmov 0.0   ;;  %v419_v2 = vld [vmem:[%s10005_s1 + $0x10] sm:$0xff]  ;;  %vm8299_vm0 = vmmov 0   ;;  %s10018_s22 = smov (!%p404_p3, %s6519_s22), 1  ;;  %v418_v3 = vld [vmem:[%s10005_s1 + $0x8] sm:$0xff] }
   0xc   : > { %7255 = vmatprep.subr.mxu0 %v8298_v1  ;;  %7263 = vmatprep.mubr.msk.f32.mxu0 %vm8299_vm0, %v8298_v1  ;;  %s8119_s29 = smul.u32 24, %s10018_s22  ;;  %v417_v4 = vld [vmem:[%s10005_s1] sm:$0xff]  ;;  %vm424_vm1 = vcmask 261120   ;;  %v422_v12 = vld [vmem:[%s10006_s2 + $0x8] sm:$0xff]  ;;  %v423_v17 = vld [vmem:[%s10006_s2 + $0x10] sm:$0xff]  ;;  %vm856_vm2 = vcmask 64512  }
   0xd   : > { %7256 = vmatpush3.msra.mxu0 %v420_v0  ;;  %7272 = vmatprep.subr.mxu1 %v8298_v1  ;;  %v421_v8 = vld [vmem:[%s10006_s2] sm:$0xff]  ;;  %v6539_v38 = vld [vmem:[%s10007_s3 + $0x98] sm:$0xff]  ;;  %v6538_v40 = vld [vmem:[%s10007_s3 + $0x90] sm:$0xff]  ;;  %vm958_vm3 = vcmask 195584   ;;  %vm3214_vm5 = vcmask 523264   ;;  %s6901_s27 = sshll.u32 %s10018_s22, 4 }
   0xe   : > { %7257 = vmatprep.subr.mxu0 %v8298_v1  ;;  %7280 = vmatprep.mubr.msk.f32.mxu1 %vm8299_vm0, %v8298_v1  ;;  %s408_s16 = scalar_lea.vmem %s10004_s0, %s8119_s29  ;;  %v573_v39 = vld [vmem:[%s10007_s3 + $0x18] sm:$0xff]  ;;  %v572_v41 = vld [vmem:[%s10007_s3 + $0x10] sm:$0xff]  ;;  %v6537_v42 = vld [vmem:[%s10007_s3 + $0x88] sm:$0xff]  ;;  %s413_s14 = scalar_lea.vmem %s10016_s12, %s6901_s27 }
   0xf   : > { %7258 = vmatpush3.msra.mxu0 %v419_v2  ;;  %v414_v5 = vld [vmem:[%s408_s16] sm:$0xff]  ;;  %v415_v6 = vld [vmem:[%s408_s16 + $0x8] sm:$0xff]  ;;  %v416_v7 = vld [vmem:[%s408_s16 + $0x10] sm:$0xff]  ;;  %7273 = vmatpush3.msra.mxu1 %v573_v39 }
  0x10   : > { %7259 = vmatprep.subr.mxu0 %v8298_v1  ;;  %7274 = vmatprep.subr.mxu1 %v8298_v1  ;;  %v571_v43 = vld [vmem:[%s10007_s3 + $0x8] sm:$0xff]  ;;  %v6536_v44 = vld [vmem:[%s10007_s3 + $0x80] sm:$0xff]  ;;  %v6548_v63 = vld [vmem:[%s10007_s3 + $0x118] sm:$0xff] }
  0x11   : > { %7260 = vmatpush3.msra.mxu0 %v418_v3  ;;  %7275 = vmatpush3.msra.mxu1 %v572_v41  ;;  %v570_v45 = vld [vmem:[%s10007_s3] sm:$0xff] }
  0x12   : > { %7261 = vmatprep.subr.mxu0 %v8298_v1  ;;  %7276 = vmatprep.subr.mxu1 %v8298_v1  ;;  %v6530_v56 = vld [vmem:[%s10012_s8] ss:$0 sm:$0xff]  ;;  %v6531_v58 = vld [vmem:[%s10012_s8 + $0x1] ss:$0 sm:$0xff] }
  0x13   : > { %7262 = vmatpush3.msra.mxu0 %v417_v4  ;;  %7277 = vmatpush3.msra.mxu1 %v571_v43  ;;  %v6565_v43 = vld [vmem:[%s10007_s3 + $0x30] sm:$0xff] }
  0x14   : > { %7264 = vmatmul.mubr.msk.f32.vlgmr.msra.gmra.mxu0 %vm424_vm1, %v414_v5  ;;  %7289 = vmatprep.subr.mxu0 %v8298_v1  ;;  %v6547_v5 = vld [vmem:[%s10007_s3 + $0x110] sm:$0xff] }
  0x15   : > { %7266 = vmatprep.mubr.msk.f32.mxu0 %vm8299_vm0, %v8298_v1  ;;  %7290 = vmatpush3.msra.mxu0 %v6539_v38  ;;  %v6566_v38 = vld [vmem:[%s10007_s3 + $0x38] sm:$0xff] }
  0x16   : > { %7291 = vmatprep.subr.mxu0 %v8298_v1  ;;  %7278 = vmatprep.subr.mxu1 %v8298_v1 }
  0x17   : > { %7292 = vmatpush3.msra.mxu0 %v6538_v40  ;;  %7279 = vmatpush3.msra.mxu1 %v570_v45  ;;  %v6564_v45 = vld [vmem:[%s10007_s3 + $0x28] sm:$0xff] }
  0x18   : > { %7267 = vmatmul.mubr.msk.f32.gmra.mxu0 %vm424_vm1, %v415_v6  ;;  %7293 = vmatprep.subr.mxu0 %v8298_v1 }
  0x19   : > { %7269 = vmatprep.mubr.msk.f32.mxu0 %vm8299_vm0, %v8298_v1  ;;  %7294 = vmatpush3.msra.mxu0 %v6537_v42 }
  0x1a   : > { %7295 = vmatprep.subr.mxu0 %v8298_v1  ;;  %7306 = vmatprep.subr.mxu1 %v8298_v1 }
  0x1b   : > { %7296 = vmatpush3.msra.mxu0 %v6536_v44 }
  0x1c   : > { %7270 = vmatmul.mubr.msk.f32.gmra.mxu0 %vm424_vm1, %v416_v7  ;;  %7323 = vmatprep.subr.mxu0 %v8298_v1 }
  0x1d   : > { %7297 = vmatprep.mubr.msk.f32.mxu0 %vm8299_vm0, %v8298_v1 }
  0xd4   : > { %v500_v9 = vpop.f32.mrf.mxu0 }
  0xd5   : > { %v8413_v10 = vadd.f32 %v500_v9, %v421_v8  ;;  %v6546_v8 = vld [vmem:[%s10007_s3 + $0x108] sm:$0xff]  ;;  %v6545_v9 = vld [vmem:[%s10007_s3 + $0x100] sm:$0xff] }
  0xd6   : > { %v7265_v11 = vpop.f32.mrf.mxu0 }
  0xd7   : > { %v516_v13 = vsel %vm424_vm1, %v8413_v10, 0.0 }
  0xd8   : > { %517 = vadd.xlane.f32.xlu0 %v516_v13  ;;  %v505_v14 = vpop.f32.mrf.mxu0 }
  0xd9   : > { %v8420_v15 = vadd.f32 %v505_v14, %v422_v12 }
  0xda   : > { %v7268_v16 = vpop.f32.mrf.mxu0 }
  0xdb   : > { %v519_v18 = vsel %vm424_vm1, %v8420_v15, 0.0 }
  0xdc   : > { %520 = vadd.xlane.f32.xlu0 %v519_v18  ;;  %v510_v19 = vpop.f32.mrf.mxu0 }
  0xdd   : > { %v8427_v20 = vadd.f32 %v510_v19, %v423_v17 }
  0xde   : > { %v7271_v21 = vpop.f32.mrf.mxu0 }
  0xdf   : > { %v522_v22 = vsel %vm424_vm1, %v8427_v20, 0.0  ;;  %v6541_v21 = vld [vmem:[%s10008_s4 + $0x4] ss:$0 sm:$0xff] }
  0xe0   : > { %523 = vadd.xlane.f32.xlu1 %v522_v22 }
 0x161   : > { %v518_v23 = vpop.xlane.xlu0 %517 }
 0x162   : > { %v526_v24 = vmul.f32 0.03125, %v518_v23 }
 0x164   : > { %v529_v25 = vsub.f32 %v8413_v10, %v526_v24 }
 0x165   : > { %v521_v26 = vpop.xlane.xlu0 %520 }
 0x166   : > { %v527_v27 = vmul.f32 0.03125, %v521_v26  ;;  %v532_v28 = vmul.f32 %v529_v25, %v529_v25 }
 0x168   : > { %v530_v29 = vsub.f32 %v8420_v15, %v527_v27  ;;  %v535_v30 = vsel %vm424_vm1, %v532_v28, 0.0 }
 0x169   : > { %536 = vadd.xlane.f32.xlu1 %v535_v30  ;;  %v524_v31 = vpop.xlane.xlu1 %523 }
 0x16a   : > { %v528_v32 = vmul.f32 0.03125, %v524_v31  ;;  %v533_v33 = vmul.f32 %v530_v29, %v530_v29  ;;  %v6532_v31 = vld [vmem:[%s10008_s4] ss:$0 sm:$0xff] }
 0x16c   : > { %v531_v34 = vsub.f32 %v8427_v20, %v528_v32  ;;  %v538_v35 = vsel %vm424_vm1, %v533_v33, 0.0 }
 0x16d   : > { %539 = vadd.xlane.f32.xlu0 %v538_v35  ;;  %v6550_v35 = vld [vmem:[%s10008_s4 + $0x8] ss:$0 sm:$0xff] }
 0x16e   : > { %v534_v36 = vmul.f32 %v531_v34, %v531_v34 }
 0x170   : > { %v541_v37 = vsel %vm424_vm1, %v534_v36, 0.0 }
 0x171   : > { %542 = vadd.xlane.f32.xlu1 %v541_v37 }
 0x1f2   : > { %v537_v46 = vpop.xlane.xlu1 %536 }
 0x1f3   : > { %v544_v47 = vmul.f32 0.03125, %v537_v46  ;;  %v6563_v46 = vld [vmem:[%s10007_s3 + $0x20] sm:$0xff] }
 0x1f5   : > { %v547_v48 = vadd.f32 1e-05, %v544_v47  ;;  %v6584_v47 = vld [vmem:[%s10007_s3 + $0x138] sm:$0xff] }
 0x1f6   : > { %v540_v49 = vpop.xlane.xlu0 %539 }
 0x1f7   : > { %8130 = vrsqrt.f32 %v547_v48  ;;  %v545_v50 = vmul.f32 0.03125, %v540_v49  ;;  %v6583_v48 = vld [vmem:[%s10007_s3 + $0x130] sm:$0xff]  ;;  %v6582_v49 = vld [vmem:[%s10007_s3 + $0x128] sm:$0xff] }
 0x1f9   : > { %v548_v51 = vadd.f32 1e-05, %v545_v50  ;;  %v6581_v50 = vld [vmem:[%s10007_s3 + $0x120] sm:$0xff] }
 0x1fa   : > { %v543_v52 = vpop.xlane.xlu1 %542 }
 0x1fb   : > { %8132 = vrsqrt.f32 %v548_v51  ;;  %v546_v53 = vmul.f32 0.03125, %v543_v52 }
 0x1fd   : > { %v549_v54 = vadd.f32 1e-05, %v546_v53 }
 0x1ff   : > { %8134 = vrsqrt.f32 %v549_v54 }
 0x204   : > { %v8131_v55 = vpop.eup %8130 }
 0x205   : > { %v553_v57 = vmul.f32 %v8131_v55, %v529_v25 }
 0x207   : > { %v560_v59 = vmul.f32 %v6530_v56, %v553_v57 }
 0x208   : > { %v8133_v60 = vpop.eup %8132 }
 0x209   : > { %v8475_v61 = vadd.f32 %v6531_v58, %v560_v59  ;;  %v554_v62 = vmul.f32 %v8133_v60, %v530_v29 }
 0x20b   : > { %v561_v0 = vmul.f32 %v6530_v56, %v554_v62  ;;  %7281 = vmatmul.mubr.msk.f32.vlgmr.msra.gmra.mxu1 %vm424_vm1, %v8475_v61  ;;  %7298 = vmatmul.mubr.msk.f32.vlgmr.msra.gmra.mxu0 %vm424_vm1, %v8475_v61 }
 0x20c   : > { %v8135_v2 = vpop.eup %8134  ;;  %7283 = vmatprep.mubr.msk.f32.mxu1 %vm8299_vm0, %v8298_v1  ;;  %7300 = vmatprep.mubr.msk.f32.mxu0 %vm8299_vm0, %v8298_v1 }
 0x20d   : > { %v8488_v3 = vadd.f32 %v6531_v58, %v561_v0  ;;  %v555_v4 = vmul.f32 %v8135_v2, %v531_v34  ;;  %7307 = vmatpush3.msra.mxu1 %v6548_v63 }
 0x20e   : > { %7308 = vmatprep.subr.mxu1 %v8298_v1 }
 0x20f   : > { %v562_v6 = vmul.f32 %v6530_v56, %v555_v4  ;;  %7284 = vmatmul.mubr.msk.f32.gmra.mxu1 %vm424_vm1, %v8488_v3  ;;  %7301 = vmatmul.mubr.msk.f32.gmra.mxu0 %vm424_vm1, %v8488_v3 }
 0x210   : > { %7286 = vmatprep.mubr.msk.f32.mxu1 %vm8299_vm0, %v8298_v1  ;;  %7303 = vmatprep.mubr.msk.f32.mxu0 %vm8299_vm0, %v8298_v1 }
 0x211   : > { %v8502_v7 = vadd.f32 %v6531_v58, %v562_v6  ;;  %7309 = vmatpush3.msra.mxu1 %v6547_v5 }
 0x212   : > { %7310 = vmatprep.subr.mxu1 %v8298_v1 }
 0x213   : > { %7287 = vmatmul.mubr.msk.f32.gmra.mxu1 %vm424_vm1, %v8502_v7  ;;  %7304 = vmatmul.mubr.msk.f32.gmra.mxu0 %vm424_vm1, %v8502_v7 }
 0x214   : > { %7311 = vmatpush3.msra.mxu1 %v6546_v8  ;;  %7314 = vmatprep.mubr.msk.f32.mxu1 %vm8299_vm0, %v8298_v1 }
 0x215   : > { %7312 = vmatprep.subr.mxu1 %v8298_v1  ;;  %7329 = vmatprep.mubr.msk.f32.mxu0 %vm8299_vm0, %v8298_v1 }
 0x216   : > { %7313 = vmatpush3.msra.mxu1 %v6545_v9 }
 0x217   : > { %7315 = vmatmul.mubr.msk.f32.vlgmr.msra.gmra.mxu1 %vm424_vm1, %v8475_v61  ;;  %7338 = vmatprep.subr.mxu1 %v8298_v1 }
 0x218   : > { %7317 = vmatprep.mubr.msk.f32.mxu1 %vm8299_vm0, %v8298_v1 }
 0x21b   : > { %7318 = vmatmul.mubr.msk.f32.gmra.mxu1 %vm424_vm1, %v8488_v3 }
 0x21c   : > { %7320 = vmatprep.mubr.msk.f32.mxu1 %vm8299_vm0, %v8298_v1 }
 0x21f   : > { %7321 = vmatmul.mubr.msk.f32.gmra.mxu1 %vm424_vm1, %v8502_v7 }
 0x220   : > { %7344 = vmatprep.mubr.msk.f32.mxu1 %vm8299_vm0, %v8298_v1 }
 0x2cb   : > { %v656_v11 = vpop.f32.mrf.mxu1  ;;  %v749_v12 = vpop.f32.mrf.mxu0 }
 0x2cc   : > { %v750_v32 = vadd.f32 %v6541_v21, %v749_v12  ;;  %v657_v34 = vadd.f32 %v6532_v31, %v656_v11 }
 0x2cd   : > { %v7282_v13 = vpop.f32.mrf.mxu1  ;;  %v7299_v14 = vpop.f32.mrf.mxu0 }
 0x2ce   : > { %v6586_v14 = vld [vmem:[%s10008_s4 + $0x9] ss:$0 sm:$0xff] }
 0x2cf   : > { %v661_v16 = vpop.f32.mrf.mxu1  ;;  %v754_v17 = vpop.f32.mrf.mxu0 }
 0x2d0   : > { %v755_v28 = vadd.f32 %v6541_v21, %v754_v17  ;;  %v662_v41 = vadd.f32 %v6532_v31, %v661_v16 }
 0x2d1   : > { %v7285_v18 = vpop.f32.mrf.mxu1  ;;  %v7302_v19 = vpop.f32.mrf.mxu0 }
 0x2d3   : > { %v666_v22 = vpop.f32.mrf.mxu1  ;;  %v759_v23 = vpop.f32.mrf.mxu0 }
 0x2d4   : > { %v760_v24 = vadd.f32 %v6541_v21, %v759_v23  ;;  %v667_v44 = vadd.f32 %v6532_v31, %v666_v22 }
 0x2d5   : > { %v7288_v25 = vpop.f32.mrf.mxu1  ;;  %v7305_v26 = vpop.f32.mrf.mxu0 }
 0x2d6   : > { %7324 = vmatpush3.xpose.msk.msra.mxu0 %vm856_vm2, %v760_v24 }
 0x2d7   : > { %v842_v27 = vpop.f32.mrf.mxu1  ;;  %7325 = vmatprep.subr.mxu0 %v8298_v1 }
 0x2d8   : > { %v843_v42 = vadd.f32 %v6550_v35, %v842_v27 }
 0x2d9   : > { %v7316_v29 = vpop.f32.mrf.mxu1 }
 0x2da   : > { %7326 = vmatpush3.xpose.msk.msra.mxu0 %vm856_vm2, %v755_v28 }
 0x2db   : > { %v847_v30 = vpop.f32.mrf.mxu1  ;;  %7327 = vmatprep.subr.mxu0 %v8298_v1 }
 0x2dc   : > { %v848_v40 = vadd.f32 %v6550_v35, %v847_v30 }
 0x2dd   : > { %v7319_v33 = vpop.f32.mrf.mxu1 }
 0x2de   : > { %7328 = vmatpush3.xpose.msk.msra.mxu0 %vm856_vm2, %v750_v32 }
 0x2df   : > { %v852_v36 = vpop.f32.mrf.mxu1  ;;  %7353 = vmatprep.subr.mxu0 %v8298_v1 }
 0x2e0   : > { %v853_v37 = vadd.f32 %v6550_v35, %v852_v36 }
 0x2e1   : > { %v7322_v39 = vpop.f32.mrf.mxu1  ;;  %7330 = vmatmul.mubr.msk.f32.vlgmr.msra.gmra.mxu0 %vm856_vm2, %v657_v34 }
 0x2e2   : > { %7339 = vmatpush3.msra.mxu1 %v853_v37  ;;  %7332 = vmatprep.mubr.msk.f32.mxu0 %vm8299_vm0, %v8298_v1 }
 0x2e3   : > { %7340 = vmatprep.subr.mxu1 %v8298_v1  ;;  %7354 = vmatpush3.msra.mxu0 %v6566_v38 }
 0x2e4   : > { %7341 = vmatpush3.msra.mxu1 %v848_v40  ;;  %7355 = vmatprep.subr.mxu0 %v8298_v1 }
 0x2e5   : > { %7333 = vmatmul.mubr.msk.f32.gmra.mxu0 %vm856_vm2, %v662_v41  ;;  %7342 = vmatprep.subr.mxu1 %v8298_v1 }
 0x2e6   : > { %7343 = vmatpush3.msra.mxu1 %v843_v42  ;;  %7335 = vmatprep.mubr.msk.f32.mxu0 %vm8299_vm0, %v8298_v1  ;;  %v6575_v42 = vld [vmem:[%s10007_s3 + $0xb8] sm:$0xff] }
 0x2e7   : > { %7356 = vmatpush3.msra.mxu0 %v6565_v43  ;;  %7370 = vmatprep.subr.mxu1 %v8298_v1  ;;  %v6574_v43 = vld [vmem:[%s10007_s3 + $0xb0] sm:$0xff] }
 0x2e8   : > { %7357 = vmatprep.subr.mxu0 %v8298_v1 }
 0x2e9   : > { %7336 = vmatmul.mubr.msk.f32.gmra.mxu0 %vm856_vm2, %v667_v44 }
 0x2ea   : > { %7358 = vmatpush3.msra.mxu0 %v6564_v45  ;;  %7361 = vmatprep.mubr.msk.f32.mxu0 %vm8299_vm0, %v8298_v1 }
 0x2eb   : > { %7359 = vmatprep.subr.mxu0 %v8298_v1 }
 0x2ec   : > { %7360 = vmatpush3.msra.mxu0 %v6563_v46  ;;  %v6573_v46 = vld [vmem:[%s10007_s3 + $0xa8] sm:$0xff] }
 0x2ed   : > { %7362 = vmatmul.mubr.msk.f32.vlgmr.msra.gmra.mxu0 %vm424_vm1, %v8475_v61  ;;  %7387 = vmatprep.subr.mxu0 %v8298_v1 }
 0x2ee   : > { %7364 = vmatprep.mubr.msk.f32.mxu0 %vm8299_vm0, %v8298_v1  ;;  %7388 = vmatpush3.msra.mxu0 %v6584_v47  ;;  %v6572_v47 = vld [vmem:[%s10007_s3 + $0xa0] sm:$0xff] }
 0x2ef   : > { %7389 = vmatprep.subr.mxu0 %v8298_v1 }
 0x2f0   : > { %7390 = vmatpush3.msra.mxu0 %v6583_v48 }
 0x2f1   : > { %7365 = vmatmul.mubr.msk.f32.gmra.mxu0 %vm424_vm1, %v8488_v3  ;;  %7391 = vmatprep.subr.mxu0 %v8298_v1 }
 0x2f2   : > { %7367 = vmatprep.mubr.msk.f32.mxu0 %vm8299_vm0, %v8298_v1  ;;  %7392 = vmatpush3.msra.mxu0 %v6582_v49 }
 0x2f3   : > { %7393 = vmatprep.subr.mxu0 %v8298_v1 }
 0x2f4   : > { %7394 = vmatpush3.msra.mxu0 %v6581_v50 }
 0x2f5   : > { %7368 = vmatmul.mubr.msk.f32.gmra.mxu0 %vm424_vm1, %v8502_v7  ;;  %7419 = vmatprep.subr.mxu0 %v8298_v1 }
 0x2f6   : > { %7395 = vmatprep.mubr.msk.f32.mxu0 %vm8299_vm0, %v8298_v1 }
 0x2f9   : > { %7396 = vmatmul.mubr.msk.f32.vlgmr.msra.gmra.mxu0 %vm424_vm1, %v8475_v61 }
 0x2fa   : > { %7398 = vmatprep.mubr.msk.f32.mxu0 %vm8299_vm0, %v8298_v1 }
 0x2fd   : > { %7399 = vmatmul.mubr.msk.f32.gmra.mxu0 %vm424_vm1, %v8488_v3 }
 0x2fe   : > { %7401 = vmatprep.mubr.msk.f32.mxu0 %vm8299_vm0, %v8298_v1 }
 0x301   : > { %7402 = vmatmul.mubr.msk.f32.gmra.mxu0 %vm424_vm1, %v8502_v7 }
 0x302   : > { %7425 = vmatprep.mubr.msk.f32.mxu0 %vm8299_vm0, %v8298_v1 }
 0x3a1   : > { %v941_v51 = vpop.f32.mrf.mxu0 }
 0x3a2   : > { %v955_v52 = vmul.f32 0.35355338, %v941_v51 }
 0x3a3   : > { %v7331_v53 = vpop.f32.mrf.mxu0 }
 0x3a4   : > { %v959_v54 = vsel %vm958_vm3, %v955_v52, -inf }
 0x3a5   : > { %960 = vmax.xlane.f32.xlu0 %v959_v54  ;;  %v946_v55 = vpop.f32.mrf.mxu0 }
 0x3a6   : > { %v956_v56 = vmul.f32 0.35355338, %v946_v55 }
 0x3a7   : > { %v7334_v57 = vpop.f32.mrf.mxu0 }
 0x3a8   : > { %v962_v58 = vsel %vm958_vm3, %v956_v56, -inf }
 0x3a9   : > { %963 = vmax.xlane.f32.xlu1 %v962_v58  ;;  %v951_v59 = vpop.f32.mrf.mxu0 }
 0x3aa   : > { %v957_v60 = vmul.f32 0.35355338, %v951_v59 }
 0x3ab   : > { %v7337_v62 = vpop.f32.mrf.mxu0 }
 0x3ac   : > { %v965_v63 = vsel %vm958_vm3, %v957_v60, -inf }
 0x3ad   : > { %966 = vmax.xlane.f32.xlu0 %v965_v63  ;;  %v8619_v0 = vpop.f32.mrf.mxu0 }
 0x3af   : > { %v7363_v2 = vpop.f32.mrf.mxu0 }
 0x3b1   : > { %v8621_v4 = vpop.f32.mrf.mxu0 }
 0x3b3   : > { %v7366_v5 = vpop.f32.mrf.mxu0 }
 0x3b5   : > { %v8623_v6 = vpop.f32.mrf.mxu0 }
 0x3b7   : > { %v7369_v8 = vpop.f32.mrf.mxu0 }
 0x3b8   : > { %v6568_v8 = vld [vmem:[%s10008_s4 + $0x1] ss:$0 sm:$0xff] }
 0x3b9   : > { %v1347_v9 = vpop.f32.mrf.mxu0 }
 0x3ba   : > { %v1348_v21 = vadd.f32 %v6586_v14, %v1347_v9 }
 0x3bb   : > { %v7397_v11 = vpop.f32.mrf.mxu0 }
 0x3bc   : > { %v1162_v11 = vadd.f32 %v6568_v8, %v8619_v0 }
 0x3bd   : > { %v1352_v12 = vpop.f32.mrf.mxu0 }
 0x3be   : > { %v1353_v19 = vadd.f32 %v6586_v14, %v1352_v12  ;;  %v1167_v12 = vadd.f32 %v6568_v8, %v8621_v4 }
 0x3bf   : > { %v7400_v13 = vpop.f32.mrf.mxu0 }
 0x3c0   : > { %v1172_v13 = vadd.f32 %v6568_v8, %v8623_v6  ;;  %v6627_v8 = vld [vmem:[%s10007_s3 + $0x158] sm:$0xff] }
 0x3c1   : > { %v1357_v16 = vpop.f32.mrf.mxu0 }
 0x3c2   : > { %v1358_v17 = vadd.f32 %v6586_v14, %v1357_v16 }
 0x3c3   : > { %v7403_v18 = vpop.f32.mrf.mxu0 }
 0x3c4   : > { %7420 = vmatpush3.msra.mxu0 %v1358_v17 }
 0x3c5   : > { %7421 = vmatprep.subr.mxu0 %v8298_v1 }
 0x3c6   : > { %7422 = vmatpush3.msra.mxu0 %v1353_v19 }
 0x3c7   : > { %7423 = vmatprep.subr.mxu0 %v8298_v1 }
 0x3c8   : > { %7424 = vmatpush3.msra.mxu0 %v1348_v21 }
 0x3c9   : > { %7445 = vmatprep.subr.mxu0 %v8298_v1 }
 0x42e   : > { %v961_v22 = vpop.xlane.xlu0 %960 }
 0x42f   : > { %v968_v23 = vsub.f32 %v955_v52, %v961_v22 }
 0x431   : > { %v971_v24 = vmul.f32 1.442695, %v968_v23 }
 0x432   : > { %v964_v25 = vpop.xlane.xlu1 %963 }
 0x433   : > { %8136 = vpow2.f32 %v971_v24  ;;  %v969_v26 = vsub.f32 %v956_v56, %v964_v25 }
 0x435   : > { %v973_v27 = vmul.f32 1.442695, %v969_v26 }
 0x436   : > { %v967_v28 = vpop.xlane.xlu0 %966 }
 0x437   : > { %8138 = vpow2.f32 %v973_v27  ;;  %v970_v29 = vsub.f32 %v957_v60, %v967_v28  ;;  %v6577_v60 = vld [vmem:[%s10008_s4 + $0x5] ss:$0 sm:$0xff] }
 0x439   : > { %v975_v30 = vmul.f32 1.442695, %v970_v29 }
 0x43b   : > { %8140 = vpow2.f32 %v975_v30 }
 0x440   : > { %v8137_v31 = vpop.eup %8136 }
 0x441   : > { %v977_v32 = vsel %vm958_vm3, %v8137_v31, 0.0 }
 0x442   : > { %978 = vadd.xlane.f32.xlu1 %v977_v32 }
 0x444   : > { %v8139_v33 = vpop.eup %8138 }
 0x445   : > { %v980_v34 = vsel %vm958_vm3, %v8139_v33, 0.0 }
 0x446   : > { %981 = vadd.xlane.f32.xlu0 %v980_v34 }
 0x448   : > { %v8141_v35 = vpop.eup %8140 }
 0x449   : > { %v983_v36 = vsel %vm958_vm3, %v8141_v35, 0.0 }
 0x44a   : > { %984 = vadd.xlane.f32.xlu1 %v983_v36 }
 0x4cb   : > { %v979_v37 = vpop.xlane.xlu1 %978 }
 0x4cc   : > { %8142 = vrcp.f32 %v979_v37 }
 0x4cf   : > { %v982_v38 = vpop.xlane.xlu0 %981 }
 0x4d0   : > { %8144 = vrcp.f32 %v982_v38 }
 0x4d3   : > { %v985_v39 = vpop.xlane.xlu1 %984 }
 0x4d4   : > { %8146 = vrcp.f32 %v985_v39 }
 0x4d9   : > { %v8143_v40 = vpop.eup %8142 }
 0x4da   : > { %v989_v41 = vmul.f32 %v8143_v40, %v8137_v31  ;;  %v6599_v40 = vld [vmem:[%s10009_s5 + $0x8] sm:$0xff] }
 0x4dc   : > { %7345 = vmatmul.mubr.msk.f32.vlgmr.msra.gmra.mxu1 %vm958_vm3, %v989_v41 }
 0x4dd   : > { %v8145_v44 = vpop.eup %8144  ;;  %7371 = vmatpush3.msra.mxu1 %v6575_v42  ;;  %7347 = vmatprep.mubr.msk.f32.mxu1 %vm8299_vm0, %v8298_v1 }
 0x4de   : > { %7372 = vmatprep.subr.mxu1 %v8298_v1  ;;  %v990_v45 = vmul.f32 %v8145_v44, %v8139_v33 }
 0x4df   : > { %7373 = vmatpush3.msra.mxu1 %v6574_v43 }
 0x4e0   : > { %7348 = vmatmul.mubr.msk.f32.gmra.mxu1 %vm958_vm3, %v990_v45  ;;  %7374 = vmatprep.subr.mxu1 %v8298_v1 }
 0x4e1   : > { %v8147_v48 = vpop.eup %8146  ;;  %7350 = vmatprep.mubr.msk.f32.mxu1 %vm8299_vm0, %v8298_v1  ;;  %7375 = vmatpush3.msra.mxu1 %v6573_v46  ;;  %v1081_v46 = vld [vmem:[%s10009_s5] sm:$0xff] }
 0x4e2   : > { %v991_v49 = vmul.f32 %v8147_v48, %v8141_v35  ;;  %7376 = vmatprep.subr.mxu1 %v8298_v1 }
 0x4e3   : > { %7377 = vmatpush3.msra.mxu1 %v6572_v47 }
 0x4e4   : > { %7351 = vmatmul.mubr.msk.f32.gmra.mxu1 %vm958_vm3, %v991_v49  ;;  %7404 = vmatprep.subr.mxu1 %v8298_v1 }
 0x4e5   : > { %7378 = vmatprep.mubr.msk.f32.mxu1 %vm8299_vm0, %v8298_v1 }
 0x4e8   : > { %7379 = vmatmul.mubr.msk.f32.vlgmr.msra.gmra.mxu1 %vm424_vm1, %v8475_v61 }
 0x4e9   : > { %7381 = vmatprep.mubr.msk.f32.mxu1 %vm8299_vm0, %v8298_v1 }
 0x4ec   : > { %7382 = vmatmul.mubr.msk.f32.gmra.mxu1 %vm424_vm1, %v8488_v3 }
 0x4ed   : > { %7384 = vmatprep.mubr.msk.f32.mxu1 %vm8299_vm0, %v8298_v1 }
 0x4f0   : > { %7385 = vmatmul.mubr.msk.f32.gmra.mxu1 %vm424_vm1, %v8502_v7 }
 0x4f1   : > { %7410 = vmatprep.mubr.msk.f32.mxu1 %vm8299_vm0, %v8298_v1 }
 0x59c   : > { %v8671_v50 = vpop.f32.mrf.mxu1 }
 0x59e   : > { %v7346_v51 = vpop.f32.mrf.mxu1 }
 0x5a0   : > { %v8673_v52 = vpop.f32.mrf.mxu1 }
 0x5a2   : > { %v7349_v53 = vpop.f32.mrf.mxu1 }
 0x5a3   : > { %v6618_v53 = vld [vmem:[%s10007_s3 + $0xd8] sm:$0xff] }
 0x5a4   : > { %v8675_v54 = vpop.f32.mrf.mxu1 }
 0x5a6   : > { %v7352_v55 = vpop.f32.mrf.mxu1 }
 0x5a7   : > { %v6617_v55 = vld [vmem:[%s10007_s3 + $0xd0] sm:$0xff] }
 0x5a8   : > { %v1254_v56 = vpop.f32.mrf.mxu1 }
 0x5a9   : > { %v1255_v9 = vadd.f32 %v6577_v60, %v1254_v56  ;;  %v6616_v56 = vld [vmem:[%s10007_s3 + $0xc8] sm:$0xff] }
 0x5aa   : > { %v7380_v57 = vpop.f32.mrf.mxu1 }
 0x5ab   : > { %v6608_v57 = vld [vmem:[%s10007_s3 + $0x50] sm:$0xff] }
 0x5ac   : > { %v1259_v58 = vpop.f32.mrf.mxu1 }
 0x5ad   : > { %v1260_v5 = vadd.f32 %v6577_v60, %v1259_v58 }
 0x5ae   : > { %v7383_v59 = vpop.f32.mrf.mxu1 }
 0x5af   : > { %v6607_v59 = vld [vmem:[%s10007_s3 + $0x48] sm:$0xff] }
 0x5b0   : > { %v1264_v62 = vpop.f32.mrf.mxu1 }
 0x5b1   : > { %v1265_v63 = vadd.f32 %v6577_v60, %v1264_v62  ;;  %v6606_v62 = vld [vmem:[%s10007_s3 + $0x40] sm:$0xff] }
 0x5b2   : > { %v7386_v2 = vpop.f32.mrf.mxu1 }
 0x5b3   : > { %7405 = vmatpush3.xpose.msk.msra.mxu1 %vm856_vm2, %v1265_v63 }
 0x5b4   : > { %7406 = vmatprep.subr.mxu1 %v8298_v1 }
 0x5b7   : > { %7407 = vmatpush3.xpose.msk.msra.mxu1 %vm856_vm2, %v1260_v5 }
 0x5b8   : > { %7408 = vmatprep.subr.mxu1 %v8298_v1 }
 0x5bb   : > { %7409 = vmatpush3.xpose.msk.msra.mxu1 %vm856_vm2, %v1255_v9 }
 0x5bc   : > { %7434 = vmatprep.subr.mxu1 %v8298_v1 }
 0x5be   : > { %7411 = vmatmul.mubr.msk.f32.vlgmr.msra.gmra.mxu1 %vm856_vm2, %v1162_v11  ;;  %v6626_v11 = vld [vmem:[%s10007_s3 + $0x150] sm:$0xff] }
 0x5bf   : > { %7413 = vmatprep.mubr.msk.f32.mxu1 %vm8299_vm0, %v8298_v1  ;;  %7435 = vmatpush3.msra.mxu1 %v6599_v40 }
 0x5c0   : > { %7456 = vmatprep.subr.mxu1 %v8298_v1 }
 0x5c2   : > { %7414 = vmatmul.mubr.msk.f32.gmra.mxu1 %vm856_vm2, %v1167_v12 }
 0x5c3   : > { %7416 = vmatprep.mubr.msk.f32.mxu1 %vm8299_vm0, %v8298_v1 }
 0x5c6   : > { %7417 = vmatmul.mubr.msk.f32.gmra.mxu1 %vm856_vm2, %v1172_v13  ;;  %v6625_v13 = vld [vmem:[%s10007_s3 + $0x148] sm:$0xff] }
 0x5c7   : > { %7436 = vmatprep.mubr.msk.f32.mxu1 %vm8299_vm0, %v8298_v1 }
 0x67e   : > { %v1445_v0 = vpop.f32.mrf.mxu1 }
 0x67f   : > { %v1459_v14 = vmul.f32 0.35355338, %v1445_v0 }
 0x680   : > { %v7412_v16 = vpop.f32.mrf.mxu1 }
 0x681   : > { %v1462_v17 = vsel %vm958_vm3, %v1459_v14, -inf }
 0x682   : > { %1463 = vmax.xlane.f32.xlu0 %v1462_v17  ;;  %v1450_v18 = vpop.f32.mrf.mxu1 }
 0x683   : > { %v1460_v4 = vmul.f32 0.35355338, %v1450_v18 }
 0x684   : > { %v7415_v19 = vpop.f32.mrf.mxu1 }
 0x685   : > { %v1465_v21 = vsel %vm958_vm3, %v1460_v4, -inf }
 0x686   : > { %1466 = vmax.xlane.f32.xlu1 %v1465_v21  ;;  %v1455_v22 = vpop.f32.mrf.mxu1 }
 0x687   : > { %v1461_v23 = vmul.f32 0.35355338, %v1455_v22 }
 0x688   : > { %v7418_v6 = vpop.f32.mrf.mxu1 }
 0x689   : > { %v1468_v24 = vsel %vm958_vm3, %v1461_v23, -inf }
 0x68a   : > { %1469 = vmax.xlane.f32.xlu0 %v1468_v24 }
 0x70b   : > { %v1464_v25 = vpop.xlane.xlu0 %1463 }
 0x70c   : > { %v1471_v26 = vsub.f32 %v1459_v14, %v1464_v25  ;;  %v6624_v14 = vld [vmem:[%s10007_s3 + $0x140] sm:$0xff] }
 0x70e   : > { %v1474_v27 = vmul.f32 1.442695, %v1471_v26 }
 0x70f   : > { %v1467_v28 = vpop.xlane.xlu1 %1466 }
 0x710   : > { %8148 = vpow2.f32 %v1474_v27  ;;  %v1472_v29 = vsub.f32 %v1460_v4, %v1467_v28 }
 0x712   : > { %v1476_v30 = vmul.f32 1.442695, %v1472_v29 }
 0x713   : > { %v1470_v31 = vpop.xlane.xlu0 %1469 }
 0x714   : > { %8150 = vpow2.f32 %v1476_v30  ;;  %v1473_v32 = vsub.f32 %v1461_v23, %v1470_v31  ;;  %v6620_v23 = vld [vmem:[%s10008_s4 + $0x6] ss:$0 sm:$0xff] }
 0x716   : > { %v1478_v33 = vmul.f32 1.442695, %v1473_v32 }
 0x718   : > { %8152 = vpow2.f32 %v1478_v33 }
 0x71d   : > { %v8149_v34 = vpop.eup %8148 }
 0x71e   : > { %v1480_v35 = vsel %vm958_vm3, %v8149_v34, 0.0 }
 0x71f   : > { %1481 = vadd.xlane.f32.xlu1 %v1480_v35 }
 0x721   : > { %v8151_v36 = vpop.eup %8150 }
 0x722   : > { %v1483_v37 = vsel %vm958_vm3, %v8151_v36, 0.0 }
 0x723   : > { %1484 = vadd.xlane.f32.xlu0 %v1483_v37 }
 0x725   : > { %v8153_v38 = vpop.eup %8152 }
 0x726   : > { %v1486_v39 = vsel %vm958_vm3, %v8153_v38, 0.0 }
 0x727   : > { %1487 = vadd.xlane.f32.xlu1 %v1486_v39 }
 0x7a8   : > { %v1482_v41 = vpop.xlane.xlu1 %1481 }
 0x7a9   : > { %8154 = vrcp.f32 %v1482_v41 }
 0x7ac   : > { %v1485_v42 = vpop.xlane.xlu0 %1484 }
 0x7ad   : > { %8156 = vrcp.f32 %v1485_v42 }
 0x7b0   : > { %v1488_v43 = vpop.xlane.xlu1 %1487 }
 0x7b1   : > { %8158 = vrcp.f32 %v1488_v43 }
 0x7b6   : > { %v8155_v44 = vpop.eup %8154 }
 0x7b7   : > { %v1492_v45 = vmul.f32 %v8155_v44, %v8149_v34  ;;  %v6611_v34 = vld [vmem:[%s10008_s4 + $0x2] ss:$0 sm:$0xff] }
 0x7b9   : > { %7426 = vmatmul.mubr.msk.f32.vlgmr.msra.gmra.mxu0 %vm958_vm3, %v1492_v45 }
 0x7ba   : > { %v8157_v47 = vpop.eup %8156  ;;  %7428 = vmatprep.mubr.msk.f32.mxu0 %vm8299_vm0, %v8298_v1  ;;  %7446 = vmatpush3.msra.mxu0 %v1081_v46 }
 0x7bb   : > { %v1493_v48 = vmul.f32 %v8157_v47, %v8151_v36  ;;  %7473 = vmatprep.subr.mxu0 %v8298_v1 }
 0x7bd   : > { %7429 = vmatmul.mubr.msk.f32.gmra.mxu0 %vm958_vm3, %v1493_v48  ;;  %v6629_v48 = vld [vmem:[%s10008_s4 + $0xa] ss:$0 sm:$0xff] }
 0x7be   : > { %v8159_v49 = vpop.eup %8158  ;;  %7431 = vmatprep.mubr.msk.f32.mxu0 %vm8299_vm0, %v8298_v1 }
 0x7bf   : > { %v1494_v51 = vmul.f32 %v8159_v49, %v8153_v38 }
 0x7c1   : > { %7432 = vmatmul.mubr.msk.f32.gmra.mxu0 %vm958_vm3, %v1494_v51 }
 0x7c2   : > { %7447 = vmatprep.mubr.msk.f32.mxu0 %vm8299_vm0, %v8298_v1 }
 0x7c5   : > { %7448 = vmatmul.mubr.msk.f32.vlgmr.msra.gmra.mxu0 %vm856_vm2, %v8671_v50  ;;  %v6615_v50 = vld [vmem:[%s10007_s3 + $0xc0] sm:$0xff] }
 0x7c6   : > { %7450 = vmatprep.mubr.msk.f32.mxu0 %vm8299_vm0, %v8298_v1  ;;  %7474 = vmatpush3.msra.mxu0 %v6618_v53 }
 0x7c7   : > { %7475 = vmatprep.subr.mxu0 %v8298_v1 }
 0x7c8   : > { %7476 = vmatpush3.msra.mxu0 %v6617_v55 }
 0x7c9   : > { %7451 = vmatmul.mubr.msk.f32.gmra.mxu0 %vm856_vm2, %v8673_v52  ;;  %7477 = vmatprep.subr.mxu0 %v8298_v1  ;;  %v6609_v52 = vld [vmem:[%s10007_s3 + $0x58] sm:$0xff] }
 0x7ca   : > { %7453 = vmatprep.mubr.msk.f32.mxu0 %vm8299_vm0, %v8298_v1  ;;  %7478 = vmatpush3.msra.mxu0 %v6616_v56 }
 0x7cb   : > { %7479 = vmatprep.subr.mxu0 %v8298_v1 }
 0x7cc   : > { %7480 = vmatpush3.msra.mxu0 %v6615_v50 }
 0x7cd   : > { %7454 = vmatmul.mubr.msk.f32.gmra.mxu0 %vm856_vm2, %v8675_v54  ;;  %7507 = vmatprep.subr.mxu0 %v8298_v1 }
 0x7ce   : > { %7481 = vmatprep.mubr.msk.f32.mxu0 %vm8299_vm0, %v8298_v1 }
 0x7d1   : > { %7482 = vmatmul.mubr.msk.f32.vlgmr.msra.gmra.mxu0 %vm424_vm1, %v8475_v61 }
 0x7d2   : > { %7484 = vmatprep.mubr.msk.f32.mxu0 %vm8299_vm0, %v8298_v1 }
 0x7d5   : > { %7485 = vmatmul.mubr.msk.f32.gmra.mxu0 %vm424_vm1, %v8488_v3 }
 0x7d6   : > { %7487 = vmatprep.mubr.msk.f32.mxu0 %vm8299_vm0, %v8298_v1 }
 0x7d9   : > { %7488 = vmatmul.mubr.msk.f32.gmra.mxu0 %vm424_vm1, %v8502_v7 }
 0x7da   : > { %7513 = vmatprep.mubr.msk.f32.mxu0 %vm8299_vm0, %v8298_v1 }
 0x879   : > { %v1570_v54 = vpop.f32.mrf.mxu0 }
 0x87a   : > { %7437 = vmatmul.mubr.msk.f32.vlgmr.msra.gmra.mxu1 %vm856_vm2, %v1570_v54 }
 0x87b   : > { %v7427_v58 = vpop.f32.mrf.mxu0  ;;  %7457 = vmatpush3.msra.mxu1 %v6609_v52  ;;  %7439 = vmatprep.mubr.msk.f32.mxu1 %vm8299_vm0, %v8298_v1 }
 0x87c   : > { %7458 = vmatprep.subr.mxu1 %v8298_v1 }
 0x87d   : > { %v1575_v60 = vpop.f32.mrf.mxu0  ;;  %7459 = vmatpush3.msra.mxu1 %v6608_v57 }
 0x87e   : > { %7440 = vmatmul.mubr.msk.f32.gmra.mxu1 %vm856_vm2, %v1575_v60  ;;  %7460 = vmatprep.subr.mxu1 %v8298_v1 }
 0x87f   : > { %v7430_v63 = vpop.f32.mrf.mxu0  ;;  %7442 = vmatprep.mubr.msk.f32.mxu1 %vm8299_vm0, %v8298_v1  ;;  %7461 = vmatpush3.msra.mxu1 %v6607_v59 }
 0x880   : > { %7462 = vmatprep.subr.mxu1 %v8298_v1 }
 0x881   : > { %v1580_v2 = vpop.f32.mrf.mxu0  ;;  %7463 = vmatpush3.msra.mxu1 %v6606_v62 }
 0x882   : > { %7443 = vmatmul.mubr.msk.f32.gmra.mxu1 %vm856_vm2, %v1580_v2  ;;  %7490 = vmatprep.subr.mxu1 %v8298_v1 }
 0x883   : > { %v7433_v5 = vpop.f32.mrf.mxu0  ;;  %7464 = vmatprep.mubr.msk.f32.mxu1 %vm8299_vm0, %v8298_v1 }
 0x885   : > { %v8792_v9 = vpop.f32.mrf.mxu0 }
 0x886   : > { %7465 = vmatmul.mubr.msk.f32.vlgmr.msra.gmra.mxu1 %vm424_vm1, %v8475_v61 }
 0x887   : > { %v7449_v12 = vpop.f32.mrf.mxu0  ;;  %7467 = vmatprep.mubr.msk.f32.mxu1 %vm8299_vm0, %v8298_v1  ;;  %7491 = vmatpush3.msra.mxu1 %v6627_v8 }
 0x888   : > { %7492 = vmatprep.subr.mxu1 %v8298_v1 }
 0x889   : > { %v8805_v0 = vpop.f32.mrf.mxu0  ;;  %7493 = vmatpush3.msra.mxu1 %v6626_v11 }
 0x88a   : > { %7468 = vmatmul.mubr.msk.f32.gmra.mxu1 %vm424_vm1, %v8488_v3  ;;  %7494 = vmatprep.subr.mxu1 %v8298_v1 }
 0x88b   : > { %v7452_v16 = vpop.f32.mrf.mxu0  ;;  %7470 = vmatprep.mubr.msk.f32.mxu1 %vm8299_vm0, %v8298_v1  ;;  %7495 = vmatpush3.msra.mxu1 %v6625_v13 }
 0x88c   : > { %7496 = vmatprep.subr.mxu1 %v8298_v1 }
 0x88d   : > { %v8816_v17 = vpop.f32.mrf.mxu0  ;;  %7497 = vmatpush3.msra.mxu1 %v6624_v14 }
 0x88e   : > { %7471 = vmatmul.mubr.msk.f32.gmra.mxu1 %vm424_vm1, %v8502_v7  ;;  %7522 = vmatprep.subr.mxu1 %v8298_v1 }
 0x88f   : > { %v7455_v18 = vpop.f32.mrf.mxu0  ;;  %7498 = vmatprep.mubr.msk.f32.mxu1 %vm8299_vm0, %v8298_v1 }
 0x891   : > { %v1936_v4 = vpop.f32.mrf.mxu0 }
 0x892   : > { %7499 = vmatmul.mubr.msk.f32.vlgmr.msra.gmra.mxu1 %vm424_vm1, %v8475_v61  ;;  %v1937_v27 = vadd.f32 %v6620_v23, %v1936_v4 }
 0x893   : > { %v7483_v19 = vpop.f32.mrf.mxu0  ;;  %7501 = vmatprep.mubr.msk.f32.mxu1 %vm8299_vm0, %v8298_v1 }
 0x895   : > { %v1941_v21 = vpop.f32.mrf.mxu0 }
 0x896   : > { %7502 = vmatmul.mubr.msk.f32.gmra.mxu1 %vm424_vm1, %v8488_v3  ;;  %v1942_v26 = vadd.f32 %v6620_v23, %v1941_v21 }
 0x897   : > { %v7486_v22 = vpop.f32.mrf.mxu0  ;;  %7504 = vmatprep.mubr.msk.f32.mxu1 %vm8299_vm0, %v8298_v1 }
 0x899   : > { %v1946_v6 = vpop.f32.mrf.mxu0 }
 0x89a   : > { %v1947_v24 = vadd.f32 %v6620_v23, %v1946_v6  ;;  %7505 = vmatmul.mubr.msk.f32.gmra.mxu1 %vm424_vm1, %v8502_v7 }
 0x89b   : > { %v7489_v25 = vpop.f32.mrf.mxu0  ;;  %7528 = vmatprep.mubr.msk.f32.mxu1 %vm8299_vm0, %v8298_v1 }
 0x89c   : > { %7508 = vmatpush3.xpose.msk.msra.mxu0 %vm856_vm2, %v1947_v24 }
 0x89d   : > { %7509 = vmatprep.subr.mxu0 %v8298_v1 }
 0x8a0   : > { %7510 = vmatpush3.xpose.msk.msra.mxu0 %vm856_vm2, %v1942_v26 }
 0x8a1   : > { %7511 = vmatprep.subr.mxu0 %v8298_v1 }
 0x8a4   : > { %7512 = vmatpush3.xpose.msk.msra.mxu0 %vm856_vm2, %v1937_v27  ;;  %v6642_v27 = vld [vmem:[%s10009_s5 + $0x10] sm:$0xff] }
 0x8a5   : > { %7537 = vmatprep.subr.mxu0 %v8298_v1 }
 0x93a   : > { %v8844_v28 = vpop.f32.mrf.mxu1 }
 0x93c   : > { %v7438_v29 = vpop.f32.mrf.mxu1 }
 0x93e   : > { %v8846_v30 = vpop.f32.mrf.mxu1 }
 0x940   : > { %v7441_v31 = vpop.f32.mrf.mxu1 }
 0x942   : > { %v8848_v32 = vpop.f32.mrf.mxu1 }
 0x944   : > { %v7444_v33 = vpop.f32.mrf.mxu1 }
 0x946   : > { %v1843_v35 = vpop.f32.mrf.mxu1 }
 0x947   : > { %v1844_v36 = vadd.f32 %v6611_v34, %v1843_v35 }
 0x948   : > { %v7466_v37 = vpop.f32.mrf.mxu1 }
 0x949   : > { %7514 = vmatmul.mubr.msk.f32.vlgmr.msra.gmra.mxu0 %vm856_vm2, %v1844_v36  ;;  %v6649_v36 = vld [vmem:[%s10007_s3 + $0x78] sm:$0xff]  ;;  %v6648_v37 = vld [vmem:[%s10007_s3 + $0x70] sm:$0xff] }
 0x94a   : > { %v1848_v38 = vpop.f32.mrf.mxu1  ;;  %7516 = vmatprep.mubr.msk.f32.mxu0 %vm8299_vm0, %v8298_v1  ;;  %7538 = vmatpush3.msra.mxu0 %v6642_v27 }
 0x94b   : > { %v1849_v39 = vadd.f32 %v6611_v34, %v1848_v38  ;;  %7565 = vmatprep.subr.mxu0 %v8298_v1 }
 0x94c   : > { %v7469_v40 = vpop.f32.mrf.mxu1 }
 0x94d   : > { %7517 = vmatmul.mubr.msk.f32.gmra.mxu0 %vm856_vm2, %v1849_v39  ;;  %v6647_v40 = vld [vmem:[%s10007_s3 + $0x68] sm:$0xff] }
 0x94e   : > { %v1853_v41 = vpop.f32.mrf.mxu1  ;;  %7519 = vmatprep.mubr.msk.f32.mxu0 %vm8299_vm0, %v8298_v1 }
 0x94f   : > { %v1854_v42 = vadd.f32 %v6611_v34, %v1853_v41  ;;  %v6646_v41 = vld [vmem:[%s10007_s3 + $0x60] sm:$0xff] }
 0x950   : > { %v7472_v43 = vpop.f32.mrf.mxu1 }
 0x951   : > { %7520 = vmatmul.mubr.msk.f32.gmra.mxu0 %vm856_vm2, %v1854_v42 }
 0x952   : > { %v2029_v44 = vpop.f32.mrf.mxu1  ;;  %7539 = vmatprep.mubr.msk.f32.mxu0 %vm8299_vm0, %v8298_v1 }
 0x953   : > { %v2030_v56 = vadd.f32 %v6629_v48, %v2029_v44  ;;  %v6667_v44 = vld [vmem:[%s10007_s3 + $0x178] sm:$0xff] }
 0x954   : > { %v7500_v45 = vpop.f32.mrf.mxu1 }
 0x955   : > { %v6666_v45 = vld [vmem:[%s10007_s3 + $0x170] sm:$0xff] }
 0x956   : > { %v2034_v46 = vpop.f32.mrf.mxu1 }
 0x957   : > { %v2035_v55 = vadd.f32 %v6629_v48, %v2034_v46  ;;  %v6665_v46 = vld [vmem:[%s10007_s3 + $0x168] sm:$0xff] }
 0x958   : > { %v7503_v47 = vpop.f32.mrf.mxu1 }
 0x959   : > { %v6664_v47 = vld [vmem:[%s10007_s3 + $0x160] sm:$0xff] }
 0x95a   : > { %v2039_v49 = vpop.f32.mrf.mxu1 }
 0x95b   : > { %v2040_v51 = vadd.f32 %v6629_v48, %v2039_v49  ;;  %v6658_v48 = vld [vmem:[%s10007_s3 + $0xf8] sm:$0xff] }
 0x95c   : > { %v7506_v53 = vpop.f32.mrf.mxu1 }
 0x95d   : > { %7523 = vmatpush3.msra.mxu1 %v2040_v51  ;;  %v6657_v51 = vld [vmem:[%s10007_s3 + $0xf0] sm:$0xff] }
 0x95e   : > { %7524 = vmatprep.subr.mxu1 %v8298_v1 }
 0x95f   : > { %7525 = vmatpush3.msra.mxu1 %v2035_v55  ;;  %v6656_v55 = vld [vmem:[%s10007_s3 + $0xe8] sm:$0xff] }
 0x960   : > { %7526 = vmatprep.subr.mxu1 %v8298_v1 }
 0x961   : > { %7527 = vmatpush3.msra.mxu1 %v2030_v56 }
 0x962   : > { %7548 = vmatprep.subr.mxu1 %v8298_v1 }
 0xa09   : > { %v2127_v50 = vpop.f32.mrf.mxu0 }
 0xa0a   : > { %v2141_v52 = vmul.f32 0.35355338, %v2127_v50  ;;  %v6655_v50 = vld [vmem:[%s10007_s3 + $0xe0] sm:$0xff] }
 0xa0b   : > { %v7515_v54 = vpop.f32.mrf.mxu0 }
 0xa0c   : > { %v2144_v57 = vsel %vm958_vm3, %v2141_v52, -inf }
 0xa0d   : > { %2145 = vmax.xlane.f32.xlu0 %v2144_v57  ;;  %v2132_v58 = vpop.f32.mrf.mxu0 }
 0xa0e   : > { %v2142_v59 = vmul.f32 0.35355338, %v2132_v58 }
 0xa0f   : > { %v7518_v60 = vpop.f32.mrf.mxu0 }
 0xa10   : > { %v2147_v62 = vsel %vm958_vm3, %v2142_v59, -inf }
 0xa11   : > { %2148 = vmax.xlane.f32.xlu1 %v2147_v62  ;;  %v2137_v63 = vpop.f32.mrf.mxu0 }
 0xa12   : > { %v2143_v2 = vmul.f32 0.35355338, %v2137_v63 }
 0xa13   : > { %v7521_v5 = vpop.f32.mrf.mxu0 }
 0xa14   : > { %v2150_v8 = vsel %vm958_vm3, %v2143_v2, -inf }
 0xa15   : > { %2151 = vmax.xlane.f32.xlu0 %v2150_v8 }
 0xa96   : > { %v2146_v11 = vpop.xlane.xlu0 %2145 }
 0xa97   : > { %v2153_v12 = vsub.f32 %v2141_v52, %v2146_v11 }
 0xa99   : > { %v2156_v13 = vmul.f32 1.442695, %v2153_v12 }
 0xa9a   : > { %v2149_v14 = vpop.xlane.xlu1 %2148 }
 0xa9b   : > { %8160 = vpow2.f32 %v2156_v13  ;;  %v2154_v16 = vsub.f32 %v2142_v59, %v2149_v14 }
 0xa9d   : > { %v2158_v18 = vmul.f32 1.442695, %v2154_v16 }
 0xa9e   : > { %v2152_v4 = vpop.xlane.xlu0 %2151 }
 0xa9f   : > { %8162 = vpow2.f32 %v2158_v18  ;;  %v2155_v19 = vsub.f32 %v2143_v2, %v2152_v4  ;;  %v1751_v18 = vadd.f32 %v8792_v9, %v8844_v28 }
 0xaa1   : > { %v2160_v21 = vmul.f32 1.442695, %v2155_v19 }
 0xaa3   : > { %8164 = vpow2.f32 %v2160_v21 }
 0xaa8   : > { %v8161_v22 = vpop.eup %8160 }
 0xaa9   : > { %v2162_v23 = vsel %vm958_vm3, %v8161_v22, 0.0 }
 0xaaa   : > { %2163 = vadd.xlane.f32.xlu1 %v2162_v23 }
 0xaac   : > { %v8163_v6 = vpop.eup %8162 }
 0xaad   : > { %v2165_v24 = vsel %vm958_vm3, %v8163_v6, 0.0 }
 0xaae   : > { %2166 = vadd.xlane.f32.xlu0 %v2165_v24 }
 0xab0   : > { %v8165_v25 = vpop.eup %8164 }
 0xab1   : > { %v2168_v26 = vsel %vm958_vm3, %v8165_v25, 0.0 }
 0xab2   : > { %2169 = vadd.xlane.f32.xlu1 %v2168_v26 }
 0xb33   : > { %v2164_v29 = vpop.xlane.xlu1 %2163 }
 0xb34   : > { %8166 = vrcp.f32 %v2164_v29 }
 0xb37   : > { %v2167_v31 = vpop.xlane.xlu0 %2166 }
 0xb38   : > { %8168 = vrcp.f32 %v2167_v31 }
 0xb3b   : > { %v2170_v33 = vpop.xlane.xlu1 %2169 }
 0xb3c   : > { %8170 = vrcp.f32 %v2170_v33 }
 0xb41   : > { %v8167_v34 = vpop.eup %8166 }
 0xb42   : > { %v2174_v35 = vmul.f32 %v8167_v34, %v8161_v22  ;;  %v1756_v22 = vadd.f32 %v8805_v0, %v8846_v30  ;;  %v6660_v34 = vld [vmem:[%s10008_s4 + $0x7] ss:$0 sm:$0xff] }
 0xb44   : > { %7529 = vmatmul.mubr.msk.f32.vlgmr.msra.gmra.mxu1 %vm958_vm3, %v2174_v35 }
 0xb45   : > { %v8169_v38 = vpop.eup %8168  ;;  %7531 = vmatprep.mubr.msk.f32.mxu1 %vm8299_vm0, %v8298_v1  ;;  %7549 = vmatpush3.msra.mxu1 %v6649_v36 }
 0xb46   : > { %v2175_v39 = vmul.f32 %v8169_v38, %v8163_v6  ;;  %7550 = vmatprep.subr.mxu1 %v8298_v1 }
 0xb47   : > { %7551 = vmatpush3.msra.mxu1 %v6648_v37 }
 0xb48   : > { %7532 = vmatmul.mubr.msk.f32.gmra.mxu1 %vm958_vm3, %v2175_v39  ;;  %7552 = vmatprep.subr.mxu1 %v8298_v1 }
 0xb49   : > { %v8171_v42 = vpop.eup %8170  ;;  %7534 = vmatprep.mubr.msk.f32.mxu1 %vm8299_vm0, %v8298_v1  ;;  %7553 = vmatpush3.msra.mxu1 %v6647_v40 }
 0xb4a   : > { %v2176_v43 = vmul.f32 %v8171_v42, %v8165_v25  ;;  %7554 = vmatprep.subr.mxu1 %v8298_v1  ;;  %v1761_v25 = vadd.f32 %v8816_v17, %v8848_v32  ;;  %v6651_v32 = vld [vmem:[%s10008_s4 + $0x3] ss:$0 sm:$0xff] }
 0xb4b   : > { %7555 = vmatpush3.msra.mxu1 %v6646_v41 }
 0xb4c   : > { %7535 = vmatmul.mubr.msk.f32.gmra.mxu1 %vm958_vm3, %v2176_v43  ;;  %7582 = vmatprep.subr.mxu1 %v8298_v1 }
 0xb4d   : > { %7556 = vmatprep.mubr.msk.f32.mxu1 %vm8299_vm0, %v8298_v1 }
 0xb50   : > { %7557 = vmatmul.mubr.msk.f32.vlgmr.msra.gmra.mxu1 %vm424_vm1, %v8475_v61 }
 0xb51   : > { %7559 = vmatprep.mubr.msk.f32.mxu1 %vm8299_vm0, %v8298_v1  ;;  %7583 = vmatpush3.msra.mxu1 %v6667_v44 }
 0xb52   : > { %7584 = vmatprep.subr.mxu1 %v8298_v1 }
 0xb53   : > { %7585 = vmatpush3.msra.mxu1 %v6666_v45 }
 0xb54   : > { %7560 = vmatmul.mubr.msk.f32.gmra.mxu1 %vm424_vm1, %v8488_v3  ;;  %7586 = vmatprep.subr.mxu1 %v8298_v1 }
 0xb55   : > { %7562 = vmatprep.mubr.msk.f32.mxu1 %vm8299_vm0, %v8298_v1  ;;  %7587 = vmatpush3.msra.mxu1 %v6665_v46 }
 0xb56   : > { %7588 = vmatprep.subr.mxu1 %v8298_v1 }
 0xb57   : > { %7589 = vmatpush3.msra.mxu1 %v6664_v47 }
 0xb58   : > { %7563 = vmatmul.mubr.msk.f32.gmra.mxu1 %vm424_vm1, %v8502_v7  ;;  %7614 = vmatprep.subr.mxu1 %v8298_v1 }
 0xb59   : > { %7590 = vmatprep.mubr.msk.f32.mxu1 %vm8299_vm0, %v8298_v1 }
 0xb5c   : > { %7591 = vmatmul.mubr.msk.f32.vlgmr.msra.gmra.mxu1 %vm424_vm1, %v8475_v61 }
 0xb5d   : > { %7593 = vmatprep.mubr.msk.f32.mxu1 %vm8299_vm0, %v8298_v1 }
 0xb60   : > { %7594 = vmatmul.mubr.msk.f32.gmra.mxu1 %vm424_vm1, %v8488_v3 }
 0xb61   : > { %7596 = vmatprep.mubr.msk.f32.mxu1 %vm8299_vm0, %v8298_v1 }
 0xb64   : > { %7597 = vmatmul.mubr.msk.f32.gmra.mxu1 %vm424_vm1, %v8502_v7 }
 0xb65   : > { %7620 = vmatprep.mubr.msk.f32.mxu1 %vm8299_vm0, %v8298_v1 }
 0xc04   : > { %v2252_v49 = vpop.f32.mrf.mxu1 }
 0xc05   : > { %7540 = vmatmul.mubr.msk.f32.vlgmr.msra.gmra.mxu0 %vm856_vm2, %v2252_v49 }
 0xc06   : > { %v7530_v53 = vpop.f32.mrf.mxu1  ;;  %7566 = vmatpush3.msra.mxu0 %v6658_v48  ;;  %7542 = vmatprep.mubr.msk.f32.mxu0 %vm8299_vm0, %v8298_v1 }
 0xc07   : > { %7567 = vmatprep.subr.mxu0 %v8298_v1 }
 0xc08   : > { %v2257_v56 = vpop.f32.mrf.mxu1  ;;  %7568 = vmatpush3.msra.mxu0 %v6657_v51 }
 0xc09   : > { %7543 = vmatmul.mubr.msk.f32.gmra.mxu0 %vm856_vm2, %v2257_v56  ;;  %7569 = vmatprep.subr.mxu0 %v8298_v1 }
 0xc0a   : > { %v7533_v52 = vpop.f32.mrf.mxu1  ;;  %7545 = vmatprep.mubr.msk.f32.mxu0 %vm8299_vm0, %v8298_v1  ;;  %7570 = vmatpush3.msra.mxu0 %v6656_v55 }
 0xc0b   : > { %7571 = vmatprep.subr.mxu0 %v8298_v1 }
 0xc0c   : > { %v2262_v54 = vpop.f32.mrf.mxu1  ;;  %7572 = vmatpush3.msra.mxu0 %v6655_v50 }
 0xc0d   : > { %7546 = vmatmul.mubr.msk.f32.gmra.mxu0 %vm856_vm2, %v2262_v54  ;;  %7599 = vmatprep.subr.mxu0 %v8298_v1 }
 0xc0e   : > { %v7536_v57 = vpop.f32.mrf.mxu1  ;;  %7573 = vmatprep.mubr.msk.f32.mxu0 %vm8299_vm0, %v8298_v1 }
 0xc10   : > { %v2439_v58 = vpop.f32.mrf.mxu1 }
 0xc11   : > { %7574 = vmatmul.mubr.msk.f32.vlgmr.msra.gmra.mxu0 %vm424_vm1, %v8475_v61  ;;  %v2440_v37 = vadd.f32 %v6651_v32, %v2439_v58 }
 0xc12   : > { %v7558_v59 = vpop.f32.mrf.mxu1  ;;  %7576 = vmatprep.mubr.msk.f32.mxu0 %vm8299_vm0, %v8298_v1 }
 0xc14   : > { %v2444_v60 = vpop.f32.mrf.mxu1 }
 0xc15   : > { %7577 = vmatmul.mubr.msk.f32.gmra.mxu0 %vm424_vm1, %v8488_v3  ;;  %v6669_v3 = vld [vmem:[%s10008_s4 + $0xb] ss:$0 sm:$0xff]  ;;  %v2445_v38 = vadd.f32 %v6651_v32, %v2444_v60 }
 0xc16   : > { %v7561_v62 = vpop.f32.mrf.mxu1  ;;  %7579 = vmatprep.mubr.msk.f32.mxu0 %vm8299_vm0, %v8298_v1 }
 0xc18   : > { %v2449_v63 = vpop.f32.mrf.mxu1 }
 0xc19   : > { %7580 = vmatmul.mubr.msk.f32.gmra.mxu0 %vm424_vm1, %v8502_v7  ;;  %v2450_v39 = vadd.f32 %v6651_v32, %v2449_v63 }
 0xc1a   : > { %v7564_v2 = vpop.f32.mrf.mxu1  ;;  %7605 = vmatprep.mubr.msk.f32.mxu0 %vm8299_vm0, %v8298_v1 }
 0xc1c   : > { %v2625_v61 = vpop.f32.mrf.mxu1 }
 0xc1d   : > { %v2626_v7 = vadd.f32 %v6669_v3, %v2625_v61 }
 0xc1e   : > { %v7592_v5 = vpop.f32.mrf.mxu1 }
 0xc20   : > { %v2630_v8 = vpop.f32.mrf.mxu1 }
 0xc21   : > { %v2631_v16 = vadd.f32 %v6669_v3, %v2630_v8 }
 0xc22   : > { %v7595_v11 = vpop.f32.mrf.mxu1 }
 0xc23   : > { %v6682_v11 = vld [vmem:[%s10009_s5 + $0x18] sm:$0xff] }
 0xc24   : > { %v2635_v12 = vpop.f32.mrf.mxu1 }
 0xc25   : > { %v2636_v13 = vadd.f32 %v6669_v3, %v2635_v12 }
 0xc26   : > { %v7598_v14 = vpop.f32.mrf.mxu1 }
 0xc27   : > { %7615 = vmatpush3.msra.mxu1 %v2636_v13 }
 0xc28   : > { %7616 = vmatprep.subr.mxu1 %v8298_v1 }
 0xc29   : > { %7617 = vmatpush3.msra.mxu1 %v2631_v16 }
 0xc2a   : > { %7618 = vmatprep.subr.mxu1 %v8298_v1 }
 0xc2b   : > { %7619 = vmatpush3.msra.mxu1 %v2626_v7 }
 0xc2c   : > { %7640 = vmatprep.subr.mxu1 %v8298_v1 }
 0xcc5   : > { %v2343_v4 = vpop.f32.mrf.mxu0 }
 0xcc6   : > { %v8988_v19 = vadd.f32 %v2343_v4, %v1751_v18 }
 0xcc7   : > { %v7541_v21 = vpop.f32.mrf.mxu0 }
 0xcc9   : > { %v2348_v23 = vpop.f32.mrf.mxu0 }
 0xcca   : > { %v8992_v6 = vadd.f32 %v2348_v23, %v1756_v22 }
 0xccb   : > { %v7544_v24 = vpop.f32.mrf.mxu0 }
 0xccd   : > { %v2353_v26 = vpop.f32.mrf.mxu0 }
 0xcce   : > { %v8996_v27 = vadd.f32 %v2353_v26, %v1761_v25 }
 0xccf   : > { %v7547_v29 = vpop.f32.mrf.mxu0 }
 0xcd1   : > { %v2532_v31 = vpop.f32.mrf.mxu0 }
 0xcd2   : > { %v2533_v36 = vadd.f32 %v6660_v34, %v2532_v31 }
 0xcd3   : > { %v7575_v9 = vpop.f32.mrf.mxu0 }
 0xcd5   : > { %v2537_v28 = vpop.f32.mrf.mxu0 }
 0xcd6   : > { %v2538_v17 = vadd.f32 %v6660_v34, %v2537_v28  ;;  %v6686_v28 = vld [vmem:[%s10012_s8 + $0x2] ss:$0 sm:$0xff] }
 0xcd7   : > { %v7578_v33 = vpop.f32.mrf.mxu0 }
 0xcd9   : > { %v2542_v0 = vpop.f32.mrf.mxu0 }
 0xcda   : > { %v2543_v30 = vadd.f32 %v6660_v34, %v2542_v0 }
 0xcdb   : > { %v7581_v35 = vpop.f32.mrf.mxu0 }
 0xcdc   : > { %7600 = vmatpush3.xpose.msk.msra.mxu0 %vm856_vm2, %v2543_v30 }
 0xcdd   : > { %7601 = vmatprep.subr.mxu0 %v8298_v1 }
 0xce0   : > { %7602 = vmatpush3.xpose.msk.msra.mxu0 %vm856_vm2, %v2538_v17 }
 0xce1   : > { %7603 = vmatprep.subr.mxu0 %v8298_v1 }
 0xce4   : > { %7604 = vmatpush3.xpose.msk.msra.mxu0 %vm856_vm2, %v2533_v36 }
 0xce5   : > { %7629 = vmatprep.subr.mxu0 %v8298_v1 }
 0xce7   : > { %7606 = vmatmul.mubr.msk.f32.vlgmr.msra.gmra.mxu0 %vm856_vm2, %v2440_v37 }
 0xce8   : > { %7608 = vmatprep.mubr.msk.f32.mxu0 %vm8299_vm0, %v8298_v1  ;;  %7630 = vmatpush3.msra.mxu0 %v6682_v11 }
 0xce9   : > { %7657 = vmatprep.subr.mxu0 %v8298_v1 }
 0xceb   : > { %7609 = vmatmul.mubr.msk.f32.gmra.mxu0 %vm856_vm2, %v2445_v38 }
 0xcec   : > { %7611 = vmatprep.mubr.msk.f32.mxu0 %vm8299_vm0, %v8298_v1 }
 0xcef   : > { %7612 = vmatmul.mubr.msk.f32.gmra.mxu0 %vm856_vm2, %v2450_v39 }
 0xcf0   : > { %7631 = vmatprep.mubr.msk.f32.mxu0 %vm8299_vm0, %v8298_v1 }
 0xda7   : > { %v2723_v40 = vpop.f32.mrf.mxu0 }
 0xda8   : > { %v2737_v41 = vmul.f32 0.35355338, %v2723_v40 }
 0xda9   : > { %v7607_v42 = vpop.f32.mrf.mxu0 }
 0xdaa   : > { %v2740_v43 = vsel %vm958_vm3, %v2737_v41, -inf }
 0xdab   : > { %2741 = vmax.xlane.f32.xlu0 %v2740_v43  ;;  %v2728_v44 = vpop.f32.mrf.mxu0 }
 0xdac   : > { %v2738_v45 = vmul.f32 0.35355338, %v2728_v44 }
 0xdad   : > { %v7610_v46 = vpop.f32.mrf.mxu0 }
 0xdae   : > { %v2743_v47 = vsel %vm958_vm3, %v2738_v45, -inf }
 0xdaf   : > { %2744 = vmax.xlane.f32.xlu1 %v2743_v47  ;;  %v2733_v48 = vpop.f32.mrf.mxu0 }
 0xdb0   : > { %v2739_v49 = vmul.f32 0.35355338, %v2733_v48 }
 0xdb1   : > { %v7613_v51 = vpop.f32.mrf.mxu0 }
 0xdb2   : > { %v2746_v53 = vsel %vm958_vm3, %v2739_v49, -inf }
 0xdb3   : > { %2747 = vmax.xlane.f32.xlu0 %v2746_v53 }
 0xe34   : > { %v2742_v55 = vpop.xlane.xlu0 %2741 }
 0xe35   : > { %v2749_v56 = vsub.f32 %v2737_v41, %v2742_v55 }
 0xe37   : > { %v2752_v50 = vmul.f32 1.442695, %v2749_v56 }
 0xe38   : > { %v2745_v52 = vpop.xlane.xlu1 %2744 }
 0xe39   : > { %8172 = vpow2.f32 %v2752_v50  ;;  %v2750_v54 = vsub.f32 %v2738_v45, %v2745_v52  ;;  %v3025_v50 = vld [vmem:[%s10010_s6 + $0x18] sm:$0xff]  ;;  %v3024_v52 = vld [vmem:[%s10010_s6 + $0x10] sm:$0xff] }
 0xe3b   : > { %v2754_v57 = vmul.f32 1.442695, %v2750_v54  ;;  %v3023_v54 = vld [vmem:[%s10010_s6 + $0x8] sm:$0xff] }
 0xe3c   : > { %v2748_v58 = vpop.xlane.xlu0 %2747 }
 0xe3d   : > { %8174 = vpow2.f32 %v2754_v57  ;;  %v2751_v59 = vsub.f32 %v2739_v49, %v2748_v58  ;;  %v3022_v57 = vld [vmem:[%s10010_s6] sm:$0xff] }
 0xe3f   : > { %v2756_v60 = vmul.f32 1.442695, %v2751_v59 }
 0xe41   : > { %8176 = vpow2.f32 %v2756_v60 }
 0xe46   : > { %v8173_v62 = vpop.eup %8172 }
 0xe47   : > { %v2758_v63 = vsel %vm958_vm3, %v8173_v62, 0.0 }
 0xe48   : > { %2759 = vadd.xlane.f32.xlu1 %v2758_v63 }
 0xe4a   : > { %v8175_v2 = vpop.eup %8174 }
 0xe4b   : > { %v2761_v61 = vsel %vm958_vm3, %v8175_v2, 0.0 }
 0xe4c   : > { %2762 = vadd.xlane.f32.xlu0 %v2761_v61 }
 0xe4e   : > { %v8177_v5 = vpop.eup %8176 }
 0xe4f   : > { %v2764_v8 = vsel %vm958_vm3, %v8177_v5, 0.0 }
 0xe50   : > { %2765 = vadd.xlane.f32.xlu1 %v2764_v8 }
 0xed1   : > { %v2760_v3 = vpop.xlane.xlu1 %2759 }
 0xed2   : > { %8178 = vrcp.f32 %v2760_v3  ;;  %v6687_v3 = vld [vmem:[%s10012_s8 + $0x3] ss:$0 sm:$0xff] }
 0xed5   : > { %v2763_v12 = vpop.xlane.xlu0 %2762 }
 0xed6   : > { %8180 = vrcp.f32 %v2763_v12 }
 0xed9   : > { %v2766_v13 = vpop.xlane.xlu1 %2765 }
 0xeda   : > { %8182 = vrcp.f32 %v2766_v13  ;;  %v6688_v13 = vld [vmem:[%s10012_s8 + $0x4] ss:$0 sm:$0xff] }
 0xedf   : > { %v8179_v14 = vpop.eup %8178 }
 0xee0   : > { %v2770_v16 = vmul.f32 %v8179_v14, %v8173_v62 }
 0xee2   : > { %7621 = vmatmul.mubr.msk.f32.vlgmr.msra.gmra.mxu1 %vm958_vm3, %v2770_v16 }
 0xee3   : > { %v8181_v7 = vpop.eup %8180  ;;  %7623 = vmatprep.mubr.msk.f32.mxu1 %vm8299_vm0, %v8298_v1  ;;  %7641 = vmatpush3.msra.mxu1 %v3025_v50 }
 0xee4   : > { %v2771_v18 = vmul.f32 %v8181_v7, %v8175_v2  ;;  %7642 = vmatprep.subr.mxu1 %v8298_v1 }
 0xee5   : > { %7643 = vmatpush3.msra.mxu1 %v3024_v52 }
 0xee6   : > { %7624 = vmatmul.mubr.msk.f32.gmra.mxu1 %vm958_vm3, %v2771_v18  ;;  %7644 = vmatprep.subr.mxu1 %v8298_v1 }
 0xee7   : > { %v8183_v4 = vpop.eup %8182  ;;  %7626 = vmatprep.mubr.msk.f32.mxu1 %vm8299_vm0, %v8298_v1  ;;  %7645 = vmatpush3.msra.mxu1 %v3023_v54 }
 0xee8   : > { %v2772_v21 = vmul.f32 %v8183_v4, %v8177_v5  ;;  %7646 = vmatprep.subr.mxu1 %v8298_v1 }
 0xee9   : > { %7647 = vmatpush3.msra.mxu1 %v3022_v57 }
 0xeea   : > { %7627 = vmatmul.mubr.msk.f32.gmra.mxu1 %vm958_vm3, %v2772_v21  ;;  %7682 = vmatprep.subr.mxu1 %v8298_v1 }
 0xeeb   : > { %7648 = vmatprep.mubr.msk.f32.mxu1 %vm8299_vm0, %v8298_v1 }
 0xfa2   : > { %v2848_v22 = vpop.f32.mrf.mxu1 }
 0xfa3   : > { %7632 = vmatmul.mubr.msk.f32.vlgmr.msra.gmra.mxu0 %vm856_vm2, %v2848_v22 }
 0xfa4   : > { %v7622_v23 = vpop.f32.mrf.mxu1  ;;  %7634 = vmatprep.mubr.msk.f32.mxu0 %vm8299_vm0, %v8298_v1 }
 0xfa6   : > { %v2853_v24 = vpop.f32.mrf.mxu1 }
 0xfa7   : > { %7635 = vmatmul.mubr.msk.f32.gmra.mxu0 %vm856_vm2, %v2853_v24 }
 0xfa8   : > { %v7625_v25 = vpop.f32.mrf.mxu1  ;;  %7637 = vmatprep.mubr.msk.f32.mxu0 %vm8299_vm0, %v8298_v1 }
 0xfaa   : > { %v2858_v26 = vpop.f32.mrf.mxu1 }
 0xfab   : > { %7638 = vmatmul.mubr.msk.f32.gmra.mxu0 %vm856_vm2, %v2858_v26  ;;  %v3208_v26 = vld [vmem:[%s10011_s7 + $0x38] sm:$0xff] }
 0xfac   : > { %v7628_v29 = vpop.f32.mrf.mxu1  ;;  %7673 = vmatprep.mubr.msk.f32.mxu0 %vm8299_vm0, %v8298_v1  ;;  %7658 = vmatpush3.msra.mxu0 %v3208_v26 }
 0xfad   : > { %7659 = vmatprep.subr.mxu0 %v8298_v1  ;;  %v3207_v29 = vld [vmem:[%s10011_s7 + $0x30] sm:$0xff] }
 0xfae   : > { %7660 = vmatpush3.msra.mxu0 %v3207_v29 }
 0xfaf   : > { %7661 = vmatprep.subr.mxu0 %v8298_v1 }
0x1063   : > { %v2939_v31 = vpop.f32.mrf.mxu0 }
0x1064   : > { %v2953_v9 = vadd.f32 %v2939_v31, %v8988_v19  ;;  %v3206_v31 = vld [vmem:[%s10011_s7 + $0x28] sm:$0xff] }
0x1065   : > { %v7633_v33 = vpop.f32.mrf.mxu0  ;;  %7662 = vmatpush3.msra.mxu0 %v3206_v31 }
0x1066   : > { %v2956_v34 = vadd.f32 %v2953_v9, %v8413_v10  ;;  %7663 = vmatprep.subr.mxu0 %v8298_v1  ;;  %v3205_v9 = vld [vmem:[%s10011_s7 + $0x20] sm:$0xff]  ;;  %v3203_v33 = vld [vmem:[%s10011_s7 + $0x10] sm:$0xff] }
0x1067   : > { %v2944_v0 = vpop.f32.mrf.mxu0  ;;  %7664 = vmatpush3.msra.mxu0 %v3205_v9 }
0x1068   : > { %v9052_v30 = vadd.f32 %v6686_v28, %v2956_v34  ;;  %v2954_v35 = vadd.f32 %v2944_v0, %v8992_v6  ;;  %7665 = vmatprep.subr.mxu0 %v8298_v1  ;;  %v3202_v34 = vld [vmem:[%s10011_s7 + $0x8] sm:$0xff]  ;;  %v3201_v0 = vld [vmem:[%s10011_s7] sm:$0xff] }
0x1069   : > { %v7636_v17 = vpop.f32.mrf.mxu0 }
0x106a   : > { %v2957_v32 = vadd.f32 %v2954_v35, %v8420_v15  ;;  %v2969_v36 = vsel %vm424_vm1, %v9052_v30, 0.0  ;;  %v6689_v35 = vld [vmem:[%s10012_s8 + $0x5] ss:$0 sm:$0xff] }
0x106b   : > { %2970 = vadd.xlane.f32.xlu0 %v2969_v36  ;;  %v2949_v19 = vpop.f32.mrf.mxu0 }
0x106c   : > { %v9058_v37 = vadd.f32 %v6686_v28, %v2957_v32  ;;  %v2955_v38 = vadd.f32 %v2949_v19, %v8996_v27 }
0x106d   : > { %v7639_v39 = vpop.f32.mrf.mxu0 }
0x106e   : > { %v2958_v10 = vadd.f32 %v2955_v38, %v8427_v20  ;;  %v2972_v40 = vsel %vm424_vm1, %v9058_v37, 0.0 }
0x106f   : > { %2973 = vadd.xlane.f32.xlu1 %v2972_v40 }
0x1070   : > { %v9064_v6 = vadd.f32 %v6686_v28, %v2958_v10  ;;  %v3204_v28 = vld [vmem:[%s10011_s7 + $0x18] sm:$0xff] }
0x1071   : > { %7666 = vmatpush3.msra.mxu0 %v3204_v28 }
0x1072   : > { %v2975_v15 = vsel %vm424_vm1, %v9064_v6, 0.0  ;;  %7667 = vmatprep.subr.mxu0 %v8298_v1 }
0x1073   : > { %2976 = vadd.xlane.f32.xlu0 %v2975_v15  ;;  %7668 = vmatpush3.msra.mxu0 %v3203_v33 }
0x1074   : > { %7669 = vmatprep.subr.mxu0 %v8298_v1 }
0x1075   : > { %7670 = vmatpush3.msra.mxu0 %v3202_v34 }
0x1076   : > { %7671 = vmatprep.subr.mxu0 %v8298_v1 }
0x1077   : > { %7672 = vmatpush3.msra.mxu0 %v3201_v0 }
0x1078   : > { %7716 = vmatprep.subr.mxu0 %v8298_v1 }
0x10f4   : > { %v2971_v41 = vpop.xlane.xlu0 %2970 }
0x10f5   : > { %v2978_v42 = vmul.f32 0.03125, %v2971_v41 }
0x10f7   : > { %v2981_v43 = vsub.f32 %v9052_v30, %v2978_v42 }
0x10f8   : > { %v2974_v44 = vpop.xlane.xlu1 %2973 }
0x10f9   : > { %v2979_v45 = vmul.f32 0.03125, %v2974_v44  ;;  %v2984_v27 = vmul.f32 %v2981_v43, %v2981_v43 }
0x10fb   : > { %v2982_v46 = vsub.f32 %v9058_v37, %v2979_v45  ;;  %v2987_v20 = vsel %vm424_vm1, %v2984_v27, 0.0 }
0x10fc   : > { %2988 = vadd.xlane.f32.xlu1 %v2987_v20  ;;  %v2977_v47 = vpop.xlane.xlu0 %2976 }
0x10fd   : > { %v2980_v48 = vmul.f32 0.03125, %v2977_v47  ;;  %v2985_v49 = vmul.f32 %v2982_v46, %v2982_v46 }
0x10ff   : > { %v2983_v51 = vsub.f32 %v9064_v6, %v2980_v48  ;;  %v2990_v53 = vsel %vm424_vm1, %v2985_v49, 0.0 }
0x1100   : > { %2991 = vadd.xlane.f32.xlu0 %v2990_v53 }
0x1101   : > { %v2986_v55 = vmul.f32 %v2983_v51, %v2983_v51 }
0x1103   : > { %v2993_v56 = vsel %vm424_vm1, %v2986_v55, 0.0 }
0x1104   : > { %2994 = vadd.xlane.f32.xlu1 %v2993_v56 }
0x1185   : > { %v2989_v58 = vpop.xlane.xlu1 %2988 }
0x1186   : > { %v2996_v59 = vmul.f32 0.03125, %v2989_v58 }
0x1188   : > { %v2999_v60 = vadd.f32 1e-05, %v2996_v59 }
0x1189   : > { %v2992_v62 = vpop.xlane.xlu0 %2991 }
0x118a   : > { %8184 = vrsqrt.f32 %v2999_v60  ;;  %v2997_v63 = vmul.f32 0.03125, %v2992_v62 }
0x118c   : > { %v3000_v2 = vadd.f32 1e-05, %v2997_v63 }
0x118d   : > { %v2995_v61 = vpop.xlane.xlu1 %2994 }
0x118e   : > { %8186 = vrsqrt.f32 %v3000_v2  ;;  %v2998_v5 = vmul.f32 0.03125, %v2995_v61 }
0x1190   : > { %v3001_v8 = vadd.f32 1e-05, %v2998_v5 }
0x1192   : > { %8188 = vrsqrt.f32 %v3001_v8 }
0x1197   : > { %v8185_v11 = vpop.eup %8184 }
0x1198   : > { %v3005_v12 = vmul.f32 %v8185_v11, %v2981_v43 }
0x119a   : > { %v3012_v14 = vmul.f32 %v6687_v3, %v3005_v12 }
0x119b   : > { %v8187_v16 = vpop.eup %8186 }
0x119c   : > { %v3019_v7 = vadd.f32 %v6688_v13, %v3012_v14  ;;  %v3006_v18 = vmul.f32 %v8187_v16, %v2982_v46 }
0x119e   : > { %7649 = vmatmul.mubr.msk.f32.vlgmr.msra.gmra.mxu1 %vm424_vm1, %v3019_v7  ;;  %v3013_v4 = vmul.f32 %v6687_v3, %v3006_v18 }
0x119f   : > { %v8189_v21 = vpop.eup %8188  ;;  %7651 = vmatprep.mubr.msk.f32.mxu1 %vm8299_vm0, %v8298_v1 }
0x11a0   : > { %v3020_v22 = vadd.f32 %v6688_v13, %v3013_v4  ;;  %v3007_v23 = vmul.f32 %v8189_v21, %v2983_v51 }
0x11a2   : > { %7652 = vmatmul.mubr.msk.f32.gmra.mxu1 %vm424_vm1, %v3020_v22  ;;  %v3014_v24 = vmul.f32 %v6687_v3, %v3007_v23 }
0x11a3   : > { %7654 = vmatprep.mubr.msk.f32.mxu1 %vm8299_vm0, %v8298_v1 }
0x11a4   : > { %v3021_v25 = vadd.f32 %v6688_v13, %v3014_v24 }
0x11a6   : > { %7655 = vmatmul.mubr.msk.f32.gmra.mxu1 %vm424_vm1, %v3021_v25 }
0x11a7   : > { %7690 = vmatprep.mubr.msk.f32.mxu1 %vm8299_vm0, %v8298_v1 }
0x125e   : > { %v3106_v17 = vpop.f32.mrf.mxu1 }
0x125f   : > { %v9140_v32 = vadd.f32 %v6689_v35, %v3106_v17 }
0x1260   : > { %v7650_v36 = vpop.f32.mrf.mxu1 }
0x1261   : > { %v9143_v19 = vmul.f32 0.70710677, %v9140_v32 }
0x1262   : > { %v3111_v38 = vpop.f32.mrf.mxu1 }
0x1263   : > { %v3126_v39 = vand.u32 2147483647, %v9143_v19  ;;  %v9146_v10 = vadd.f32 %v6689_v35, %v3111_v38  ;;  %vm3186_vm4 = vcmp.lt.f32.partialorder %v9143_v19, 0.0 }
0x1264   : > { %v7653_v40 = vpop.f32.mrf.mxu1 }
0x1265   : > { %v3129_v15 = vmul.f32 0.3275911, %v3126_v39  ;;  %v9149_v41 = vmul.f32 0.70710677, %v9146_v10  ;;  %v3168_v51 = vsub.f32 0.0, %v3126_v39 }
0x1266   : > { %v3116_v42 = vpop.f32.mrf.mxu1 }
0x1267   : > { %v3132_v43 = vadd.f32 1.0, %v3129_v15  ;;  %v3127_v44 = vand.u32 2147483647, %v9149_v41  ;;  %v9152_v45 = vadd.f32 %v6689_v35, %v3116_v42  ;;  %v3171_v55 = vmul.f32 %v3168_v51, %v3126_v39 }
0x1268   : > { %v7656_v27 = vpop.f32.mrf.mxu1  ;;  %vm3187_vm6 = vcmp.lt.f32.partialorder %v9149_v41, 0.0 }
0x1269   : > { %8190 = vrcp.f32 %v3132_v43  ;;  %v3130_v46 = vmul.f32 0.3275911, %v3127_v44  ;;  %v9155_v20 = vmul.f32 0.70710677, %v9152_v45  ;;  %v3169_v56 = vsub.f32 0.0, %v3127_v44 }
0x126a   : > { %v3174_v54 = vmul.f32 1.442695, %v3171_v55  ;;  %v3120_v43 = vmul.f32 0.5, %v9140_v32  ;;  %v3122_v41 = vmul.f32 0.5, %v9152_v45 }
0x126b   : > { %v3133_v47 = vadd.f32 1.0, %v3130_v46  ;;  %v3128_v48 = vand.u32 2147483647, %v9155_v20  ;;  %v3172_v57 = vmul.f32 %v3169_v56, %v3127_v44  ;;  %vm3188_vm7 = vcmp.lt.f32.partialorder %v9155_v20, 0.0 }
0x126d   : > { %8192 = vrcp.f32 %v3133_v47  ;;  %v3131_v49 = vmul.f32 0.3275911, %v3128_v48  ;;  %v3170_v58 = vsub.f32 0.0, %v3128_v48  ;;  %v3176_v2 = vmul.f32 1.442695, %v3172_v57 }
0x126f   : > { %v3134_v53 = vadd.f32 1.0, %v3131_v49  ;;  %v3173_v61 = vmul.f32 %v3170_v58, %v3128_v48 }
0x1271   : > { %8194 = vrcp.f32 %v3134_v53  ;;  %v3178_v14 = vmul.f32 1.442695, %v3173_v61  ;;  %v3121_v53 = vmul.f32 0.5, %v9146_v10 }
0x1272   : > { %8196 = vpow2.f32 %v3174_v54  ;;  %v6693_v54 = vld [vmem:[%s10012_s8 + $0x6] ss:$0 sm:$0xff] }
0x1273   : > { %8198 = vpow2.f32 %v3176_v2 }
0x1274   : > { %8200 = vpow2.f32 %v3178_v14 }
0x1276   : > { %v8191_v50 = vpop.eup %8190 }
0x1277   : > { %v3141_v52 = vmul.f32 1.0614054, %v8191_v50 }
0x1279   : > { %v3144_v59 = vadd.f32 -1.4531521, %v3141_v52 }
0x127a   : > { %v8193_v60 = vpop.eup %8192 }
0x127b   : > { %v3147_v62 = vmul.f32 %v8191_v50, %v3144_v59  ;;  %v3142_v63 = vmul.f32 1.0614054, %v8193_v60 }
0x127d   : > { %v3150_v5 = vadd.f32 1.4214138, %v3147_v62  ;;  %v3145_v8 = vadd.f32 -1.4531521, %v3142_v63 }
0x127e   : > { %v8195_v11 = vpop.eup %8194 }
0x127f   : > { %v3153_v3 = vmul.f32 %v8191_v50, %v3150_v5  ;;  %v3148_v12 = vmul.f32 %v8193_v60, %v3145_v8  ;;  %v3143_v13 = vmul.f32 1.0614054, %v8195_v11  ;;  %v8197_v31 = vpop.eup %8196 }
0x1280   : > { %v8199_v17 = vpop.eup %8198 }
0x1281   : > { %v3156_v16 = vadd.f32 -0.28449672, %v3153_v3  ;;  %v3151_v7 = vadd.f32 1.4214138, %v3148_v12  ;;  %v3146_v18 = vadd.f32 -1.4531521, %v3143_v13  ;;  %v8201_v46 = vpop.eup %8200 }
0x1283   : > { %v3159_v4 = vmul.f32 %v8191_v50, %v3156_v16  ;;  %v3154_v21 = vmul.f32 %v8193_v60, %v3151_v7  ;;  %v3149_v22 = vmul.f32 %v8195_v11, %v3146_v18 }
0x1285   : > { %v3162_v23 = vadd.f32 0.2548296, %v3159_v4  ;;  %v3157_v24 = vadd.f32 -0.28449672, %v3154_v21  ;;  %v3152_v25 = vadd.f32 1.4214138, %v3149_v22 }
0x1287   : > { %v3165_v26 = vmul.f32 %v8191_v50, %v3162_v23  ;;  %v3160_v29 = vmul.f32 %v8193_v60, %v3157_v24  ;;  %v3155_v9 = vmul.f32 %v8195_v11, %v3152_v25 }
0x1289   : > { %v3180_v28 = vmul.f32 %v8197_v31, %v3165_v26  ;;  %v3163_v33 = vadd.f32 0.2548296, %v3160_v29  ;;  %v3158_v34 = vadd.f32 -0.28449672, %v3155_v9  ;;  %v6704_v29 = vld [vmem:[%s10007_s3 + $0x198] sm:$0xff]  ;;  %v6703_v9 = vld [vmem:[%s10007_s3 + $0x190] sm:$0xff] }
0x128a   : > { %v6722_v31 = vld [vmem:[%s10007_s3 + $0x298] sm:$0xff]  ;;  %7683 = vmatpush3.msra.mxu1 %v6704_v29  ;;  %v6706_v29 = vld [vmem:[%s10008_s4 + $0xc] ss:$0 sm:$0xff] }
0x128b   : > { %v3183_v0 = vsub.f32 1.0, %v3180_v28  ;;  %v3166_v35 = vmul.f32 %v8193_v60, %v3163_v33  ;;  %v3161_v36 = vmul.f32 %v8195_v11, %v3158_v34  ;;  %7684 = vmatprep.subr.mxu1 %v8298_v1  ;;  %v6721_v28 = vld [vmem:[%s10007_s3 + $0x290] sm:$0xff]  ;;  %v6702_v33 = vld [vmem:[%s10007_s3 + $0x188] sm:$0xff] }
0x128c   : > { %7685 = vmatpush3.msra.mxu1 %v6703_v9  ;;  %v6720_v34 = vld [vmem:[%s10007_s3 + $0x288] sm:$0xff] }
0x128d   : > { %v3189_v38 = vsub.f32 0.0, %v3183_v0  ;;  %v3181_v39 = vmul.f32 %v8199_v17, %v3166_v35  ;;  %v3164_v40 = vadd.f32 0.2548296, %v3161_v36  ;;  %7686 = vmatprep.subr.mxu1 %v8298_v1  ;;  %v6719_v35 = vld [vmem:[%s10007_s3 + $0x280] sm:$0xff] }
0x128e   : > { %7687 = vmatpush3.msra.mxu1 %v6702_v33  ;;  %v6740_v33 = vld [vmem:[%s10007_s3 + $0x1b0] sm:$0xff] }
0x128f   : > { %v3192_v15 = vsel %vm3186_vm4, %v3189_v38, %v3183_v0  ;;  %v3184_v42 = vsub.f32 1.0, %v3181_v39  ;;  %v3167_v27 = vmul.f32 %v8195_v11, %v3164_v40  ;;  %7688 = vmatprep.subr.mxu1 %v8298_v1  ;;  %v6701_v0 = vld [vmem:[%s10007_s3 + $0x180] sm:$0xff] }
0x1290   : > { %v3195_v44 = vadd.f32 1.0, %v3192_v15  ;;  %7689 = vmatpush3.msra.mxu1 %v6701_v0  ;;  %v6739_v0 = vld [vmem:[%s10007_s3 + $0x1a8] sm:$0xff] }
0x1291   : > { %v3190_v47 = vsub.f32 0.0, %v3184_v42  ;;  %v3182_v49 = vmul.f32 %v8201_v46, %v3167_v27  ;;  %7699 = vmatprep.subr.mxu1 %v8298_v1  ;;  %v6699_v46 = vld [vmem:[%s10012_s8 + $0x8] ss:$0 sm:$0xff] }
0x1292   : > { %v3198_v48 = vmul.f32 %v3195_v44, %v3120_v43 }
0x1293   : > { %v3193_v51 = vsel %vm3187_vm6, %v3190_v47, %v3184_v42  ;;  %v3185_v56 = vsub.f32 1.0, %v3182_v49 }
0x1294   : > { %v3196_v55 = vadd.f32 1.0, %v3193_v51  ;;  %7674 = vmatmul.mubr.msk.f32.vlgmr.msra.gmra.mxu0 %vm3214_vm5, %v3198_v48  ;;  %v6700_v48 = vld [vmem:[%s10012_s8 + $0x9] ss:$0 sm:$0xff] }
0x1295   : > { %7676 = vmatprep.mubr.msk.f32.mxu0 %vm8299_vm0, %v8298_v1  ;;  %v3191_v19 = vsub.f32 0.0, %v3185_v56  ;;  %7717 = vmatpush3.msra.mxu0 %v6722_v31 }
0x1296   : > { %v3199_v32 = vmul.f32 %v3196_v55, %v3121_v53  ;;  %7718 = vmatprep.subr.mxu0 %v8298_v1 }
0x1297   : > { %v3194_v50 = vsel %vm3188_vm7, %v3191_v19, %v3185_v56  ;;  %7719 = vmatpush3.msra.mxu0 %v6721_v28  ;;  %v6713_v56 = vld [vmem:[%s10007_s3 + $0x218] sm:$0xff]  ;;  %v6712_v19 = vld [vmem:[%s10007_s3 + $0x210] sm:$0xff] }
0x1298   : > { %7677 = vmatmul.mubr.msk.f32.gmra.mxu0 %vm3214_vm5, %v3199_v32  ;;  %v3197_v52 = vadd.f32 1.0, %v3194_v50  ;;  %7720 = vmatprep.subr.mxu0 %v8298_v1  ;;  %v6741_v28 = vld [vmem:[%s10007_s3 + $0x1b8] sm:$0xff] }
0x1299   : > { %7679 = vmatprep.mubr.msk.f32.mxu0 %vm8299_vm0, %v8298_v1  ;;  %7721 = vmatpush3.msra.mxu0 %v6720_v34 }
0x129a   : > { %v3200_v10 = vmul.f32 %v3197_v52, %v3122_v41  ;;  %7722 = vmatprep.subr.mxu0 %v8298_v1 }
0x129b   : > { %7723 = vmatpush3.msra.mxu0 %v6719_v35  ;;  %v6738_v35 = vld [vmem:[%s10007_s3 + $0x1a0] sm:$0xff] }
0x129c   : > { %7680 = vmatmul.mubr.msk.f32.gmra.mxu0 %vm3214_vm5, %v3200_v10  ;;  %7748 = vmatprep.subr.mxu0 %v8298_v1  ;;  %v6711_v10 = vld [vmem:[%s10007_s3 + $0x208] sm:$0xff] }
0x129d   : > { %7724 = vmatprep.mubr.msk.f32.mxu0 %vm8299_vm0, %v8298_v1 }
0x1354   : > { %v3290_v20 = vpop.f32.mrf.mxu0 }
0x1355   : > { %v3291_v57 = vadd.f32 %v6693_v54, %v3290_v20  ;;  %v6710_v20 = vld [vmem:[%s10007_s3 + $0x200] sm:$0xff] }
0x1356   : > { %v7675_v58 = vpop.f32.mrf.mxu0 }
0x1357   : > { %v9177_v59 = vadd.f32 %v3291_v57, %v9052_v30 }
0x1358   : > { %v3295_v45 = vpop.f32.mrf.mxu0 }
0x1359   : > { %v3296_v60 = vadd.f32 %v6693_v54, %v3295_v45  ;;  %v3310_v62 = vsel %vm424_vm1, %v9177_v59, 0.0 }
0x135a   : > { %3311 = vadd.xlane.f32.xlu0 %v3310_v62  ;;  %v7678_v63 = vpop.f32.mrf.mxu0 }
0x135b   : > { %v9182_v2 = vadd.f32 %v3296_v60, %v9058_v37 }
0x135c   : > { %v3300_v61 = vpop.f32.mrf.mxu0 }
0x135d   : > { %v3313_v5 = vsel %vm424_vm1, %v9182_v2, 0.0  ;;  %v3301_v8 = vadd.f32 %v6693_v54, %v3300_v61 }
0x135e   : > { %3314 = vadd.xlane.f32.xlu1 %v3313_v5  ;;  %v7681_v11 = vpop.f32.mrf.mxu0 }
0x135f   : > { %v9187_v30 = vadd.f32 %v3301_v8, %v9064_v6  ;;  %v6724_v11 = vld [vmem:[%s10008_s4 + $0x14] ss:$0 sm:$0xff] }
0x1361   : > { %v3316_v3 = vsel %vm424_vm1, %v9187_v30, 0.0 }
0x1362   : > { %3317 = vadd.xlane.f32.xlu0 %v3316_v3 }
0x13e3   : > { %v3312_v12 = vpop.xlane.xlu0 %3311 }
0x13e4   : > { %v3319_v13 = vmul.f32 0.03125, %v3312_v12 }
0x13e6   : > { %v3322_v14 = vsub.f32 %v9177_v59, %v3319_v13 }
0x13e7   : > { %v3315_v37 = vpop.xlane.xlu1 %3314 }
0x13e8   : > { %v3320_v16 = vmul.f32 0.03125, %v3315_v37  ;;  %v3325_v7 = vmul.f32 %v3322_v14, %v3322_v14 }
0x13ea   : > { %v3323_v18 = vsub.f32 %v9182_v2, %v3320_v16  ;;  %v3328_v4 = vsel %vm424_vm1, %v3325_v7, 0.0 }
0x13eb   : > { %3329 = vadd.xlane.f32.xlu1 %v3328_v4  ;;  %v3318_v21 = vpop.xlane.xlu0 %3317 }
0x13ec   : > { %v3326_v22 = vmul.f32 %v3323_v18, %v3323_v18  ;;  %v3321_v6 = vmul.f32 0.03125, %v3318_v21 }
0x13ee   : > { %v3331_v23 = vsel %vm424_vm1, %v3326_v22, 0.0  ;;  %v3324_v24 = vsub.f32 %v9187_v30, %v3321_v6  ;;  %v6715_v6 = vld [vmem:[%s10008_s4 + $0x10] ss:$0 sm:$0xff] }
0x13ef   : > { %3332 = vadd.xlane.f32.xlu0 %v3331_v23 }
0x13f0   : > { %v3327_v25 = vmul.f32 %v3324_v24, %v3324_v24 }
0x13f2   : > { %v3334_v26 = vsel %vm424_vm1, %v3327_v25, 0.0 }
0x13f3   : > { %3335 = vadd.xlane.f32.xlu1 %v3334_v26 }
0x1474   : > { %v3330_v17 = vpop.xlane.xlu1 %3329 }
0x1475   : > { %v3337_v36 = vmul.f32 0.03125, %v3330_v17 }
0x1477   : > { %v3340_v38 = vadd.f32 1e-05, %v3337_v36  ;;  %v6759_v36 = vld [vmem:[%s10007_s3 + $0x2b8] sm:$0xff] }
0x1478   : > { %v3333_v39 = vpop.xlane.xlu0 %3332 }
0x1479   : > { %8202 = vrsqrt.f32 %v3340_v38  ;;  %v3338_v40 = vmul.f32 0.03125, %v3333_v39  ;;  %v6758_v38 = vld [vmem:[%s10007_s3 + $0x2b0] sm:$0xff]  ;;  %v6757_v39 = vld [vmem:[%s10007_s3 + $0x2a8] sm:$0xff] }
0x147b   : > { %v3341_v15 = vadd.f32 1e-05, %v3338_v40  ;;  %v6756_v40 = vld [vmem:[%s10007_s3 + $0x2a0] sm:$0xff] }
0x147c   : > { %v3336_v42 = vpop.xlane.xlu1 %3335 }
0x147d   : > { %8204 = vrsqrt.f32 %v3341_v15  ;;  %v3339_v43 = vmul.f32 0.03125, %v3336_v42 }
0x147f   : > { %v3342_v44 = vadd.f32 1e-05, %v3339_v43 }
0x1481   : > { %8206 = vrsqrt.f32 %v3342_v44 }
0x1486   : > { %v8203_v27 = vpop.eup %8202 }
0x1487   : > { %v3346_v47 = vmul.f32 %v8203_v27, %v3322_v14 }
0x1489   : > { %v3353_v49 = vmul.f32 %v6699_v46, %v3346_v47 }
0x148a   : > { %v8205_v51 = vpop.eup %8204 }
0x148b   : > { %v9235_v53 = vadd.f32 %v6700_v48, %v3353_v49  ;;  %v3347_v55 = vmul.f32 %v8205_v51, %v3323_v18 }
0x148d   : > { %v3354_v32 = vmul.f32 %v6699_v46, %v3347_v55  ;;  %7691 = vmatmul.mubr.msk.f32.vlgmr.msra.gmra.mxu1 %vm424_vm1, %v9235_v53  ;;  %7725 = vmatmul.mubr.msk.f32.vlgmr.msra.gmra.mxu0 %vm424_vm1, %v9235_v53 }
0x148e   : > { %7700 = vmatpush3.msra.mxu1 %v6713_v56  ;;  %7693 = vmatprep.mubr.msk.f32.mxu1 %vm8299_vm0, %v8298_v1  ;;  %v8207_v50 = vpop.eup %8206 }
0x148f   : > { %v9249_v41 = vadd.f32 %v6700_v48, %v3354_v32  ;;  %7701 = vmatprep.subr.mxu1 %v8298_v1  ;;  %7727 = vmatprep.mubr.msk.f32.mxu0 %vm8299_vm0, %v8298_v1  ;;  %v3348_v52 = vmul.f32 %v8207_v50, %v3324_v24 }
0x1490   : > { %7702 = vmatpush3.msra.mxu1 %v6712_v19 }
0x1491   : > { %7694 = vmatmul.mubr.msk.f32.gmra.mxu1 %vm424_vm1, %v9249_v41  ;;  %7728 = vmatmul.mubr.msk.f32.gmra.mxu0 %vm424_vm1, %v9249_v41  ;;  %v3355_v54 = vmul.f32 %v6699_v46, %v3348_v52 }
0x1492   : > { %7703 = vmatprep.subr.mxu1 %v8298_v1  ;;  %7696 = vmatprep.mubr.msk.f32.mxu1 %vm8299_vm0, %v8298_v1 }
0x1493   : > { %7704 = vmatpush3.msra.mxu1 %v6711_v10  ;;  %7730 = vmatprep.mubr.msk.f32.mxu0 %vm8299_vm0, %v8298_v1  ;;  %v9269_v57 = vadd.f32 %v6700_v48, %v3355_v54 }
0x1494   : > { %7705 = vmatprep.subr.mxu1 %v8298_v1 }
0x1495   : > { %7706 = vmatpush3.msra.mxu1 %v6710_v20  ;;  %7731 = vmatmul.mubr.msk.f32.gmra.mxu0 %vm424_vm1, %v9269_v57 }
0x1496   : > { %7697 = vmatmul.mubr.msk.f32.gmra.mxu1 %vm424_vm1, %v9269_v57  ;;  %7733 = vmatprep.subr.mxu1 %v8298_v1 }
0x1497   : > { %7707 = vmatprep.mubr.msk.f32.mxu1 %vm8299_vm0, %v8298_v1  ;;  %7754 = vmatprep.mubr.msk.f32.mxu0 %vm8299_vm0, %v8298_v1 }
0x149a   : > { %7708 = vmatmul.mubr.msk.f32.vlgmr.msra.gmra.mxu1 %vm424_vm1, %v9235_v53 }
0x149b   : > { %7710 = vmatprep.mubr.msk.f32.mxu1 %vm8299_vm0, %v8298_v1 }
0x149e   : > { %7711 = vmatmul.mubr.msk.f32.gmra.mxu1 %vm424_vm1, %v9249_v41 }
0x149f   : > { %7713 = vmatprep.mubr.msk.f32.mxu1 %vm8299_vm0, %v8298_v1 }
0x14a2   : > { %7714 = vmatmul.mubr.msk.f32.gmra.mxu1 %vm424_vm1, %v9269_v57 }
0x14a3   : > { %7739 = vmatprep.mubr.msk.f32.mxu1 %vm8299_vm0, %v8298_v1 }
0x154d   : > { %v3451_v58 = vpop.f32.mrf.mxu1  ;;  %v3637_v45 = vpop.f32.mrf.mxu0 }
0x154e   : > { %v3638_v18 = vadd.f32 %v6724_v11, %v3637_v45  ;;  %v3452_v9 = vadd.f32 %v6706_v29, %v3451_v58 }
0x154f   : > { %v7692_v60 = vpop.f32.mrf.mxu1  ;;  %v7726_v62 = vpop.f32.mrf.mxu0 }
0x1550   : > { %v6761_v62 = vld [vmem:[%s10008_s4 + $0x15] ss:$0 sm:$0xff] }
0x1551   : > { %v3456_v63 = vpop.f32.mrf.mxu1  ;;  %v3642_v61 = vpop.f32.mrf.mxu0 }
0x1552   : > { %v3643_v16 = vadd.f32 %v6724_v11, %v3642_v61  ;;  %v3457_v34 = vadd.f32 %v6706_v29, %v3456_v63 }
0x1553   : > { %v7695_v5 = vpop.f32.mrf.mxu1  ;;  %v7729_v8 = vpop.f32.mrf.mxu0 }
0x1555   : > { %v3647_v12 = vpop.f32.mrf.mxu0 }
0x1556   : > { %v3461_v3 = vpop.f32.mrf.mxu1  ;;  %v3648_v13 = vadd.f32 %v6724_v11, %v3647_v12 }
0x1557   : > { %v7732_v37 = vpop.f32.mrf.mxu0  ;;  %v3462_v17 = vadd.f32 %v6706_v29, %v3461_v3 }
0x1558   : > { %v7698_v14 = vpop.f32.mrf.mxu1  ;;  %7749 = vmatpush3.msra.mxu0 %v3648_v13 }
0x1559   : > { %7750 = vmatprep.subr.mxu0 %v8298_v1 }
0x155a   : > { %v3544_v7 = vpop.f32.mrf.mxu1  ;;  %7751 = vmatpush3.msra.mxu0 %v3643_v16 }
0x155b   : > { %7752 = vmatprep.subr.mxu0 %v8298_v1  ;;  %v3545_v31 = vadd.f32 %v6715_v6, %v3544_v7 }
0x155c   : > { %v7709_v4 = vpop.f32.mrf.mxu1  ;;  %7753 = vmatpush3.msra.mxu0 %v3638_v18 }
0x155d   : > { %7780 = vmatprep.subr.mxu0 %v8298_v1 }
0x155e   : > { %v3549_v21 = vpop.f32.mrf.mxu1 }
0x155f   : > { %v3550_v26 = vadd.f32 %v6715_v6, %v3549_v21 }
0x1560   : > { %v7712_v22 = vpop.f32.mrf.mxu1 }
0x1562   : > { %v3554_v23 = vpop.f32.mrf.mxu1 }
0x1563   : > { %v3555_v24 = vadd.f32 %v6715_v6, %v3554_v23 }
0x1564   : > { %v7715_v25 = vpop.f32.mrf.mxu1 }
0x1565   : > { %7734 = vmatpush3.xpose.msk.msra.mxu1 %vm856_vm2, %v3555_v24 }
0x1566   : > { %7735 = vmatprep.subr.mxu1 %v8298_v1 }
0x1569   : > { %7736 = vmatpush3.xpose.msk.msra.mxu1 %vm856_vm2, %v3550_v26 }
0x156a   : > { %7737 = vmatprep.subr.mxu1 %v8298_v1 }
0x156d   : > { %7738 = vmatpush3.xpose.msk.msra.mxu1 %vm856_vm2, %v3545_v31 }
0x156e   : > { %7763 = vmatprep.subr.mxu1 %v8298_v1 }
0x1570   : > { %7740 = vmatmul.mubr.msk.f32.vlgmr.msra.gmra.mxu1 %vm856_vm2, %v3452_v9 }
0x1571   : > { %7742 = vmatprep.mubr.msk.f32.mxu1 %vm8299_vm0, %v8298_v1  ;;  %7764 = vmatpush3.msra.mxu1 %v6741_v28 }
0x1572   : > { %7765 = vmatprep.subr.mxu1 %v8298_v1 }
0x1573   : > { %7766 = vmatpush3.msra.mxu1 %v6740_v33  ;;  %v6750_v33 = vld [vmem:[%s10007_s3 + $0x238] sm:$0xff] }
0x1574   : > { %7743 = vmatmul.mubr.msk.f32.gmra.mxu1 %vm856_vm2, %v3457_v34  ;;  %7767 = vmatprep.subr.mxu1 %v8298_v1  ;;  %v6749_v34 = vld [vmem:[%s10007_s3 + $0x230] sm:$0xff] }
0x1575   : > { %7745 = vmatprep.mubr.msk.f32.mxu1 %vm8299_vm0, %v8298_v1  ;;  %7768 = vmatpush3.msra.mxu1 %v6739_v0 }
0x1576   : > { %7769 = vmatprep.subr.mxu1 %v8298_v1 }
0x1577   : > { %7770 = vmatpush3.msra.mxu1 %v6738_v35 }
0x1578   : > { %7746 = vmatmul.mubr.msk.f32.gmra.mxu1 %vm856_vm2, %v3462_v17  ;;  %7797 = vmatprep.subr.mxu1 %v8298_v1  ;;  %v6748_v17 = vld [vmem:[%s10007_s3 + $0x228] sm:$0xff] }
0x1579   : > { %7771 = vmatprep.mubr.msk.f32.mxu1 %vm8299_vm0, %v8298_v1 }
0x157c   : > { %7772 = vmatmul.mubr.msk.f32.vlgmr.msra.gmra.mxu1 %vm424_vm1, %v9235_v53 }
0x157d   : > { %7774 = vmatprep.mubr.msk.f32.mxu1 %vm8299_vm0, %v8298_v1  ;;  %7798 = vmatpush3.msra.mxu1 %v6759_v36  ;;  %v6747_v36 = vld [vmem:[%s10007_s3 + $0x220] sm:$0xff] }
0x157e   : > { %7799 = vmatprep.subr.mxu1 %v8298_v1 }
0x157f   : > { %7800 = vmatpush3.msra.mxu1 %v6758_v38 }
0x1580   : > { %7775 = vmatmul.mubr.msk.f32.gmra.mxu1 %vm424_vm1, %v9249_v41  ;;  %7801 = vmatprep.subr.mxu1 %v8298_v1 }
0x1581   : > { %7777 = vmatprep.mubr.msk.f32.mxu1 %vm8299_vm0, %v8298_v1  ;;  %7802 = vmatpush3.msra.mxu1 %v6757_v39 }
0x1582   : > { %7803 = vmatprep.subr.mxu1 %v8298_v1 }
0x1583   : > { %7804 = vmatpush3.msra.mxu1 %v6756_v40 }
0x1584   : > { %7778 = vmatmul.mubr.msk.f32.gmra.mxu1 %vm424_vm1, %v9269_v57  ;;  %7829 = vmatprep.subr.mxu1 %v8298_v1 }
0x1585   : > { %7805 = vmatprep.mubr.msk.f32.mxu1 %vm8299_vm0, %v8298_v1 }
0x1588   : > { %7806 = vmatmul.mubr.msk.f32.vlgmr.msra.gmra.mxu1 %vm424_vm1, %v9235_v53 }
0x1589   : > { %7808 = vmatprep.mubr.msk.f32.mxu1 %vm8299_vm0, %v8298_v1 }
0x158c   : > { %7809 = vmatmul.mubr.msk.f32.gmra.mxu1 %vm424_vm1, %v9249_v41 }
0x158d   : > { %7811 = vmatprep.mubr.msk.f32.mxu1 %vm8299_vm0, %v8298_v1 }
0x1590   : > { %7812 = vmatmul.mubr.msk.f32.gmra.mxu1 %vm424_vm1, %v9269_v57 }
0x1591   : > { %7835 = vmatprep.mubr.msk.f32.mxu1 %vm8299_vm0, %v8298_v1 }
0x1630   : > { %v3735_v15 = vpop.f32.mrf.mxu1 }
0x1631   : > { %v3749_v42 = vmul.f32 0.35355338, %v3735_v15 }
0x1632   : > { %v7741_v43 = vpop.f32.mrf.mxu1 }
0x1633   : > { %v3752_v44 = vsel %vm958_vm3, %v3749_v42, -inf }
0x1634   : > { %3753 = vmax.xlane.f32.xlu0 %v3752_v44  ;;  %v3740_v27 = vpop.f32.mrf.mxu1 }
0x1635   : > { %v3750_v46 = vmul.f32 0.35355338, %v3740_v27 }
0x1636   : > { %v7744_v47 = vpop.f32.mrf.mxu1 }
0x1637   : > { %v3755_v48 = vsel %vm958_vm3, %v3750_v46, -inf }
0x1638   : > { %3756 = vmax.xlane.f32.xlu1 %v3755_v48  ;;  %v3745_v49 = vpop.f32.mrf.mxu1 }
0x1639   : > { %v3751_v51 = vmul.f32 0.35355338, %v3745_v49 }
0x163a   : > { %v7747_v55 = vpop.f32.mrf.mxu1 }
0x163b   : > { %v3758_v56 = vsel %vm958_vm3, %v3751_v51, -inf }
0x163c   : > { %3759 = vmax.xlane.f32.xlu0 %v3758_v56  ;;  %v9379_v32 = vpop.f32.mrf.mxu1 }
0x163e   : > { %v7773_v19 = vpop.f32.mrf.mxu1 }
0x1640   : > { %v9381_v50 = vpop.f32.mrf.mxu1 }
0x1642   : > { %v7776_v52 = vpop.f32.mrf.mxu1 }
0x1644   : > { %v9383_v10 = vpop.f32.mrf.mxu1 }
0x1646   : > { %v7779_v54 = vpop.f32.mrf.mxu1 }
0x1647   : > { %v6743_v54 = vld [vmem:[%s10008_s4 + $0xd] ss:$0 sm:$0xff] }
0x1648   : > { %v4141_v20 = vpop.f32.mrf.mxu1 }
0x1649   : > { %v4142_v11 = vadd.f32 %v6761_v62, %v4141_v20 }
0x164a   : > { %v7807_v58 = vpop.f32.mrf.mxu1 }
0x164b   : > { %v3956_v58 = vadd.f32 %v6743_v54, %v9379_v32 }
0x164c   : > { %v4146_v45 = vpop.f32.mrf.mxu1 }
0x164d   : > { %v4147_v8 = vadd.f32 %v6761_v62, %v4146_v45  ;;  %v3961_v45 = vadd.f32 %v6743_v54, %v9381_v50 }
0x164e   : > { %v7810_v60 = vpop.f32.mrf.mxu1 }
0x164f   : > { %v3966_v60 = vadd.f32 %v6743_v54, %v9383_v10  ;;  %v6802_v54 = vld [vmem:[%s10007_s3 + $0x2d8] sm:$0xff] }
0x1650   : > { %v4151_v63 = vpop.f32.mrf.mxu1 }
0x1651   : > { %v4152_v61 = vadd.f32 %v6761_v62, %v4151_v63 }
0x1652   : > { %v7813_v5 = vpop.f32.mrf.mxu1 }
0x1653   : > { %7830 = vmatpush3.msra.mxu1 %v4152_v61 }
0x1654   : > { %7831 = vmatprep.subr.mxu1 %v8298_v1 }
0x1655   : > { %7832 = vmatpush3.msra.mxu1 %v4147_v8 }
0x1656   : > { %7833 = vmatprep.subr.mxu1 %v8298_v1 }
0x1657   : > { %7834 = vmatpush3.msra.mxu1 %v4142_v11 }
0x1658   : > { %7855 = vmatprep.subr.mxu1 %v8298_v1 }
0x16bd   : > { %v3754_v3 = vpop.xlane.xlu0 %3753 }
0x16be   : > { %v3761_v12 = vsub.f32 %v3749_v42, %v3754_v3 }
0x16c0   : > { %v3764_v13 = vmul.f32 1.442695, %v3761_v12 }
0x16c1   : > { %v3757_v14 = vpop.xlane.xlu1 %3756 }
0x16c2   : > { %8208 = vpow2.f32 %v3764_v13  ;;  %v3762_v37 = vsub.f32 %v3750_v46, %v3757_v14 }
0x16c4   : > { %v3766_v16 = vmul.f32 1.442695, %v3762_v37 }
0x16c5   : > { %v3760_v7 = vpop.xlane.xlu0 %3759 }
0x16c6   : > { %8210 = vpow2.f32 %v3766_v16  ;;  %v3763_v18 = vsub.f32 %v3751_v51, %v3760_v7  ;;  %v6752_v51 = vld [vmem:[%s10008_s4 + $0x11] ss:$0 sm:$0xff] }
0x16c8   : > { %v3768_v4 = vmul.f32 1.442695, %v3763_v18 }
0x16ca   : > { %8212 = vpow2.f32 %v3768_v4 }
0x16cf   : > { %v8209_v21 = vpop.eup %8208 }
0x16d0   : > { %v3770_v22 = vsel %vm958_vm3, %v8209_v21, 0.0 }
0x16d1   : > { %3771 = vadd.xlane.f32.xlu1 %v3770_v22 }
0x16d3   : > { %v8211_v6 = vpop.eup %8210 }
0x16d4   : > { %v3773_v23 = vsel %vm958_vm3, %v8211_v6, 0.0 }
0x16d5   : > { %3774 = vadd.xlane.f32.xlu0 %v3773_v23 }
0x16d7   : > { %v8213_v24 = vpop.eup %8212 }
0x16d8   : > { %v3776_v25 = vsel %vm958_vm3, %v8213_v24, 0.0 }
0x16d9   : > { %3777 = vadd.xlane.f32.xlu1 %v3776_v25 }
0x175a   : > { %v3772_v26 = vpop.xlane.xlu1 %3771 }
0x175b   : > { %8214 = vrcp.f32 %v3772_v26 }
0x175e   : > { %v3775_v29 = vpop.xlane.xlu0 %3774 }
0x175f   : > { %8216 = vrcp.f32 %v3775_v29 }
0x1762   : > { %v3778_v31 = vpop.xlane.xlu1 %3777 }
0x1763   : > { %8218 = vrcp.f32 %v3778_v31 }
0x1768   : > { %v8215_v9 = vpop.eup %8214 }
0x1769   : > { %v3782_v28 = vmul.f32 %v8215_v9, %v8209_v21  ;;  %v6774_v9 = vld [vmem:[%s10009_s5 + $0x28] sm:$0xff] }
0x176b   : > { %7755 = vmatmul.mubr.msk.f32.vlgmr.msra.gmra.mxu0 %vm958_vm3, %v3782_v28 }
0x176c   : > { %v8217_v0 = vpop.eup %8216  ;;  %7781 = vmatpush3.msra.mxu0 %v6750_v33  ;;  %7757 = vmatprep.mubr.msk.f32.mxu0 %vm8299_vm0, %v8298_v1 }
0x176d   : > { %7782 = vmatprep.subr.mxu0 %v8298_v1  ;;  %v3783_v35 = vmul.f32 %v8217_v0, %v8211_v6 }
0x176e   : > { %7783 = vmatpush3.msra.mxu0 %v6749_v34 }
0x176f   : > { %7758 = vmatmul.mubr.msk.f32.gmra.mxu0 %vm958_vm3, %v3783_v35  ;;  %7784 = vmatprep.subr.mxu0 %v8298_v1 }
0x1770   : > { %v8219_v38 = vpop.eup %8218  ;;  %7760 = vmatprep.mubr.msk.f32.mxu0 %vm8299_vm0, %v8298_v1  ;;  %7785 = vmatpush3.msra.mxu0 %v6748_v17  ;;  %v6737_v17 = vld [vmem:[%s10009_s5 + $0x20] sm:$0xff] }
0x1771   : > { %v3784_v39 = vmul.f32 %v8219_v38, %v8213_v24  ;;  %7786 = vmatprep.subr.mxu0 %v8298_v1 }
0x1772   : > { %7787 = vmatpush3.msra.mxu0 %v6747_v36 }
0x1773   : > { %7761 = vmatmul.mubr.msk.f32.gmra.mxu0 %vm958_vm3, %v3784_v39  ;;  %7814 = vmatprep.subr.mxu0 %v8298_v1 }
0x1774   : > { %7788 = vmatprep.mubr.msk.f32.mxu0 %vm8299_vm0, %v8298_v1 }
0x1777   : > { %7789 = vmatmul.mubr.msk.f32.vlgmr.msra.gmra.mxu0 %vm424_vm1, %v9235_v53 }
0x1778   : > { %7791 = vmatprep.mubr.msk.f32.mxu0 %vm8299_vm0, %v8298_v1 }
0x177b   : > { %7792 = vmatmul.mubr.msk.f32.gmra.mxu0 %vm424_vm1, %v9249_v41 }
0x177c   : > { %7794 = vmatprep.mubr.msk.f32.mxu0 %vm8299_vm0, %v8298_v1 }
0x177f   : > { %7795 = vmatmul.mubr.msk.f32.gmra.mxu0 %vm424_vm1, %v9269_v57 }
0x1780   : > { %7820 = vmatprep.mubr.msk.f32.mxu0 %vm8299_vm0, %v8298_v1 }
0x182b   : > { %v9431_v40 = vpop.f32.mrf.mxu0 }
0x182d   : > { %v7756_v15 = vpop.f32.mrf.mxu0 }
0x182f   : > { %v9433_v42 = vpop.f32.mrf.mxu0 }
0x1831   : > { %v7759_v43 = vpop.f32.mrf.mxu0 }
0x1832   : > { %v6793_v43 = vld [vmem:[%s10007_s3 + $0x258] sm:$0xff] }
0x1833   : > { %v9435_v44 = vpop.f32.mrf.mxu0 }
0x1835   : > { %v7762_v27 = vpop.f32.mrf.mxu0 }
0x1836   : > { %v6792_v27 = vld [vmem:[%s10007_s3 + $0x250] sm:$0xff] }
0x1837   : > { %v4048_v46 = vpop.f32.mrf.mxu0 }
0x1838   : > { %v4049_v20 = vadd.f32 %v6752_v51, %v4048_v46  ;;  %v6791_v46 = vld [vmem:[%s10007_s3 + $0x248] sm:$0xff] }
0x1839   : > { %v7790_v47 = vpop.f32.mrf.mxu0 }
0x183a   : > { %v6783_v47 = vld [vmem:[%s10007_s3 + $0x1d0] sm:$0xff] }
0x183b   : > { %v4053_v48 = vpop.f32.mrf.mxu0 }
0x183c   : > { %v4054_v52 = vadd.f32 %v6752_v51, %v4053_v48 }
0x183d   : > { %v7793_v49 = vpop.f32.mrf.mxu0 }
0x183e   : > { %v6782_v49 = vld [vmem:[%s10007_s3 + $0x1c8] sm:$0xff] }
0x183f   : > { %v4058_v55 = vpop.f32.mrf.mxu0 }
0x1840   : > { %v4059_v56 = vadd.f32 %v6752_v51, %v4058_v55  ;;  %v6781_v55 = vld [vmem:[%s10007_s3 + $0x1c0] sm:$0xff] }
0x1841   : > { %v7796_v19 = vpop.f32.mrf.mxu0 }
0x1842   : > { %7815 = vmatpush3.xpose.msk.msra.mxu0 %vm856_vm2, %v4059_v56 }
0x1843   : > { %7816 = vmatprep.subr.mxu0 %v8298_v1 }
0x1846   : > { %7817 = vmatpush3.xpose.msk.msra.mxu0 %vm856_vm2, %v4054_v52 }
0x1847   : > { %7818 = vmatprep.subr.mxu0 %v8298_v1 }
0x184a   : > { %7819 = vmatpush3.xpose.msk.msra.mxu0 %vm856_vm2, %v4049_v20 }
0x184b   : > { %7844 = vmatprep.subr.mxu0 %v8298_v1 }
0x184d   : > { %7821 = vmatmul.mubr.msk.f32.vlgmr.msra.gmra.mxu0 %vm856_vm2, %v3956_v58  ;;  %v6801_v58 = vld [vmem:[%s10007_s3 + $0x2d0] sm:$0xff] }
0x184e   : > { %7823 = vmatprep.mubr.msk.f32.mxu0 %vm8299_vm0, %v8298_v1  ;;  %7845 = vmatpush3.msra.mxu0 %v6774_v9 }
0x184f   : > { %7866 = vmatprep.subr.mxu0 %v8298_v1 }
0x1851   : > { %7824 = vmatmul.mubr.msk.f32.gmra.mxu0 %vm856_vm2, %v3961_v45 }
0x1852   : > { %7826 = vmatprep.mubr.msk.f32.mxu0 %vm8299_vm0, %v8298_v1 }
0x1855   : > { %7827 = vmatmul.mubr.msk.f32.gmra.mxu0 %vm856_vm2, %v3966_v60  ;;  %v6800_v60 = vld [vmem:[%s10007_s3 + $0x2c8] sm:$0xff] }
0x1856   : > { %7846 = vmatprep.mubr.msk.f32.mxu0 %vm8299_vm0, %v8298_v1 }
0x190d   : > { %v4239_v32 = vpop.f32.mrf.mxu0 }
0x190e   : > { %v4253_v62 = vmul.f32 0.35355338, %v4239_v32 }
0x190f   : > { %v7822_v63 = vpop.f32.mrf.mxu0 }
0x1910   : > { %v4256_v61 = vsel %vm958_vm3, %v4253_v62, -inf }
0x1911   : > { %4257 = vmax.xlane.f32.xlu0 %v4256_v61  ;;  %v4244_v5 = vpop.f32.mrf.mxu0 }
0x1912   : > { %v4254_v50 = vmul.f32 0.35355338, %v4244_v5 }
0x1913   : > { %v7825_v8 = vpop.f32.mrf.mxu0 }
0x1914   : > { %v4259_v11 = vsel %vm958_vm3, %v4254_v50, -inf }
0x1915   : > { %4260 = vmax.xlane.f32.xlu1 %v4259_v11  ;;  %v4249_v3 = vpop.f32.mrf.mxu0 }
0x1916   : > { %v4255_v12 = vmul.f32 0.35355338, %v4249_v3 }
0x1917   : > { %v7828_v10 = vpop.f32.mrf.mxu0 }
0x1918   : > { %v4262_v13 = vsel %vm958_vm3, %v4255_v12, -inf }
0x1919   : > { %4263 = vmax.xlane.f32.xlu0 %v4262_v13 }
0x199a   : > { %v4258_v14 = vpop.xlane.xlu0 %4257 }
0x199b   : > { %v4265_v37 = vsub.f32 %v4253_v62, %v4258_v14  ;;  %v6799_v62 = vld [vmem:[%s10007_s3 + $0x2c0] sm:$0xff] }
0x199d   : > { %v4268_v16 = vmul.f32 1.442695, %v4265_v37 }
0x199e   : > { %v4261_v7 = vpop.xlane.xlu1 %4260 }
0x199f   : > { %8220 = vpow2.f32 %v4268_v16  ;;  %v4266_v18 = vsub.f32 %v4254_v50, %v4261_v7 }
0x19a1   : > { %v4270_v4 = vmul.f32 1.442695, %v4266_v18 }
0x19a2   : > { %v4264_v21 = vpop.xlane.xlu0 %4263 }
0x19a3   : > { %8222 = vpow2.f32 %v4270_v4  ;;  %v4267_v22 = vsub.f32 %v4255_v12, %v4264_v21  ;;  %v6795_v12 = vld [vmem:[%s10008_s4 + $0x12] ss:$0 sm:$0xff] }
0x19a5   : > { %v4272_v6 = vmul.f32 1.442695, %v4267_v22 }
0x19a7   : > { %8224 = vpow2.f32 %v4272_v6 }
0x19ac   : > { %v8221_v23 = vpop.eup %8220 }
0x19ad   : > { %v4274_v24 = vsel %vm958_vm3, %v8221_v23, 0.0 }
0x19ae   : > { %4275 = vadd.xlane.f32.xlu1 %v4274_v24 }
0x19b0   : > { %v8223_v25 = vpop.eup %8222 }
0x19b1   : > { %v4277_v26 = vsel %vm958_vm3, %v8223_v25, 0.0 }
0x19b2   : > { %4278 = vadd.xlane.f32.xlu0 %v4277_v26 }
0x19b4   : > { %v8225_v29 = vpop.eup %8224 }
0x19b5   : > { %v4280_v31 = vsel %vm958_vm3, %v8225_v29, 0.0 }
0x19b6   : > { %4281 = vadd.xlane.f32.xlu1 %v4280_v31 }
0x1a37   : > { %v4276_v28 = vpop.xlane.xlu1 %4275 }
0x1a38   : > { %8226 = vrcp.f32 %v4276_v28 }
0x1a3b   : > { %v4279_v33 = vpop.xlane.xlu0 %4278 }
0x1a3c   : > { %8228 = vrcp.f32 %v4279_v33 }
0x1a3f   : > { %v4282_v34 = vpop.xlane.xlu1 %4281 }
0x1a40   : > { %8230 = vrcp.f32 %v4282_v34 }
0x1a45   : > { %v8227_v0 = vpop.eup %8226 }
0x1a46   : > { %v4286_v35 = vmul.f32 %v8227_v0, %v8221_v23  ;;  %v6786_v23 = vld [vmem:[%s10008_s4 + $0xe] ss:$0 sm:$0xff] }
0x1a48   : > { %7836 = vmatmul.mubr.msk.f32.vlgmr.msra.gmra.mxu1 %vm958_vm3, %v4286_v35 }
0x1a49   : > { %v8229_v36 = vpop.eup %8228  ;;  %7838 = vmatprep.mubr.msk.f32.mxu1 %vm8299_vm0, %v8298_v1  ;;  %7856 = vmatpush3.msra.mxu1 %v6737_v17 }
0x1a4a   : > { %v4287_v38 = vmul.f32 %v8229_v36, %v8223_v25  ;;  %7883 = vmatprep.subr.mxu1 %v8298_v1 }
0x1a4c   : > { %7839 = vmatmul.mubr.msk.f32.gmra.mxu1 %vm958_vm3, %v4287_v38  ;;  %v6804_v38 = vld [vmem:[%s10008_s4 + $0x16] ss:$0 sm:$0xff] }
0x1a4d   : > { %v8231_v39 = vpop.eup %8230  ;;  %7841 = vmatprep.mubr.msk.f32.mxu1 %vm8299_vm0, %v8298_v1 }
0x1a4e   : > { %v4288_v15 = vmul.f32 %v8231_v39, %v8225_v29 }
0x1a50   : > { %7842 = vmatmul.mubr.msk.f32.gmra.mxu1 %vm958_vm3, %v4288_v15 }
0x1a51   : > { %7857 = vmatprep.mubr.msk.f32.mxu1 %vm8299_vm0, %v8298_v1 }
0x1a54   : > { %7858 = vmatmul.mubr.msk.f32.vlgmr.msra.gmra.mxu1 %vm856_vm2, %v9431_v40  ;;  %v6790_v40 = vld [vmem:[%s10007_s3 + $0x240] sm:$0xff] }
0x1a55   : > { %7860 = vmatprep.mubr.msk.f32.mxu1 %vm8299_vm0, %v8298_v1  ;;  %7884 = vmatpush3.msra.mxu1 %v6793_v43 }
0x1a56   : > { %7885 = vmatprep.subr.mxu1 %v8298_v1 }
0x1a57   : > { %7886 = vmatpush3.msra.mxu1 %v6792_v27 }
0x1a58   : > { %7861 = vmatmul.mubr.msk.f32.gmra.mxu1 %vm856_vm2, %v9433_v42  ;;  %7887 = vmatprep.subr.mxu1 %v8298_v1  ;;  %v6784_v42 = vld [vmem:[%s10007_s3 + $0x1d8] sm:$0xff] }
0x1a59   : > { %7863 = vmatprep.mubr.msk.f32.mxu1 %vm8299_vm0, %v8298_v1  ;;  %7888 = vmatpush3.msra.mxu1 %v6791_v46 }
0x1a5a   : > { %7889 = vmatprep.subr.mxu1 %v8298_v1 }
0x1a5b   : > { %7890 = vmatpush3.msra.mxu1 %v6790_v40 }
0x1a5c   : > { %7864 = vmatmul.mubr.msk.f32.gmra.mxu1 %vm856_vm2, %v9435_v44  ;;  %7917 = vmatprep.subr.mxu1 %v8298_v1 }
0x1a5d   : > { %7891 = vmatprep.mubr.msk.f32.mxu1 %vm8299_vm0, %v8298_v1 }
0x1a60   : > { %7892 = vmatmul.mubr.msk.f32.vlgmr.msra.gmra.mxu1 %vm424_vm1, %v9235_v53 }
0x1a61   : > { %7894 = vmatprep.mubr.msk.f32.mxu1 %vm8299_vm0, %v8298_v1 }
0x1a64   : > { %7895 = vmatmul.mubr.msk.f32.gmra.mxu1 %vm424_vm1, %v9249_v41 }
0x1a65   : > { %7897 = vmatprep.mubr.msk.f32.mxu1 %vm8299_vm0, %v8298_v1 }
0x1a68   : > { %7898 = vmatmul.mubr.msk.f32.gmra.mxu1 %vm424_vm1, %v9269_v57 }
0x1a69   : > { %7923 = vmatprep.mubr.msk.f32.mxu1 %vm8299_vm0, %v8298_v1 }
0x1b08   : > { %v4364_v44 = vpop.f32.mrf.mxu1 }
0x1b09   : > { %7847 = vmatmul.mubr.msk.f32.vlgmr.msra.gmra.mxu0 %vm856_vm2, %v4364_v44 }
0x1b0a   : > { %v7837_v48 = vpop.f32.mrf.mxu1  ;;  %7867 = vmatpush3.msra.mxu0 %v6784_v42  ;;  %7849 = vmatprep.mubr.msk.f32.mxu0 %vm8299_vm0, %v8298_v1 }
0x1b0b   : > { %7868 = vmatprep.subr.mxu0 %v8298_v1 }
0x1b0c   : > { %v4369_v51 = vpop.f32.mrf.mxu1  ;;  %7869 = vmatpush3.msra.mxu0 %v6783_v47 }
0x1b0d   : > { %7850 = vmatmul.mubr.msk.f32.gmra.mxu0 %vm856_vm2, %v4369_v51  ;;  %7870 = vmatprep.subr.mxu0 %v8298_v1 }
0x1b0e   : > { %v7840_v56 = vpop.f32.mrf.mxu1  ;;  %7852 = vmatprep.mubr.msk.f32.mxu0 %vm8299_vm0, %v8298_v1  ;;  %7871 = vmatpush3.msra.mxu0 %v6782_v49 }
0x1b0f   : > { %7872 = vmatprep.subr.mxu0 %v8298_v1 }
0x1b10   : > { %v4374_v19 = vpop.f32.mrf.mxu1  ;;  %7873 = vmatpush3.msra.mxu0 %v6781_v55 }
0x1b11   : > { %7853 = vmatmul.mubr.msk.f32.gmra.mxu0 %vm856_vm2, %v4374_v19  ;;  %7900 = vmatprep.subr.mxu0 %v8298_v1 }
0x1b12   : > { %v7843_v52 = vpop.f32.mrf.mxu1  ;;  %7874 = vmatprep.mubr.msk.f32.mxu0 %vm8299_vm0, %v8298_v1 }
0x1b14   : > { %v9552_v20 = vpop.f32.mrf.mxu1 }
0x1b15   : > { %7875 = vmatmul.mubr.msk.f32.vlgmr.msra.gmra.mxu0 %vm424_vm1, %v9235_v53 }
0x1b16   : > { %v7859_v45 = vpop.f32.mrf.mxu1  ;;  %7877 = vmatprep.mubr.msk.f32.mxu0 %vm8299_vm0, %v8298_v1  ;;  %7901 = vmatpush3.msra.mxu0 %v6802_v54 }
0x1b17   : > { %7902 = vmatprep.subr.mxu0 %v8298_v1 }
0x1b18   : > { %v9565_v32 = vpop.f32.mrf.mxu1  ;;  %7903 = vmatpush3.msra.mxu0 %v6801_v58 }
0x1b19   : > { %7878 = vmatmul.mubr.msk.f32.gmra.mxu0 %vm424_vm1, %v9249_v41  ;;  %7904 = vmatprep.subr.mxu0 %v8298_v1 }
0x1b1a   : > { %v7862_v63 = vpop.f32.mrf.mxu1  ;;  %7880 = vmatprep.mubr.msk.f32.mxu0 %vm8299_vm0, %v8298_v1  ;;  %7905 = vmatpush3.msra.mxu0 %v6800_v60 }
0x1b1b   : > { %7906 = vmatprep.subr.mxu0 %v8298_v1 }
0x1b1c   : > { %v9576_v61 = vpop.f32.mrf.mxu1  ;;  %7907 = vmatpush3.msra.mxu0 %v6799_v62 }
0x1b1d   : > { %7881 = vmatmul.mubr.msk.f32.gmra.mxu0 %vm424_vm1, %v9269_v57  ;;  %7932 = vmatprep.subr.mxu0 %v8298_v1 }
0x1b1e   : > { %v7865_v5 = vpop.f32.mrf.mxu1  ;;  %7908 = vmatprep.mubr.msk.f32.mxu0 %vm8299_vm0, %v8298_v1 }
0x1b20   : > { %v4730_v50 = vpop.f32.mrf.mxu1 }
0x1b21   : > { %7909 = vmatmul.mubr.msk.f32.vlgmr.msra.gmra.mxu0 %vm424_vm1, %v9235_v53  ;;  %v4731_v16 = vadd.f32 %v6795_v12, %v4730_v50 }
0x1b22   : > { %v7893_v8 = vpop.f32.mrf.mxu1  ;;  %7911 = vmatprep.mubr.msk.f32.mxu0 %vm8299_vm0, %v8298_v1 }
0x1b24   : > { %v4735_v11 = vpop.f32.mrf.mxu1 }
0x1b25   : > { %7912 = vmatmul.mubr.msk.f32.gmra.mxu0 %vm424_vm1, %v9249_v41  ;;  %v4736_v37 = vadd.f32 %v6795_v12, %v4735_v11 }
0x1b26   : > { %v7896_v3 = vpop.f32.mrf.mxu1  ;;  %7914 = vmatprep.mubr.msk.f32.mxu0 %vm8299_vm0, %v8298_v1 }
0x1b28   : > { %v4740_v10 = vpop.f32.mrf.mxu1 }
0x1b29   : > { %v4741_v13 = vadd.f32 %v6795_v12, %v4740_v10  ;;  %7915 = vmatmul.mubr.msk.f32.gmra.mxu0 %vm424_vm1, %v9269_v57 }
0x1b2a   : > { %v7899_v14 = vpop.f32.mrf.mxu1  ;;  %7938 = vmatprep.mubr.msk.f32.mxu0 %vm8299_vm0, %v8298_v1 }
0x1b2b   : > { %7918 = vmatpush3.xpose.msk.msra.mxu1 %vm856_vm2, %v4741_v13 }
0x1b2c   : > { %7919 = vmatprep.subr.mxu1 %v8298_v1 }
0x1b2f   : > { %7920 = vmatpush3.xpose.msk.msra.mxu1 %vm856_vm2, %v4736_v37 }
0x1b30   : > { %7921 = vmatprep.subr.mxu1 %v8298_v1 }
0x1b33   : > { %7922 = vmatpush3.xpose.msk.msra.mxu1 %vm856_vm2, %v4731_v16  ;;  %v6817_v16 = vld [vmem:[%s10009_s5 + $0x30] sm:$0xff] }
0x1b34   : > { %7947 = vmatprep.subr.mxu1 %v8298_v1 }
0x1bc9   : > { %v9604_v7 = vpop.f32.mrf.mxu0 }
0x1bcb   : > { %v7848_v18 = vpop.f32.mrf.mxu0 }
0x1bcd   : > { %v9606_v4 = vpop.f32.mrf.mxu0 }
0x1bcf   : > { %v7851_v21 = vpop.f32.mrf.mxu0 }
0x1bd1   : > { %v9608_v22 = vpop.f32.mrf.mxu0 }
0x1bd3   : > { %v7854_v6 = vpop.f32.mrf.mxu0 }
0x1bd5   : > { %v4637_v24 = vpop.f32.mrf.mxu0 }
0x1bd6   : > { %v4638_v25 = vadd.f32 %v6786_v23, %v4637_v24 }
0x1bd7   : > { %v7876_v26 = vpop.f32.mrf.mxu0 }
0x1bd8   : > { %7924 = vmatmul.mubr.msk.f32.vlgmr.msra.gmra.mxu1 %vm856_vm2, %v4638_v25  ;;  %v6824_v25 = vld [vmem:[%s10007_s3 + $0x1f8] sm:$0xff]  ;;  %v6823_v26 = vld [vmem:[%s10007_s3 + $0x1f0] sm:$0xff] }
0x1bd9   : > { %v4642_v29 = vpop.f32.mrf.mxu0  ;;  %7926 = vmatprep.mubr.msk.f32.mxu1 %vm8299_vm0, %v8298_v1  ;;  %7948 = vmatpush3.msra.mxu1 %v6817_v16 }
0x1bda   : > { %v4643_v31 = vadd.f32 %v6786_v23, %v4642_v29  ;;  %7975 = vmatprep.subr.mxu1 %v8298_v1 }
0x1bdb   : > { %v7879_v9 = vpop.f32.mrf.mxu0 }
0x1bdc   : > { %7927 = vmatmul.mubr.msk.f32.gmra.mxu1 %vm856_vm2, %v4643_v31  ;;  %v6822_v9 = vld [vmem:[%s10007_s3 + $0x1e8] sm:$0xff] }
0x1bdd   : > { %v4647_v28 = vpop.f32.mrf.mxu0  ;;  %7929 = vmatprep.mubr.msk.f32.mxu1 %vm8299_vm0, %v8298_v1 }
0x1bde   : > { %v4648_v33 = vadd.f32 %v6786_v23, %v4647_v28  ;;  %v6821_v28 = vld [vmem:[%s10007_s3 + $0x1e0] sm:$0xff] }
0x1bdf   : > { %v7882_v34 = vpop.f32.mrf.mxu0 }
0x1be0   : > { %7930 = vmatmul.mubr.msk.f32.gmra.mxu1 %vm856_vm2, %v4648_v33 }
0x1be1   : > { %v4823_v0 = vpop.f32.mrf.mxu0  ;;  %7949 = vmatprep.mubr.msk.f32.mxu1 %vm8299_vm0, %v8298_v1 }
0x1be2   : > { %v4824_v46 = vadd.f32 %v6804_v38, %v4823_v0  ;;  %v6842_v0 = vld [vmem:[%s10007_s3 + $0x2f8] sm:$0xff] }
0x1be3   : > { %v7910_v35 = vpop.f32.mrf.mxu0 }
0x1be4   : > { %v6841_v35 = vld [vmem:[%s10007_s3 + $0x2f0] sm:$0xff] }
0x1be5   : > { %v4828_v17 = vpop.f32.mrf.mxu0 }
0x1be6   : > { %v4829_v27 = vadd.f32 %v6804_v38, %v4828_v17  ;;  %v6840_v17 = vld [vmem:[%s10007_s3 + $0x2e8] sm:$0xff] }
0x1be7   : > { %v7913_v36 = vpop.f32.mrf.mxu0 }
0x1be8   : > { %v6839_v36 = vld [vmem:[%s10007_s3 + $0x2e0] sm:$0xff] }
0x1be9   : > { %v4833_v39 = vpop.f32.mrf.mxu0 }
0x1bea   : > { %v4834_v15 = vadd.f32 %v6804_v38, %v4833_v39  ;;  %v6833_v38 = vld [vmem:[%s10007_s3 + $0x278] sm:$0xff] }
0x1beb   : > { %v7916_v43 = vpop.f32.mrf.mxu0 }
0x1bec   : > { %7933 = vmatpush3.msra.mxu0 %v4834_v15  ;;  %v6832_v15 = vld [vmem:[%s10007_s3 + $0x270] sm:$0xff] }
0x1bed   : > { %7934 = vmatprep.subr.mxu0 %v8298_v1 }
0x1bee   : > { %7935 = vmatpush3.msra.mxu0 %v4829_v27  ;;  %v6831_v27 = vld [vmem:[%s10007_s3 + $0x268] sm:$0xff] }
0x1bef   : > { %7936 = vmatprep.subr.mxu0 %v8298_v1 }
0x1bf0   : > { %7937 = vmatpush3.msra.mxu0 %v4824_v46 }
0x1bf1   : > { %7958 = vmatprep.subr.mxu0 %v8298_v1 }
0x1c98   : > { %v4921_v40 = vpop.f32.mrf.mxu1 }
0x1c99   : > { %v4935_v42 = vmul.f32 0.35355338, %v4921_v40  ;;  %v6830_v40 = vld [vmem:[%s10007_s3 + $0x260] sm:$0xff] }
0x1c9a   : > { %v7925_v44 = vpop.f32.mrf.mxu1 }
0x1c9b   : > { %v4938_v47 = vsel %vm958_vm3, %v4935_v42, -inf }
0x1c9c   : > { %4939 = vmax.xlane.f32.xlu0 %v4938_v47  ;;  %v4926_v48 = vpop.f32.mrf.mxu1 }
0x1c9d   : > { %v4936_v49 = vmul.f32 0.35355338, %v4926_v48 }
0x1c9e   : > { %v7928_v51 = vpop.f32.mrf.mxu1 }
0x1c9f   : > { %v4941_v55 = vsel %vm958_vm3, %v4936_v49, -inf }
0x1ca0   : > { %4942 = vmax.xlane.f32.xlu1 %v4941_v55  ;;  %v4931_v56 = vpop.f32.mrf.mxu1 }
0x1ca1   : > { %v4937_v19 = vmul.f32 0.35355338, %v4931_v56 }
0x1ca2   : > { %v7931_v52 = vpop.f32.mrf.mxu1 }
0x1ca3   : > { %v4944_v54 = vsel %vm958_vm3, %v4937_v19, -inf }
0x1ca4   : > { %4945 = vmax.xlane.f32.xlu0 %v4944_v54 }
0x1d25   : > { %v4940_v58 = vpop.xlane.xlu0 %4939 }
0x1d26   : > { %v4947_v45 = vsub.f32 %v4935_v42, %v4940_v58 }
0x1d28   : > { %v4950_v60 = vmul.f32 1.442695, %v4947_v45 }
0x1d29   : > { %v4943_v62 = vpop.xlane.xlu1 %4942 }
0x1d2a   : > { %8232 = vpow2.f32 %v4950_v60  ;;  %v4948_v63 = vsub.f32 %v4936_v49, %v4943_v62 }
0x1d2c   : > { %v4952_v5 = vmul.f32 1.442695, %v4948_v63 }
0x1d2d   : > { %v4946_v50 = vpop.xlane.xlu0 %4945 }
0x1d2e   : > { %8234 = vpow2.f32 %v4952_v5  ;;  %v4949_v8 = vsub.f32 %v4937_v19, %v4946_v50  ;;  %v4545_v5 = vadd.f32 %v9552_v20, %v9604_v7 }
0x1d30   : > { %v4954_v11 = vmul.f32 1.442695, %v4949_v8 }
0x1d32   : > { %8236 = vpow2.f32 %v4954_v11 }
0x1d37   : > { %v8233_v3 = vpop.eup %8232 }
0x1d38   : > { %v4956_v12 = vsel %vm958_vm3, %v8233_v3, 0.0 }
0x1d39   : > { %4957 = vadd.xlane.f32.xlu1 %v4956_v12 }
0x1d3b   : > { %v8235_v10 = vpop.eup %8234 }
0x1d3c   : > { %v4959_v13 = vsel %vm958_vm3, %v8235_v10, 0.0 }
0x1d3d   : > { %4960 = vadd.xlane.f32.xlu0 %v4959_v13 }
0x1d3f   : > { %v8237_v14 = vpop.eup %8236 }
0x1d40   : > { %v4962_v37 = vsel %vm958_vm3, %v8237_v14, 0.0 }
0x1d41   : > { %4963 = vadd.xlane.f32.xlu1 %v4962_v37 }
0x1dc2   : > { %v4958_v18 = vpop.xlane.xlu1 %4957 }
0x1dc3   : > { %8238 = vrcp.f32 %v4958_v18 }
0x1dc6   : > { %v4961_v21 = vpop.xlane.xlu0 %4960 }
0x1dc7   : > { %8240 = vrcp.f32 %v4961_v21 }
0x1dca   : > { %v4964_v6 = vpop.xlane.xlu1 %4963 }
0x1dcb   : > { %8242 = vrcp.f32 %v4964_v6 }
0x1dd0   : > { %v8239_v23 = vpop.eup %8238 }
0x1dd1   : > { %v4968_v24 = vmul.f32 %v8239_v23, %v8233_v3  ;;  %v4550_v3 = vadd.f32 %v9565_v32, %v9606_v4  ;;  %v6835_v23 = vld [vmem:[%s10008_s4 + $0x13] ss:$0 sm:$0xff] }
0x1dd3   : > { %7939 = vmatmul.mubr.msk.f32.vlgmr.msra.gmra.mxu0 %vm958_vm3, %v4968_v24 }
0x1dd4   : > { %v8241_v29 = vpop.eup %8240  ;;  %7941 = vmatprep.mubr.msk.f32.mxu0 %vm8299_vm0, %v8298_v1  ;;  %7959 = vmatpush3.msra.mxu0 %v6824_v25 }
0x1dd5   : > { %v4969_v31 = vmul.f32 %v8241_v29, %v8235_v10  ;;  %7960 = vmatprep.subr.mxu0 %v8298_v1 }
0x1dd6   : > { %7961 = vmatpush3.msra.mxu0 %v6823_v26 }
0x1dd7   : > { %7942 = vmatmul.mubr.msk.f32.gmra.mxu0 %vm958_vm3, %v4969_v31  ;;  %7962 = vmatprep.subr.mxu0 %v8298_v1 }
0x1dd8   : > { %v8243_v33 = vpop.eup %8242  ;;  %7944 = vmatprep.mubr.msk.f32.mxu0 %vm8299_vm0, %v8298_v1  ;;  %7963 = vmatpush3.msra.mxu0 %v6822_v9 }
0x1dd9   : > { %v4970_v34 = vmul.f32 %v8243_v33, %v8237_v14  ;;  %7964 = vmatprep.subr.mxu0 %v8298_v1  ;;  %v4555_v14 = vadd.f32 %v9576_v61, %v9608_v22  ;;  %v6826_v22 = vld [vmem:[%s10008_s4 + $0xf] ss:$0 sm:$0xff] }
0x1dda   : > { %7965 = vmatpush3.msra.mxu0 %v6821_v28 }
0x1ddb   : > { %7945 = vmatmul.mubr.msk.f32.gmra.mxu0 %vm958_vm3, %v4970_v34  ;;  %7992 = vmatprep.subr.mxu0 %v8298_v1 }
0x1ddc   : > { %7966 = vmatprep.mubr.msk.f32.mxu0 %vm8299_vm0, %v8298_v1 }
0x1ddf   : > { %7967 = vmatmul.mubr.msk.f32.vlgmr.msra.gmra.mxu0 %vm424_vm1, %v9235_v53 }
0x1de0   : > { %7969 = vmatprep.mubr.msk.f32.mxu0 %vm8299_vm0, %v8298_v1  ;;  %7993 = vmatpush3.msra.mxu0 %v6842_v0 }
0x1de1   : > { %7994 = vmatprep.subr.mxu0 %v8298_v1 }
0x1de2   : > { %7995 = vmatpush3.msra.mxu0 %v6841_v35 }
0x1de3   : > { %7970 = vmatmul.mubr.msk.f32.gmra.mxu0 %vm424_vm1, %v9249_v41  ;;  %7996 = vmatprep.subr.mxu0 %v8298_v1 }
0x1de4   : > { %7972 = vmatprep.mubr.msk.f32.mxu0 %vm8299_vm0, %v8298_v1  ;;  %7997 = vmatpush3.msra.mxu0 %v6840_v17 }
0x1de5   : > { %7998 = vmatprep.subr.mxu0 %v8298_v1 }
0x1de6   : > { %7999 = vmatpush3.msra.mxu0 %v6839_v36 }
0x1de7   : > { %7973 = vmatmul.mubr.msk.f32.gmra.mxu0 %vm424_vm1, %v9269_v57  ;;  %8024 = vmatprep.subr.mxu0 %v8298_v1 }
0x1de8   : > { %8000 = vmatprep.mubr.msk.f32.mxu0 %vm8299_vm0, %v8298_v1 }
0x1deb   : > { %8001 = vmatmul.mubr.msk.f32.vlgmr.msra.gmra.mxu0 %vm424_vm1, %v9235_v53 }
0x1dec   : > { %8003 = vmatprep.mubr.msk.f32.mxu0 %vm8299_vm0, %v8298_v1 }
0x1def   : > { %8004 = vmatmul.mubr.msk.f32.gmra.mxu0 %vm424_vm1, %v9249_v41 }
0x1df0   : > { %8006 = vmatprep.mubr.msk.f32.mxu0 %vm8299_vm0, %v8298_v1 }
0x1df3   : > { %8007 = vmatmul.mubr.msk.f32.gmra.mxu0 %vm424_vm1, %v9269_v57 }
0x1df4   : > { %8030 = vmatprep.mubr.msk.f32.mxu0 %vm8299_vm0, %v8298_v1 }
0x1e93   : > { %v5046_v39 = vpop.f32.mrf.mxu0 }
0x1e94   : > { %7950 = vmatmul.mubr.msk.f32.vlgmr.msra.gmra.mxu1 %vm856_vm2, %v5046_v39 }
0x1e95   : > { %v7940_v43 = vpop.f32.mrf.mxu0  ;;  %7976 = vmatpush3.msra.mxu1 %v6833_v38  ;;  %7952 = vmatprep.mubr.msk.f32.mxu1 %vm8299_vm0, %v8298_v1 }
0x1e96   : > { %7977 = vmatprep.subr.mxu1 %v8298_v1 }
0x1e97   : > { %v5051_v46 = vpop.f32.mrf.mxu0  ;;  %7978 = vmatpush3.msra.mxu1 %v6832_v15 }
0x1e98   : > { %7953 = vmatmul.mubr.msk.f32.gmra.mxu1 %vm856_vm2, %v5051_v46  ;;  %7979 = vmatprep.subr.mxu1 %v8298_v1 }
0x1e99   : > { %v7943_v42 = vpop.f32.mrf.mxu0  ;;  %7955 = vmatprep.mubr.msk.f32.mxu1 %vm8299_vm0, %v8298_v1  ;;  %7980 = vmatpush3.msra.mxu1 %v6831_v27 }
0x1e9a   : > { %7981 = vmatprep.subr.mxu1 %v8298_v1 }
0x1e9b   : > { %v5056_v44 = vpop.f32.mrf.mxu0  ;;  %7982 = vmatpush3.msra.mxu1 %v6830_v40 }
0x1e9c   : > { %7956 = vmatmul.mubr.msk.f32.gmra.mxu1 %vm856_vm2, %v5056_v44  ;;  %8009 = vmatprep.subr.mxu1 %v8298_v1 }
0x1e9d   : > { %v7946_v47 = vpop.f32.mrf.mxu0  ;;  %7983 = vmatprep.mubr.msk.f32.mxu1 %vm8299_vm0, %v8298_v1 }
0x1e9f   : > { %v5233_v48 = vpop.f32.mrf.mxu0 }
0x1ea0   : > { %7984 = vmatmul.mubr.msk.f32.vlgmr.msra.gmra.mxu1 %vm424_vm1, %v9235_v53  ;;  %v5234_v26 = vadd.f32 %v6826_v22, %v5233_v48 }
0x1ea1   : > { %v7968_v49 = vpop.f32.mrf.mxu0  ;;  %7986 = vmatprep.mubr.msk.f32.mxu1 %vm8299_vm0, %v8298_v1 }
0x1ea3   : > { %v5238_v51 = vpop.f32.mrf.mxu0 }
0x1ea4   : > { %7987 = vmatmul.mubr.msk.f32.gmra.mxu1 %vm424_vm1, %v9249_v41  ;;  %v6844_v41 = vld [vmem:[%s10008_s4 + $0x17] ss:$0 sm:$0xff]  ;;  %v5239_v29 = vadd.f32 %v6826_v22, %v5238_v51 }
0x1ea5   : > { %v7971_v55 = vpop.f32.mrf.mxu0  ;;  %7989 = vmatprep.mubr.msk.f32.mxu1 %vm8299_vm0, %v8298_v1 }
0x1ea7   : > { %v5243_v56 = vpop.f32.mrf.mxu0 }
0x1ea8   : > { %7990 = vmatmul.mubr.msk.f32.gmra.mxu1 %vm424_vm1, %v9269_v57  ;;  %v5244_v31 = vadd.f32 %v6826_v22, %v5243_v56 }
0x1ea9   : > { %v7974_v19 = vpop.f32.mrf.mxu0  ;;  %8015 = vmatprep.mubr.msk.f32.mxu1 %vm8299_vm0, %v8298_v1 }
0x1eab   : > { %v5419_v53 = vpop.f32.mrf.mxu0 }
0x1eac   : > { %v5420_v57 = vadd.f32 %v6844_v41, %v5419_v53 }
0x1ead   : > { %v8002_v52 = vpop.f32.mrf.mxu0 }
0x1eaf   : > { %v5424_v54 = vpop.f32.mrf.mxu0 }
0x1eb0   : > { %v5425_v63 = vadd.f32 %v6844_v41, %v5424_v54 }
0x1eb1   : > { %v8005_v58 = vpop.f32.mrf.mxu0 }
0x1eb2   : > { %v6857_v58 = vld [vmem:[%s10009_s5 + $0x38] sm:$0xff] }
0x1eb3   : > { %v5429_v45 = vpop.f32.mrf.mxu0 }
0x1eb4   : > { %v5430_v60 = vadd.f32 %v6844_v41, %v5429_v45 }
0x1eb5   : > { %v8008_v62 = vpop.f32.mrf.mxu0 }
0x1eb6   : > { %8025 = vmatpush3.msra.mxu0 %v5430_v60 }
0x1eb7   : > { %8026 = vmatprep.subr.mxu0 %v8298_v1 }
0x1eb8   : > { %8027 = vmatpush3.msra.mxu0 %v5425_v63 }
0x1eb9   : > { %8028 = vmatprep.subr.mxu0 %v8298_v1 }
0x1eba   : > { %8029 = vmatpush3.msra.mxu0 %v5420_v57 }
0x1ebb   : > { %8050 = vmatprep.subr.mxu0 %v8298_v1 }
0x1f54   : > { %v5137_v50 = vpop.f32.mrf.mxu1 }
0x1f55   : > { %v9748_v8 = vadd.f32 %v5137_v50, %v4545_v5 }
0x1f56   : > { %v7951_v11 = vpop.f32.mrf.mxu1 }
0x1f58   : > { %v5142_v12 = vpop.f32.mrf.mxu1 }
0x1f59   : > { %v9752_v10 = vadd.f32 %v5142_v12, %v4550_v3 }
0x1f5a   : > { %v7954_v13 = vpop.f32.mrf.mxu1 }
0x1f5c   : > { %v5147_v37 = vpop.f32.mrf.mxu1 }
0x1f5d   : > { %v9756_v16 = vadd.f32 %v5147_v37, %v4555_v14 }
0x1f5e   : > { %v7957_v18 = vpop.f32.mrf.mxu1 }
0x1f60   : > { %v5326_v21 = vpop.f32.mrf.mxu1 }
0x1f61   : > { %v5327_v25 = vadd.f32 %v6835_v23, %v5326_v21 }
0x1f62   : > { %v7985_v20 = vpop.f32.mrf.mxu1 }
0x1f64   : > { %v5331_v7 = vpop.f32.mrf.mxu1 }
0x1f65   : > { %v5332_v61 = vadd.f32 %v6835_v23, %v5331_v7  ;;  %v6862_v7 = vld [vmem:[%s10012_s8 + $0xa] ss:$0 sm:$0xff] }
0x1f66   : > { %v7988_v6 = vpop.f32.mrf.mxu1 }
0x1f68   : > { %v5336_v32 = vpop.f32.mrf.mxu1 }
0x1f69   : > { %v5337_v4 = vadd.f32 %v6835_v23, %v5336_v32 }
0x1f6a   : > { %v7991_v24 = vpop.f32.mrf.mxu1 }
0x1f6b   : > { %8010 = vmatpush3.xpose.msk.msra.mxu1 %vm856_vm2, %v5337_v4 }
0x1f6c   : > { %8011 = vmatprep.subr.mxu1 %v8298_v1 }
0x1f6f   : > { %8012 = vmatpush3.xpose.msk.msra.mxu1 %vm856_vm2, %v5332_v61 }
0x1f70   : > { %8013 = vmatprep.subr.mxu1 %v8298_v1 }
0x1f73   : > { %8014 = vmatpush3.xpose.msk.msra.mxu1 %vm856_vm2, %v5327_v25 }
0x1f74   : > { %8039 = vmatprep.subr.mxu1 %v8298_v1 }
0x1f76   : > { %8016 = vmatmul.mubr.msk.f32.vlgmr.msra.gmra.mxu1 %vm856_vm2, %v5234_v26 }
0x1f77   : > { %8018 = vmatprep.mubr.msk.f32.mxu1 %vm8299_vm0, %v8298_v1  ;;  %8040 = vmatpush3.msra.mxu1 %v6857_v58 }
0x1f78   : > { %8067 = vmatprep.subr.mxu1 %v8298_v1 }
0x1f7a   : > { %8019 = vmatmul.mubr.msk.f32.gmra.mxu1 %vm856_vm2, %v5239_v29 }
0x1f7b   : > { %8021 = vmatprep.mubr.msk.f32.mxu1 %vm8299_vm0, %v8298_v1 }
0x1f7e   : > { %8022 = vmatmul.mubr.msk.f32.gmra.mxu1 %vm856_vm2, %v5244_v31 }
0x1f7f   : > { %8041 = vmatprep.mubr.msk.f32.mxu1 %vm8299_vm0, %v8298_v1 }
0x2036   : > { %v5517_v9 = vpop.f32.mrf.mxu1 }
0x2037   : > { %v5531_v28 = vmul.f32 0.35355338, %v5517_v9 }
0x2038   : > { %v8017_v33 = vpop.f32.mrf.mxu1 }
0x2039   : > { %v5534_v34 = vsel %vm958_vm3, %v5531_v28, -inf }
0x203a   : > { %5535 = vmax.xlane.f32.xlu0 %v5534_v34  ;;  %v5522_v0 = vpop.f32.mrf.mxu1 }
0x203b   : > { %v5532_v35 = vmul.f32 0.35355338, %v5522_v0 }
0x203c   : > { %v8020_v17 = vpop.f32.mrf.mxu1 }
0x203d   : > { %v5537_v36 = vsel %vm958_vm3, %v5532_v35, -inf }
0x203e   : > { %5538 = vmax.xlane.f32.xlu1 %v5537_v36  ;;  %v5527_v38 = vpop.f32.mrf.mxu1 }
0x203f   : > { %v5533_v39 = vmul.f32 0.35355338, %v5527_v38 }
0x2040   : > { %v8023_v15 = vpop.f32.mrf.mxu1 }
0x2041   : > { %v5540_v43 = vsel %vm958_vm3, %v5533_v39, -inf }
0x2042   : > { %5541 = vmax.xlane.f32.xlu0 %v5540_v43 }
0x20c3   : > { %v5536_v27 = vpop.xlane.xlu0 %5535 }
0x20c4   : > { %v5543_v46 = vsub.f32 %v5531_v28, %v5536_v27 }
0x20c6   : > { %v5546_v40 = vmul.f32 1.442695, %v5543_v46 }
0x20c7   : > { %v5539_v42 = vpop.xlane.xlu1 %5538 }
0x20c8   : > { %8244 = vpow2.f32 %v5546_v40  ;;  %v5544_v44 = vsub.f32 %v5532_v35, %v5539_v42  ;;  %v6870_v40 = vld [vmem:[%s10010_s6 + $0x38] sm:$0xff]  ;;  %v6869_v42 = vld [vmem:[%s10010_s6 + $0x30] sm:$0xff] }
0x20ca   : > { %v5548_v47 = vmul.f32 1.442695, %v5544_v44  ;;  %v6868_v44 = vld [vmem:[%s10010_s6 + $0x28] sm:$0xff] }
0x20cb   : > { %v5542_v48 = vpop.xlane.xlu0 %5541 }
0x20cc   : > { %8246 = vpow2.f32 %v5548_v47  ;;  %v5545_v49 = vsub.f32 %v5533_v39, %v5542_v48  ;;  %v6867_v47 = vld [vmem:[%s10010_s6 + $0x20] sm:$0xff] }
0x20ce   : > { %v5550_v51 = vmul.f32 1.442695, %v5545_v49 }
0x20d0   : > { %8248 = vpow2.f32 %v5550_v51 }
0x20d5   : > { %v8245_v55 = vpop.eup %8244 }
0x20d6   : > { %v5552_v56 = vsel %vm958_vm3, %v8245_v55, 0.0 }
0x20d7   : > { %5553 = vadd.xlane.f32.xlu1 %v5552_v56 }
0x20d9   : > { %v8247_v19 = vpop.eup %8246 }
0x20da   : > { %v5555_v53 = vsel %vm958_vm3, %v8247_v19, 0.0 }
0x20db   : > { %5556 = vadd.xlane.f32.xlu0 %v5555_v53 }
0x20dd   : > { %v8249_v52 = vpop.eup %8248 }
0x20de   : > { %v5558_v54 = vsel %vm958_vm3, %v8249_v52, 0.0 }
0x20df   : > { %5559 = vadd.xlane.f32.xlu1 %v5558_v54 }
0x2160   : > { %v5554_v41 = vpop.xlane.xlu1 %5553 }
0x2161   : > { %8250 = vrcp.f32 %v5554_v41  ;;  %v6865_v41 = vld [vmem:[%s10012_s8 + $0xb] ss:$0 sm:$0xff] }
0x2164   : > { %v5557_v45 = vpop.xlane.xlu0 %5556 }
0x2165   : > { %8252 = vrcp.f32 %v5557_v45 }
0x2168   : > { %v5560_v60 = vpop.xlane.xlu1 %5559 }
0x2169   : > { %8254 = vrcp.f32 %v5560_v60  ;;  %v6866_v60 = vld [vmem:[%s10012_s8 + $0xc] ss:$0 sm:$0xff] }
0x216e   : > { %v8251_v62 = vpop.eup %8250 }
0x216f   : > { %v5564_v63 = vmul.f32 %v8251_v62, %v8245_v55 }
0x2171   : > { %8031 = vmatmul.mubr.msk.f32.vlgmr.msra.gmra.mxu0 %vm958_vm3, %v5564_v63 }
0x2172   : > { %v8253_v57 = vpop.eup %8252  ;;  %8033 = vmatprep.mubr.msk.f32.mxu0 %vm8299_vm0, %v8298_v1  ;;  %8051 = vmatpush3.msra.mxu0 %v6870_v40 }
0x2173   : > { %v5565_v5 = vmul.f32 %v8253_v57, %v8247_v19  ;;  %8052 = vmatprep.subr.mxu0 %v8298_v1 }
0x2174   : > { %8053 = vmatpush3.msra.mxu0 %v6869_v42 }
0x2175   : > { %8034 = vmatmul.mubr.msk.f32.gmra.mxu0 %vm958_vm3, %v5565_v5  ;;  %8054 = vmatprep.subr.mxu0 %v8298_v1 }
0x2176   : > { %v8255_v50 = vpop.eup %8254  ;;  %8036 = vmatprep.mubr.msk.f32.mxu0 %vm8299_vm0, %v8298_v1  ;;  %8055 = vmatpush3.msra.mxu0 %v6868_v44 }
0x2177   : > { %v5566_v11 = vmul.f32 %v8255_v50, %v8249_v52  ;;  %8056 = vmatprep.subr.mxu0 %v8298_v1 }
0x2178   : > { %8057 = vmatpush3.msra.mxu0 %v6867_v47 }
0x2179   : > { %8037 = vmatmul.mubr.msk.f32.gmra.mxu0 %vm958_vm3, %v5566_v11 }
0x217a   : > { %8058 = vmatprep.mubr.msk.f32.mxu0 %vm8299_vm0, %v8298_v1 }
0x2231   : > { %v5642_v3 = vpop.f32.mrf.mxu0 }
0x2232   : > { %8042 = vmatmul.mubr.msk.f32.vlgmr.msra.gmra.mxu1 %vm856_vm2, %v5642_v3 }
0x2233   : > { %v8032_v12 = vpop.f32.mrf.mxu0  ;;  %8044 = vmatprep.mubr.msk.f32.mxu1 %vm8299_vm0, %v8298_v1 }
0x2235   : > { %v5647_v13 = vpop.f32.mrf.mxu0 }
0x2236   : > { %8045 = vmatmul.mubr.msk.f32.gmra.mxu1 %vm856_vm2, %v5647_v13 }
0x2237   : > { %v8035_v14 = vpop.f32.mrf.mxu0  ;;  %8047 = vmatprep.mubr.msk.f32.mxu1 %vm8299_vm0, %v8298_v1 }
0x2239   : > { %v5652_v37 = vpop.f32.mrf.mxu0 }
0x223a   : > { %8048 = vmatmul.mubr.msk.f32.gmra.mxu1 %vm856_vm2, %v5652_v37  ;;  %v6883_v37 = vld [vmem:[%s10011_s7 + $0x78] sm:$0xff] }
0x223b   : > { %v8038_v18 = vpop.f32.mrf.mxu0  ;;  %8083 = vmatprep.mubr.msk.f32.mxu1 %vm8299_vm0, %v8298_v1  ;;  %8068 = vmatpush3.msra.mxu1 %v6883_v37 }
0x223c   : > { %8069 = vmatprep.subr.mxu1 %v8298_v1  ;;  %v6882_v18 = vld [vmem:[%s10011_s7 + $0x70] sm:$0xff] }
0x223d   : > { %8070 = vmatpush3.msra.mxu1 %v6882_v18 }
0x223e   : > { %8071 = vmatprep.subr.mxu1 %v8298_v1 }
0x22f2   : > { %v5733_v21 = vpop.f32.mrf.mxu1 }
0x22f3   : > { %v5747_v20 = vadd.f32 %v5733_v21, %v9748_v8  ;;  %v6881_v21 = vld [vmem:[%s10011_s7 + $0x68] sm:$0xff] }
0x22f4   : > { %v8043_v6 = vpop.f32.mrf.mxu1  ;;  %8072 = vmatpush3.msra.mxu1 %v6881_v21 }
0x22f5   : > { %v5750_v23 = vadd.f32 %v5747_v20, %v9177_v59  ;;  %8073 = vmatprep.subr.mxu1 %v8298_v1  ;;  %v6880_v20 = vld [vmem:[%s10011_s7 + $0x60] sm:$0xff]  ;;  %v6878_v6 = vld [vmem:[%s10011_s7 + $0x50] sm:$0xff] }
0x22f6   : > { %v5738_v32 = vpop.f32.mrf.mxu1  ;;  %8074 = vmatpush3.msra.mxu1 %v6880_v20 }
0x22f7   : > { %v9812_v4 = vadd.f32 %v6862_v7, %v5750_v23  ;;  %v5748_v24 = vadd.f32 %v5738_v32, %v9752_v10  ;;  %8075 = vmatprep.subr.mxu1 %v8298_v1  ;;  %v6877_v23 = vld [vmem:[%s10011_s7 + $0x48] sm:$0xff]  ;;  %v6876_v32 = vld [vmem:[%s10011_s7 + $0x40] sm:$0xff] }
0x22f8   : > { %v8046_v61 = vpop.f32.mrf.mxu1 }
0x22f9   : > { %v5751_v22 = vadd.f32 %v5748_v24, %v9182_v2  ;;  %v5763_v25 = vsel %vm424_vm1, %v9812_v4, 0.0  ;;  %v6872_v24 = vld [vmem:[%s10012_s8 + $0xd] ss:$0 sm:$0xff] }
0x22fa   : > { %5764 = vadd.xlane.f32.xlu0 %v5763_v25  ;;  %v5743_v8 = vpop.f32.mrf.mxu1 }
0x22fb   : > { %v9818_v26 = vadd.f32 %v6862_v7, %v5751_v22  ;;  %v5749_v29 = vadd.f32 %v5743_v8, %v9756_v16 }
0x22fc   : > { %v8049_v31 = vpop.f32.mrf.mxu1 }
0x22fd   : > { %v5752_v59 = vadd.f32 %v5749_v29, %v9187_v30  ;;  %v5766_v9 = vsel %vm424_vm1, %v9818_v26, 0.0 }
0x22fe   : > { %5767 = vadd.xlane.f32.xlu1 %v5766_v9 }
0x22ff   : > { %v9824_v10 = vadd.f32 %v6862_v7, %v5752_v59  ;;  %v6879_v7 = vld [vmem:[%s10011_s7 + $0x58] sm:$0xff] }
0x2300   : > { %8076 = vmatpush3.msra.mxu1 %v6879_v7 }
0x2301   : > { %v5769_v2 = vsel %vm424_vm1, %v9824_v10, 0.0  ;;  %8077 = vmatprep.subr.mxu1 %v8298_v1 }
0x2302   : > { %5770 = vadd.xlane.f32.xlu0 %v5769_v2  ;;  %8078 = vmatpush3.msra.mxu1 %v6878_v6 }
0x2303   : > { %8079 = vmatprep.subr.mxu1 %v8298_v1 }
0x2304   : > { %8080 = vmatpush3.msra.mxu1 %v6877_v23 }
0x2305   : > { %8081 = vmatprep.subr.mxu1 %v8298_v1 }
0x2306   : > { %8082 = vmatpush3.msra.mxu1 %v6876_v32 }
0x2383   : > { %v5765_v28 = vpop.xlane.xlu0 %5764 }
0x2384   : > { %v5772_v33 = vmul.f32 0.03125, %v5765_v28 }
0x2386   : > { %v5775_v34 = vsub.f32 %v9812_v4, %v5772_v33 }
0x2387   : > { %v5768_v0 = vpop.xlane.xlu1 %5767 }
0x2388   : > { %v5773_v35 = vmul.f32 0.03125, %v5768_v0  ;;  %v5778_v16 = vmul.f32 %v5775_v34, %v5775_v34 }
0x238a   : > { %v5776_v17 = vsub.f32 %v9818_v26, %v5773_v35  ;;  %v5781_v30 = vsel %vm424_vm1, %v5778_v16, 0.0 }
0x238b   : > { %5782 = vadd.xlane.f32.xlu1 %v5781_v30  ;;  %v5771_v36 = vpop.xlane.xlu0 %5770 }
0x238c   : > { %v5774_v38 = vmul.f32 0.03125, %v5771_v36  ;;  %v5779_v39 = vmul.f32 %v5776_v17, %v5776_v17 }
0x238e   : > { %v5777_v15 = vsub.f32 %v9824_v10, %v5774_v38  ;;  %v5784_v43 = vsel %vm424_vm1, %v5779_v39, 0.0 }
0x238f   : > { %5785 = vadd.xlane.f32.xlu0 %v5784_v43 }
0x2390   : > { %v5780_v27 = vmul.f32 %v5777_v15, %v5777_v15 }
0x2392   : > { %v5787_v46 = vsel %vm424_vm1, %v5780_v27, 0.0 }
0x2393   : > { %5788 = vadd.xlane.f32.xlu1 %v5787_v46 }
0x2414   : > { %v5783_v48 = vpop.xlane.xlu1 %5782 }
0x2415   : > { %v5790_v49 = vmul.f32 0.03125, %v5783_v48 }
0x2417   : > { %v5793_v51 = vadd.f32 1e-05, %v5790_v49 }
0x2418   : > { %v5786_v55 = vpop.xlane.xlu0 %5785 }
0x2419   : > { %8256 = vrsqrt.f32 %v5793_v51  ;;  %v5791_v56 = vmul.f32 0.03125, %v5786_v55 }
0x241b   : > { %v5794_v19 = vadd.f32 1e-05, %v5791_v56 }
0x241c   : > { %v5789_v53 = vpop.xlane.xlu1 %5788 }
0x241d   : > { %8258 = vrsqrt.f32 %v5794_v19  ;;  %v5792_v52 = vmul.f32 0.03125, %v5789_v53 }
0x241f   : > { %v5795_v54 = vadd.f32 1e-05, %v5792_v52 }
0x2421   : > { %8260 = vrsqrt.f32 %v5795_v54 }
0x2426   : > { %v8257_v58 = vpop.eup %8256 }
0x2427   : > { %v5799_v45 = vmul.f32 %v8257_v58, %v5775_v34 }
0x2429   : > { %v5806_v62 = vmul.f32 %v6865_v41, %v5799_v45 }
0x242a   : > { %v8259_v63 = vpop.eup %8258 }
0x242b   : > { %v5813_v57 = vadd.f32 %v6866_v60, %v5806_v62  ;;  %v5800_v5 = vmul.f32 %v8259_v63, %v5776_v17 }
0x242d   : > { %8059 = vmatmul.mubr.msk.f32.vlgmr.msra.gmra.mxu0 %vm424_vm1, %v5813_v57  ;;  %v5807_v50 = vmul.f32 %v6865_v41, %v5800_v5 }
0x242e   : > { %v8261_v11 = vpop.eup %8260  ;;  %8061 = vmatprep.mubr.msk.f32.mxu0 %vm8299_vm0, %v8298_v1 }
0x242f   : > { %v5801_v3 = vmul.f32 %v8261_v11, %v5777_v15  ;;  %v5814_v12 = vadd.f32 %v6866_v60, %v5807_v50 }
0x2431   : > { %8062 = vmatmul.mubr.msk.f32.gmra.mxu0 %vm424_vm1, %v5814_v12  ;;  %v5808_v13 = vmul.f32 %v6865_v41, %v5801_v3 }
0x2432   : > { %8064 = vmatprep.mubr.msk.f32.mxu0 %vm8299_vm0, %v8298_v1 }
0x2433   : > { %v5815_v14 = vadd.f32 %v6866_v60, %v5808_v13 }
0x2435   : > { %8065 = vmatmul.mubr.msk.f32.gmra.mxu0 %vm424_vm1, %v5815_v14 }
0x24ed   : > { %v5901_v61 = vpop.f32.mrf.mxu0 }
0x24ee   : > { %v9896_v22 = vadd.f32 %v6872_v24, %v5901_v61 }
0x24ef   : > { %v8060_v25 = vpop.f32.mrf.mxu0 }
0x24f0   : > { %v9899_v8 = vmul.f32 0.70710677, %v9896_v22 }
0x24f1   : > { %v5906_v29 = vpop.f32.mrf.mxu0 }
0x24f2   : > { %v5921_v31 = vand.u32 2147483647, %v9899_v8  ;;  %v9902_v59 = vadd.f32 %v6872_v24, %v5906_v29  ;;  %vm5981_vm8 = vcmp.lt.f32.partialorder %v9899_v8, 0.0 }
0x24f3   : > { %v8063_v9 = vpop.f32.mrf.mxu0 }
0x24f4   : > { %v5924_v2 = vmul.f32 0.3275911, %v5921_v31  ;;  %v9905_v28 = vmul.f32 0.70710677, %v9902_v59  ;;  %v5963_v15 = vsub.f32 0.0, %v5921_v31 }
0x24f5   : > { %v5911_v33 = vpop.f32.mrf.mxu0 }
0x24f6   : > { %v5927_v34 = vadd.f32 1.0, %v5924_v2  ;;  %v5922_v0 = vand.u32 2147483647, %v9905_v28  ;;  %v9908_v35 = vadd.f32 %v6872_v24, %v5911_v33  ;;  %v5966_v27 = vmul.f32 %v5963_v15, %v5921_v31 }
0x24f7   : > { %v8066_v16 = vpop.f32.mrf.mxu0  ;;  %vm5982_vm9 = vcmp.lt.f32.partialorder %v9905_v28, 0.0 }
0x24f8   : > { %8262 = vrcp.f32 %v5927_v34  ;;  %v5925_v17 = vmul.f32 0.3275911, %v5922_v0  ;;  %v9911_v30 = vmul.f32 0.70710677, %v9908_v35  ;;  %v5964_v46 = vsub.f32 0.0, %v5922_v0 }
0x24f9   : > { %v5969_v44 = vmul.f32 1.442695, %v5966_v27  ;;  %v5915_v34 = vmul.f32 0.5, %v9896_v22  ;;  %v5917_v28 = vmul.f32 0.5, %v9908_v35 }
0x24fa   : > { %v5928_v36 = vadd.f32 1.0, %v5925_v17  ;;  %v5923_v38 = vand.u32 2147483647, %v9911_v30  ;;  %v5967_v47 = vmul.f32 %v5964_v46, %v5922_v0  ;;  %vm5983_vm10 = vcmp.lt.f32.partialorder %v9911_v30, 0.0 }
0x24fc   : > { %8264 = vrcp.f32 %v5928_v36  ;;  %v5926_v39 = vmul.f32 0.3275911, %v5923_v38  ;;  %v5965_v48 = vsub.f32 0.0, %v5923_v38  ;;  %v5971_v19 = vmul.f32 1.442695, %v5967_v47 }
0x24fe   : > { %v5929_v43 = vadd.f32 1.0, %v5926_v39  ;;  %v5968_v53 = vmul.f32 %v5965_v48, %v5923_v38 }
0x2500   : > { %8266 = vrcp.f32 %v5929_v43  ;;  %v5973_v62 = vmul.f32 1.442695, %v5968_v53  ;;  %v5916_v43 = vmul.f32 0.5, %v9902_v59 }
0x2501   : > { %8268 = vpow2.f32 %v5969_v44  ;;  %v6885_v44 = vld [vmem:[%s10012_s8 + $0xe] ss:$0 sm:$0xff] }
0x2502   : > { %8270 = vpow2.f32 %v5971_v19 }
0x2503   : > { %8272 = vpow2.f32 %v5973_v62 }
0x2505   : > { %v8263_v40 = vpop.eup %8262 }
0x2506   : > { %v5936_v42 = vmul.f32 1.0614054, %v8263_v40 }
0x2508   : > { %v5939_v49 = vadd.f32 -1.4531521, %v5936_v42 }
0x2509   : > { %v8265_v51 = vpop.eup %8264 }
0x250a   : > { %v5942_v55 = vmul.f32 %v8263_v40, %v5939_v49  ;;  %v5937_v56 = vmul.f32 1.0614054, %v8265_v51 }
0x250c   : > { %v5945_v52 = vadd.f32 1.4214138, %v5942_v55  ;;  %v5940_v54 = vadd.f32 -1.4531521, %v5937_v56 }
0x250d   : > { %v8267_v58 = vpop.eup %8266 }
0x250e   : > { %v5948_v41 = vmul.f32 %v8263_v40, %v5945_v52  ;;  %v5943_v45 = vmul.f32 %v8265_v51, %v5940_v54  ;;  %v5938_v60 = vmul.f32 1.0614054, %v8267_v58  ;;  %v8269_v21 = vpop.eup %8268 }
0x250f   : > { %v8271_v61 = vpop.eup %8270 }
0x2510   : > { %v5951_v63 = vadd.f32 -0.28449672, %v5948_v41  ;;  %v5946_v57 = vadd.f32 1.4214138, %v5943_v45  ;;  %v5941_v5 = vadd.f32 -1.4531521, %v5938_v60  ;;  %v8273_v17 = vpop.eup %8272 }
0x2512   : > { %v5954_v50 = vmul.f32 %v8263_v40, %v5951_v63  ;;  %v5949_v11 = vmul.f32 %v8265_v51, %v5946_v57  ;;  %v5944_v3 = vmul.f32 %v8267_v58, %v5941_v5 }
0x2514   : > { %v5957_v12 = vadd.f32 0.2548296, %v5954_v50  ;;  %v5952_v13 = vadd.f32 -0.28449672, %v5949_v11  ;;  %v5947_v14 = vadd.f32 1.4214138, %v5944_v3 }
0x2516   : > { %v5960_v37 = vmul.f32 %v8263_v40, %v5957_v12  ;;  %v5955_v18 = vmul.f32 %v8265_v51, %v5952_v13  ;;  %v5950_v20 = vmul.f32 %v8267_v58, %v5947_v14 }
0x2518   : > { %v5975_v7 = vmul.f32 %v8269_v21, %v5960_v37  ;;  %v5958_v6 = vadd.f32 0.2548296, %v5955_v18  ;;  %v5953_v23 = vadd.f32 -0.28449672, %v5950_v20  ;;  %v6160_v18 = vld [vmem:[%s10014_s10 + $0x18] sm:$0xff]  ;;  %v6159_v21 = vld [vmem:[%s10014_s10 + $0x10] sm:$0xff] }
0x2519   : > { %8092 = vmatprep.subr.mxu0 %v6160_v18  ;;  %v6158_v20 = vld [vmem:[%s10014_s10 + $0x8] sm:$0xff] }
0x251a   : > { %v5978_v32 = vsub.f32 1.0, %v5975_v7  ;;  %v5961_v24 = vmul.f32 %v8265_v51, %v5958_v6  ;;  %v5956_v25 = vmul.f32 %v8267_v58, %v5953_v23  ;;  %8093 = vmatpush3.msra.mxu0 %v6160_v18  ;;  %v6157_v7 = vld [vmem:[%s10014_s10] sm:$0xff] }
0x251b   : > { %8094 = vmatprep.subr.mxu0 %v6159_v21 }
0x251c   : > { %v5984_v29 = vsub.f32 0.0, %v5978_v32  ;;  %v5976_v31 = vmul.f32 %v8271_v61, %v5961_v24  ;;  %v5959_v9 = vadd.f32 0.2548296, %v5956_v25  ;;  %8095 = vmatpush3.msra.mxu0 %v6159_v21 }
0x251d   : > { %8096 = vmatprep.subr.mxu0 %v6158_v20 }
0x251e   : > { %v5987_v2 = vsel %vm5981_vm8, %v5984_v29, %v5978_v32  ;;  %v5979_v33 = vsub.f32 1.0, %v5976_v31  ;;  %v5962_v16 = vmul.f32 %v8267_v58, %v5959_v9  ;;  %8097 = vmatpush3.msra.mxu0 %v6158_v20 }
0x251f   : > { %v5990_v0 = vadd.f32 1.0, %v5987_v2  ;;  %8098 = vmatprep.subr.mxu0 %v6157_v7 }
0x2520   : > { %v5985_v36 = vsub.f32 0.0, %v5979_v33  ;;  %v5977_v39 = vmul.f32 %v8273_v17, %v5962_v16  ;;  %8099 = vmatpush3.msra.mxu0 %v6157_v7 }
0x2521   : > { %v5993_v38 = vmul.f32 %v5990_v0, %v5915_v34  ;;  %8103 = vmatprep.subr.mxu0 %v8298_v1  ;;  %v6890_v0 = vld [vmem:[%s10013_s9 + $0x1] ss:$0 sm:$0xff] }
0x2522   : > { %v5988_v15 = vsel %vm5982_vm9, %v5985_v36, %v5979_v33  ;;  %v5980_v46 = vsub.f32 1.0, %v5977_v39  ;;  %v6889_v33 = vld [vmem:[%s10013_s9] ss:$0 sm:$0xff] }
0x2523   : > { %v5991_v27 = vadd.f32 1.0, %v5988_v15  ;;  %8084 = vmatmul.mubr.msk.f32.vlgmr.msra.gmra.mxu1 %vm3214_vm5, %v5993_v38 }
0x2524   : > { %8086 = vmatprep.mubr.msk.f32.mxu1 %vm8299_vm0, %v8298_v1  ;;  %v5986_v22 = vsub.f32 0.0, %v5980_v46 }
0x2525   : > { %v5994_v8 = vmul.f32 %v5991_v27, %v5916_v43  ;;  %v6245_v27 = vld [vmem:[%s10015_s11 + $0x18] sm:$0xff] }
0x2526   : > { %v5989_v40 = vsel %vm5983_vm10, %v5986_v22, %v5980_v46 }
0x2527   : > { %8087 = vmatmul.mubr.msk.f32.gmra.mxu1 %vm3214_vm5, %v5994_v8  ;;  %v5992_v42 = vadd.f32 1.0, %v5989_v40  ;;  %v6244_v8 = vld [vmem:[%s10015_s11 + $0x10] sm:$0xff]  ;;  %v6243_v40 = vld [vmem:[%s10015_s11 + $0x8] sm:$0xff] }
0x2528   : > { %8089 = vmatprep.mubr.msk.f32.mxu1 %vm8299_vm0, %v8298_v1 }
0x2529   : > { %v5995_v59 = vmul.f32 %v5992_v42, %v5917_v28  ;;  %v6242_v28 = vld [vmem:[%s10015_s11] sm:$0xff] }
0x252b   : > { %8090 = vmatmul.mubr.msk.f32.gmra.mxu1 %vm3214_vm5, %v5995_v59 }
0x25e3   : > { %v6085_v47 = vpop.f32.mrf.mxu1 }
0x25e4   : > { %v6086_v48 = vadd.f32 %v6885_v44, %v6085_v47 }
0x25e5   : > { %v8085_v49 = vpop.f32.mrf.mxu1 }
0x25e6   : > { %v6099_v30 = vadd.f32 %v6086_v48, %v9812_v4 }
0x25e7   : > { %v6090_v51 = vpop.f32.mrf.mxu1 }
0x25e8   : > { %v6091_v55 = vadd.f32 %v6885_v44, %v6090_v51  ;;  %v6104_v35 = vsel %vm424_vm1, %v6099_v30, 0.0 }
0x25e9   : > { %6105 = vadd.xlane.f32.xlu0 %v6104_v35  ;;  %v8088_v56 = vpop.f32.mrf.mxu1 }
0x25ea   : > { %v6100_v19 = vadd.f32 %v6091_v55, %v9818_v26 }
0x25eb   : > { %v6095_v53 = vpop.f32.mrf.mxu1 }
0x25ec   : > { %v6107_v52 = vsel %vm424_vm1, %v6100_v19, 0.0  ;;  %v6096_v54 = vadd.f32 %v6885_v44, %v6095_v53 }
0x25ed   : > { %6108 = vadd.xlane.f32.xlu1 %v6107_v52  ;;  %v8091_v58 = vpop.f32.mrf.mxu1 }
0x25ee   : > { %v6101_v41 = vadd.f32 %v6096_v54, %v9824_v10 }
0x25f0   : > { %v6110_v45 = vsel %vm424_vm1, %v6101_v41, 0.0 }
0x25f1   : > { %6111 = vadd.xlane.f32.xlu0 %v6110_v45 }
0x2672   : > { %v6106_v4 = vpop.xlane.xlu0 %6105 }
0x2673   : > { %v6113_v60 = vmul.f32 0.03125, %v6106_v4 }
0x2675   : > { %v6116_v62 = vsub.f32 %v6099_v30, %v6113_v60 }
0x2676   : > { %v6109_v63 = vpop.xlane.xlu1 %6108 }
0x2677   : > { %v6114_v57 = vmul.f32 0.03125, %v6109_v63  ;;  %v6119_v5 = vmul.f32 %v6116_v62, %v6116_v62 }
0x2679   : > { %v6117_v50 = vsub.f32 %v6100_v19, %v6114_v57  ;;  %v6122_v26 = vsel %vm424_vm1, %v6119_v5, 0.0 }
0x267a   : > { %6123 = vadd.xlane.f32.xlu1 %v6122_v26  ;;  %v6112_v11 = vpop.xlane.xlu0 %6111 }
0x267b   : > { %v6120_v3 = vmul.f32 %v6117_v50, %v6117_v50  ;;  %v6115_v12 = vmul.f32 0.03125, %v6112_v11 }
0x267d   : > { %v6125_v13 = vsel %vm424_vm1, %v6120_v3, 0.0  ;;  %v6118_v14 = vsub.f32 %v6101_v41, %v6115_v12 }
0x267e   : > { %6126 = vadd.xlane.f32.xlu0 %v6125_v13 }
0x267f   : > { %v6121_v10 = vmul.f32 %v6118_v14, %v6118_v14 }
0x2681   : > { %v6128_v37 = vsel %vm424_vm1, %v6121_v10, 0.0 }
0x2682   : > { %6129 = vadd.xlane.f32.xlu1 %v6128_v37 }
0x2703   : > { %v6124_v6 = vpop.xlane.xlu1 %6123 }
0x2704   : > { %v6131_v23 = vmul.f32 0.03125, %v6124_v6 }
0x2706   : > { %v6134_v32 = vadd.f32 1e-05, %v6131_v23 }
0x2707   : > { %v6127_v24 = vpop.xlane.xlu0 %6126 }
0x2708   : > { %8274 = vrsqrt.f32 %v6134_v32  ;;  %v6132_v61 = vmul.f32 0.03125, %v6127_v24  ;;  %v6897_v24 = vld [vmem:[%s10013_s9 + $0x2] ss:$0 sm:$0xff] }
0x270a   : > { %v6135_v25 = vadd.f32 1e-05, %v6132_v61 }
0x270b   : > { %v6130_v29 = vpop.xlane.xlu1 %6129 }
0x270c   : > { %8276 = vrsqrt.f32 %v6135_v25  ;;  %v6133_v31 = vmul.f32 0.03125, %v6130_v29  ;;  %v6898_v29 = vld [vmem:[%s10013_s9 + $0x3] ss:$0 sm:$0xff] }
0x270e   : > { %v6136_v9 = vadd.f32 1e-05, %v6133_v31 }
0x2710   : > { %8278 = vrsqrt.f32 %v6136_v9 }
0x2715   : > { %v8275_v2 = vpop.eup %8274 }
0x2716   : > { %v6140_v34 = vmul.f32 %v8275_v2, %v6116_v62 }
0x2718   : > { %v6147_v16 = vmul.f32 %v6889_v33, %v6140_v34 }
0x2719   : > { %v8277_v17 = vpop.eup %8276 }
0x271a   : > { %v6141_v36 = vmul.f32 %v8277_v17, %v6117_v50  ;;  %v6154_v38 = vadd.f32 %v6890_v0, %v6147_v16 }
0x271c   : > { %v6148_v39 = vmul.f32 %v6889_v33, %v6141_v36  ;;  %8100 = vmatprep.mubr.msk.f32.mxu0 %vm424_vm1, %v6154_v38 }
0x271d   : > { %v8279_v15 = vpop.eup %8278 }
0x271e   : > { %v6155_v43 = vadd.f32 %v6890_v0, %v6148_v39  ;;  %v6142_v46 = vmul.f32 %v8279_v15, %v6118_v14 }
0x2720   : > { %8101 = vmatmul.mubr.msk.f32.vlgmr.msra.gmra.mxu0 %vm424_vm1, %v6155_v43  ;;  %v6149_v22 = vmul.f32 %v6889_v33, %v6142_v46 }
0x2721   : > { %8104 = vmatpush3.msra.mxu0 %v6245_v27  ;;  %8111 = vmatprep.mubr.msk.f32.mxu0 %vm8299_vm0, %v8298_v1 }
0x2722   : > { %8105 = vmatprep.subr.mxu0 %v8298_v1  ;;  %v6156_v42 = vadd.f32 %v6890_v0, %v6149_v22 }
0x2723   : > { %8106 = vmatpush3.msra.mxu0 %v6244_v8 }
0x2724   : > { %8107 = vmatprep.subr.mxu0 %v8298_v1 }
0x2725   : > { %8108 = vmatpush3.msra.mxu0 %v6243_v40 }
0x2726   : > { %8109 = vmatprep.subr.mxu0 %v8298_v1 }
0x2727   : > { %8110 = vmatpush3.msra.mxu0 %v6242_v28 }
0x2728   : > { %8112 = vmatmul.mubr.msk.f32.vlgmr.msra.gmra.mxu0 %vm424_vm1, %v6156_v42 }
0x27e0   : > { %v8102_v59 = vpop.f32.mrf.mxu0 }
0x27e1   : > { %v6320_v55 = vmul.f32 %v8102_v59, %v8102_v59 }
0x27e2   : > { %v6233_v44 = vpop.f32.mrf.mxu0 }
0x27e3   : > { %v6319_v47 = vmul.f32 %v6233_v44, %v6233_v44  ;;  %v6324_v56 = vsel %vm424_vm1, %v6320_v55, 0.0 }
0x27e5   : > { %v6321_v48 = vsel %vm424_vm1, %v6319_v47, 0.0 }
0x27e6   : > { %6322 = vadd.xlane.f32.xlu1 %v6321_v48 }
0x27e8   : > { %v6315_v49 = vpop.f32.mrf.mxu0 }
0x27e9   : > { %v6331_v30 = vmul.f32 %v6315_v49, %v6315_v49 }
0x27ea   : > { %v8113_v51 = vpop.f32.mrf.mxu0 }
0x27eb   : > { %v6332_v35 = vsel %vm424_vm1, %v6331_v30, 0.0 }
0x27ec   : > { %6333 = vadd.xlane.f32.xlu0 %v6332_v35 }
0x27f0   : > { %6325 = vadd.xlane.f32.xlu0 %v6324_v56 }
0x286f   : > { %v6323_v1 = vpop.xlane.xlu1 %6322 }
0x2870   : > { %8280 = vrsqrt.f32 %v6323_v1 }
0x2875   : > { %v6334_v19 = vpop.xlane.xlu0 %6333 }
0x2876   : > { %8282 = vrsqrt.f32 %v6334_v19 }
0x2879   : > { %v6326_v53 = vpop.xlane.xlu0 %6325 }
0x287a   : > { %8284 = vrsqrt.f32 %v6326_v53 }
0x287d   : > { %v8281_v52 = vpop.eup %8280 }
0x287e   : > { %v6329_v54 = vmul.f32 %v8281_v52, %v6233_v44 }
0x2880   : > { %8116 = vmatprep.mubr.msk.f32.mxu0 %vm424_vm1, %v6329_v54 }
0x2883   : > { %v8283_v58 = vpop.eup %8282 }
0x2884   : > { %v6336_v41 = vmul.f32 %v8283_v58, %v6315_v49 }
0x2886   : > { %8114 = vmatprep.subr.msk.mxu0 %vm424_vm1, %v6336_v41 }
0x2887   : > { %v8285_v45 = vpop.eup %8284  ;;  %8115 = vmatpush3.xpose.msk.msra.mxu0 %vm424_vm1, %v6336_v41 }
0x2888   : > { %v6330_v4 = vmul.f32 %v8285_v45, %v8102_v59 }
0x288a   : > { %8117 = vmatmul.mubr.msk.f32.vlgmr.msra.gmra.mxu0 %vm424_vm1, %v6330_v4 }
0x294a   : > { %v8118_v60 = vpop.f32.mrf.mxu0 }
0x294b   : > { %v6426_v62 = vsel %vm856_vm2, %v8118_v60, 0.0 }
0x294c   : > { %6427 = vadd.xlane.f32.xlu0 %v6426_v62  ;;  %v6412_v63 = vpop.f32.mrf.mxu0 }
0x294d   : > { %v6423_v57 = vsel %vm856_vm2, %v6412_v63, 0.0 }
0x294e   : > { %6424 = vadd.xlane.f32.xlu1 %v6423_v57 }
0x29d5   : > { %v6428_v5 = vpop.xlane.xlu0 %6427 }
0x29d6   : > { %v6431_v50 = vmul.f32 0.125, %v6428_v5 }
0x29d7   : > { %v6425_v26 = vpop.xlane.xlu1 %6424 }
0x29d8   : > { %v6433_v11 = vsub.f32 %v8118_v60, %v6431_v50  ;;  %v6430_v3 = vmul.f32 0.125, %v6425_v26 }
0x29da   : > { %v6432_v12 = vsub.f32 %v6412_v63, %v6430_v3  ;;  %v6435_v13 = vmul.f32 %v6433_v11, %v6433_v11 }
0x29dc   : > { %v6439_v14 = vsel %vm856_vm2, %v6435_v13, 0.0  ;;  %v6434_v10 = vmul.f32 %v6432_v12, %v6432_v12 }
0x29dd   : > { %6440 = vadd.xlane.f32.xlu0 %v6439_v14 }
0x29de   : > { %v6436_v37 = vsel %vm856_vm2, %v6434_v10, 0.0 }
0x29df   : > { %6437 = vadd.xlane.f32.xlu1 %v6436_v37 }
0x2a66   : > { %v6441_v18 = vpop.xlane.xlu0 %6440 }
0x2a67   : > { %v6443_v21 = vmul.f32 0.125, %v6441_v18 }
0x2a68   : > { %v6438_v20 = vpop.xlane.xlu1 %6437 }
0x2a69   : > { %v6445_v7 = vadd.f32 1e-05, %v6443_v21  ;;  %v6442_v6 = vmul.f32 0.125, %v6438_v20 }
0x2a6b   : > { %8286 = vrsqrt.f32 %v6445_v7  ;;  %v6444_v23 = vadd.f32 1e-05, %v6442_v6 }
0x2a6d   : > { %8288 = vrsqrt.f32 %v6444_v23 }
0x2a78   : > { %v8287_v32 = vpop.eup %8286 }
0x2a79   : > { %v6449_v61 = vmul.f32 %v8287_v32, %v6433_v11 }
0x2a7a   : > { %v8289_v25 = vpop.eup %8288 }
0x2a7b   : > { %v6455_v31 = vmul.f32 %v6897_v24, %v6449_v61  ;;  %v6448_v9 = vmul.f32 %v8289_v25, %v6432_v12 }
0x2a7d   : > { %v6461_v2 = vadd.f32 %v6898_v29, %v6455_v31  ;;  %v6454_v33 = vmul.f32 %v6897_v24, %v6448_v9 }
0x2a7f   : > { %6463 = vst.msk [vmem:[%s413_s14 + $0x8] sm:$0xff] %vm856_vm2, %v6461_v2  ;;  %v6460_v34 = vadd.f32 %v6898_v29, %v6454_v33 }
0x2a81   : > { %6462 = vst.msk [vmem:[%s413_s14] sm:$0xff] %vm856_vm2, %v6460_v34 }
0x2a82 PF: > { %s22_s21 = sadd.s32 1, %s8296_s21  }
0x2a83   : > { %p19_p4 = scmp.ge.s32.totalorder %s22_s21, 4  }
0x2a85   :  { %21 = sbr.rel (!%p19_p4) target bundleno = 1 (0x1), region = 154 }

</bundles_post_ra>
